<compile_context>
chip_gen: v7x
topology: tpu7x:2x2x1
jax: 0.10.0
libtpu: 0.0.40
codegen_flags: <defaults>
</compile_context>

<pallas_src>
import functools

import jax
import jax.numpy as jnp
from jax.experimental import pallas as pl
from jax.experimental.pallas import tpu as pltpu


def _round_up(x, m):
    return (x + m - 1) // m * m


def _bilstm_kernel(gxf_ref, gxb_ref, mf_ref, mb_ref, whh_ref, bias_ref,
                   outf_ref, outb_ref, hf_sc, cf_sc, hb_sc, cb_sc,
                   *, hidden, chunk):
    """Fused fwd+bwd masked-LSTM recurrence over one (batch-tile, time-chunk).

    grid = (batch tile b [parallel], time chunk t [sequential recurrence]).
    The x-projection has been hoisted out; each timestep only does the two
    independent recurrent h @ W_hh matmuls (fwd + bwd -> ILP).

    gxf_ref  : (T, B, 4H) bf16  x@W_ih^T, fwd direction, time chunk t
    gxb_ref  : (T, B, 4H) bf16  x@W_ih^T, bwd direction, time chunk nT-1-t
    mf_ref   : (T, B, 1)  f32   mask chunk t          (1 = real token)
    mb_ref   : (T, B, 1)  f32   mask chunk nT-1-t
    whh_ref  : (2, H, 4H) bf16  recurrent weights, resident (single-buffered)
    bias_ref : (2, 4H)    f32   gate bias, resident (single-buffered)
    outf_ref : (T, B, H)  f32   fwd hiddens for chunk t
    outb_ref : (T, B, H)  f32   bwd hiddens for chunk nT-1-t
    h*_sc/c*_sc : (B, H)  f32   per-direction state carried across time chunks
    """
    t = pl.program_id(1)
    H = hidden
    T = chunk
    Brows = hf_sc.shape[0]

    @pl.when(t == 0)
    def _():
        hf_sc[...] = jnp.zeros_like(hf_sc)
        cf_sc[...] = jnp.zeros_like(cf_sc)
        hb_sc[...] = jnp.zeros_like(hb_sc)
        cb_sc[...] = jnp.zeros_like(cb_sc)

    w_f = whh_ref[0]                              # (H, 4H) bf16, VMEM-resident
    w_b = whh_ref[1]
    # Hoisted f32 bias broadcasts: once per grid step, not per unrolled step.
    b_f = jnp.broadcast_to(bias_ref[0:1, :], (Brows, 4 * H))
    b_b = jnp.broadcast_to(bias_ref[1:2, :], (Brows, 4 * H))

    def cell(gates, c):
        i_g = jax.nn.sigmoid(gates[:, 0 * H:1 * H])
        f_g = jax.nn.sigmoid(gates[:, 1 * H:2 * H])
        g_g = jnp.tanh(gates[:, 2 * H:3 * H])
        o_g = jax.nn.sigmoid(gates[:, 3 * H:4 * H])
        c_new = f_g * c + i_g * g_g
        h_new = o_g * jnp.tanh(c_new)
        return h_new, c_new

    def step(i, carry):
        hf, cf, hb, cb = carry
        j = T - 1 - i                 # bwd within-chunk index (static after unroll)
        # Two independent recurrent matmuls back-to-back -> MXU/EUP overlap.
        mm_f = jnp.dot(hf.astype(jnp.bfloat16), w_f,
                       preferred_element_type=jnp.float32)
        mm_b = jnp.dot(hb.astype(jnp.bfloat16), w_b,
                       preferred_element_type=jnp.float32)
        gates_f = gxf_ref[i].astype(jnp.float32) + b_f + mm_f
        gates_b = gxb_ref[j].astype(jnp.float32) + b_b + mm_b
        hf_new, cf_new = cell(gates_f, cf)
        hb_new, cb_new = cell(gates_b, cb)
        keep_f = mf_ref[i] > 0.5      # (B, 1) bool, broadcasts over H lanes
        keep_b = mb_ref[j] > 0.5
        hf = jnp.where(keep_f, hf_new, hf)   # padded steps carry the state
        cf = jnp.where(keep_f, cf_new, cf)
        hb = jnp.where(keep_b, hb_new, hb)
        cb = jnp.where(keep_b, cb_new, cb)
        outf_ref[i] = hf
        outb_ref[j] = hb
        return hf, cf, hb, cb

    hf, cf, hb, cb = jax.lax.fori_loop(
        0, T, step, (hf_sc[...], cf_sc[...], hb_sc[...], cb_sc[...]),
        unroll=True)
    hf_sc[...] = hf
    cf_sc[...] = cf
    hb_sc[...] = hb
    cb_sc[...] = cb


def _pad_gate_cols(w, H, Hp):
    """Zero-pad the 4H (gate) axis per-gate: [..., 4H] -> [..., 4Hp]."""
    if Hp == H:
        return w
    lead = w.shape[:-1]
    w4 = w.reshape(lead + (4, H))
    w4 = jnp.pad(w4, [(0, 0)] * len(lead) + [(0, 0), (0, Hp - H)])
    return w4.reshape(lead + (4 * Hp,))


def _prep_direction(p, H, Hp):
    w_ih = _pad_gate_cols(p["w_ih_t"], H, Hp)                      # (E, 4Hp)
    w_hh = p["w_hh_t"]
    if Hp != H:
        w_hh = jnp.pad(w_hh, ((0, Hp - H), (0, 0)))
    w_hh = _pad_gate_cols(w_hh, H, Hp)                             # (Hp, 4Hp)
    bias = _pad_gate_cols(p["bias"], H, Hp)                        # (4Hp,)
    return w_ih, w_hh, bias


def _pick_time_chunk(requested, L, Bp_t, Hp, budget_bytes):
    """Largest T <= min(requested, L) whose VMEM footprint fits the budget."""
    def est(T):
        gx = 2 * 2 * T * Bp_t * (4 * Hp) * 2     # 2 dirs x 2 buffers, bf16
        mk = 2 * 2 * T * Bp_t * 128 * 4          # masks (lane-padded), f32
        out = 2 * 2 * T * Bp_t * Hp * 4          # 2 dirs x 2 buffers, f32
        whh = 2 * 2 * Hp * (4 * Hp) * 2          # single-buffered + value copy
        bias = 8 * (4 * Hp) * 4
        scr = 4 * Bp_t * Hp * 4
        return gx + mk + out + whh + bias + scr
    t = max(1, min(requested, L))
    while t > 1 and est(t) > budget_bytes:
        t = max(1, t // 2)
    return t


def _prepare(x, x_mask, params, *, time_chunk, batch_tile, vmem_budget_bytes):
    """Shared preprocessing: padding + the hoisted bf16 input-projection GEMM.

    Used by both the Pallas encoder and the pure-JAX reference so that the
    bf16-rounded gates_x values are bit-identical between the two.
    """
    B, L, E = x.shape
    H = params["hidden_size"]
    Hp = _round_up(H, 128)         # lane-aligned gate slices & dense stores
    Bp = _round_up(B, 8)           # full f32 sublanes / MXU rows
    if Bp > batch_tile:
        Bp_t = _round_up(batch_tile, 8)
        Bp = _round_up(Bp, Bp_t)
    else:
        Bp_t = Bp
    T = _pick_time_chunk(time_chunk, L, Bp_t, Hp, vmem_budget_bytes)
    Lp = _round_up(L, T)

    mask = x_mask.astype(jnp.float32)
    x_p = jnp.pad(x, ((0, Bp - B), (0, Lp - L), (0, 0)))
    m_p = jnp.pad(mask, ((0, Bp - B), (0, Lp - L)))                # pads = 0

    wf_ih, wf_hh, bf_ = _prep_direction(params["fwd"], H, Hp)
    wb_ih, wb_hh, bb_ = _prep_direction(params["bwd"], H, Hp)
    w_ih = jnp.stack([wf_ih, wb_ih]).astype(jnp.bfloat16)          # (2, E, 4Hp)
    w_hh = jnp.stack([wf_hh, wb_hh]).astype(jnp.bfloat16)          # (2, Hp, 4Hp)
    bias = jnp.stack([bf_, bb_]).astype(jnp.float32)               # (2, 4Hp)

    # Hoisted input projection: one large bf16 GEMM for both directions and
    # all timesteps (also does the [B,L]->[L,B] transpose). Bias is NOT added
    # here (added in-kernel in f32), and the result is stored bf16 to halve
    # the dominant HBM stream of the bandwidth-bound recurrence.
    gates_x = jnp.einsum("ble,deg->dlbg", x_p.astype(jnp.bfloat16), w_ih,
                         preferred_element_type=jnp.float32
                         ).astype(jnp.bfloat16)                    # (2,Lp,Bp,4Hp)

    m_lb1 = jnp.transpose(m_p, (1, 0))[:, :, None]                 # (Lp, Bp, 1)

    dims = dict(B=B, L=L, H=H, Hp=Hp, Bp=Bp, Bp_t=Bp_t, T=T, Lp=Lp,
                nB=Bp // Bp_t, nT=Lp // T)
    return gates_x, m_lb1, w_hh, bias, dims


def bilstm_encoder(x, x_mask, params, *, time_chunk=32, batch_tile=64,
                   vmem_budget_bytes=44 * 1024 * 1024):
    """BiLSTMEncoder.forward.

    x:      [B, L, E] float32 embeddings
    x_mask: [B, L]    {0,1} mask (0 = padding)
    returns [B, L, 2H] float32
    """
    gates_x, m_lb1, w_hh, bias, d = _prepare(
        x, x_mask, params, time_chunk=time_chunk, batch_tile=batch_tile,
        vmem_budget_bytes=vmem_budget_bytes)
    B, L, H, Hp = d["B"], d["L"], d["H"], d["Hp"]
    Bp, Bp_t, T, Lp, nB, nT = (d["Bp"], d["Bp_t"], d["T"], d["Lp"],
                               d["nB"], d["nT"])

    kernel = functools.partial(_bilstm_kernel, hidden=Hp, chunk=T)
    resident = pl.Buffered(1)     # constant-index blocks: single VMEM buffer

    out_f, out_b = pl.pallas_call(
        kernel,
        out_shape=(jax.ShapeDtypeStruct((Lp, Bp, Hp), jnp.float32),
                   jax.ShapeDtypeStruct((Lp, Bp, Hp), jnp.float32)),
        grid_spec=pltpu.PrefetchScalarGridSpec(
            num_scalar_prefetch=0,
            grid=(nB, nT),
            in_specs=[
                # fwd gx: time chunk t; bwd gx: time chunk nT-1-t (the sequence
                # reversal is pure index arithmetic -- no HBM reverse copies)
                pl.BlockSpec((None, T, Bp_t, 4 * Hp),
                             lambda b, t: (0, t, b, 0)),
                pl.BlockSpec((None, T, Bp_t, 4 * Hp),
                             lambda b, t: (1, nT - 1 - t, b, 0)),
                pl.BlockSpec((T, Bp_t, 1), lambda b, t: (t, b, 0)),
                pl.BlockSpec((T, Bp_t, 1), lambda b, t: (nT - 1 - t, b, 0)),
                # resident recurrent weights + bias, single-buffered
                pl.BlockSpec((2, Hp, 4 * Hp), lambda b, t: (0, 0, 0),
                             pipeline_mode=resident),
                pl.BlockSpec((2, 4 * Hp), lambda b, t: (0, 0),
                             pipeline_mode=resident),
            ],
            out_specs=[
                pl.BlockSpec((T, Bp_t, Hp), lambda b, t: (t, b, 0)),
                pl.BlockSpec((T, Bp_t, Hp), lambda b, t: (nT - 1 - t, b, 0)),
            ],
            scratch_shapes=[
                pltpu.VMEM((Bp_t, Hp), jnp.float32),   # h fwd
                pltpu.VMEM((Bp_t, Hp), jnp.float32),   # c fwd
                pltpu.VMEM((Bp_t, Hp), jnp.float32),   # h bwd
                pltpu.VMEM((Bp_t, Hp), jnp.float32),   # c bwd
            ],
        ),
        compiler_params=pltpu.CompilerParams(
            # batch tiles are independent (megacore split when nB > 1); the
            # time axis is the sequential recurrence.
            dimension_semantics=("parallel", "arbitrary"),
            # Above the default scoped limit on v5e/v6e, below v7x's 64 MiB.
            vmem_limit_bytes=48 * 1024 * 1024,
        ),
    )(gates_x, gates_x, m_lb1, m_lb1, w_hh, bias)

    # TODO(synk): consumers that accept time-major [L, B, *] output could skip
    # this concat+transpose HBM pass entirely.
    enc = jnp.concatenate([out_f[:L, :B, :H], out_b[:L, :B, :H]], axis=-1)
    return jnp.transpose(enc, (1, 0, 2))                           # (B, L, 2H)


def init_lstm_params(key, embed_size, hidden_size):
    """Deterministic nn.LSTMCell-style init: U(-1/sqrt(H), 1/sqrt(H))."""
    k1, k2, k3, k4 = jax.random.split(key, 4)
    bound = 1.0 / jnp.sqrt(hidden_size)
    # stored transposed so the kernel/reference do x @ W directly
    w_ih_t = jax.random.uniform(k1, (embed_size, 4 * hidden_size),
                                jnp.float32, -bound, bound)
    w_hh_t = jax.random.uniform(k2, (hidden_size, 4 * hidden_size),
                                jnp.float32, -bound, bound)
    b_ih = jax.random.uniform(k3, (4 * hidden_size,), jnp.float32, -bound, bound)
    b_hh = jax.random.uniform(k4, (4 * hidden_size,), jnp.float32, -bound, bound)
    return {"w_ih_t": w_ih_t, "w_hh_t": w_hh_t, "bias": b_ih + b_hh}


def reference_bilstm(x, x_mask, params, *, time_chunk=32, batch_tile=64,
                     vmem_budget_bytes=44 * 1024 * 1024):
    """Pure-JAX reference (lax.scan) with the same mixed-precision numerics
    (bf16 hoisted x-projection, bf16 recurrent matmul, f32 gates/state)."""
    gates_x, m_lb1, w_hh, bias, d = _prepare(
        x, x_mask, params, time_chunk=time_chunk, batch_tile=batch_tile,
        vmem_budget_bytes=vmem_budget_bytes)
    B, L, H, Hp, Bp = d["B"], d["L"], d["H"], d["Hp"], d["Bp"]

    def run(gx_d, m_d, w, b):
        def step(carry, inp):
            h, c = carry
            gx_t, m_t = inp
            g = (gx_t.astype(jnp.float32) + b[None, :]
                 + jnp.dot(h.astype(jnp.bfloat16), w,
                           preferred_element_type=jnp.float32))
            i = jax.nn.sigmoid(g[:, 0 * Hp:1 * Hp])
            f = jax.nn.sigmoid(g[:, 1 * Hp:2 * Hp])
            gg = jnp.tanh(g[:, 2 * Hp:3 * Hp])
            o = jax.nn.sigmoid(g[:, 3 * Hp:4 * Hp])
            c_new = f * c + i * gg
            h_new = o * jnp.tanh(c_new)
            keep = m_t > 0.5
            h = jnp.where(keep, h_new, h)
            c = jnp.where(keep, c_new, c)
            return (h, c), h

        init = (jnp.zeros((Bp, Hp), jnp.float32),
                jnp.zeros((Bp, Hp), jnp.float32))
        _, hs = jax.lax.scan(step, init, (gx_d, m_d))
        return hs

    fwd = run(gates_x[0], m_lb1, w_hh[0], bias[0])
    bwd = run(gates_x[1, ::-1], m_lb1[::-1], w_hh[1], bias[1])[::-1]
    enc = jnp.concatenate([fwd[..., :H], bwd[..., :H]], axis=-1)   # (Lp,Bp,2H)
    return jnp.transpose(enc[:L, :B], (1, 0, 2))


if __name__ == "__main__":
    B, L, E, H = 2, 8, 16, 32

    key = jax.random.PRNGKey(0)
    k_x, k_fwd, k_bwd = jax.random.split(key, 3)

    x = jax.random.normal(k_x, (B, L, E), jnp.float32)
    # mask: second sequence has 2 padded positions at the end
    x_mask = jnp.array(
        [[1] * L,
         [1] * (L - 2) + [0, 0]], dtype=jnp.int32)

    params = {
        "hidden_size": H,
        "fwd": init_lstm_params(k_fwd, E, H),
        "bwd": init_lstm_params(k_bwd, E, H),
    }

    out = bilstm_encoder(x, x_mask, params)
    out = jax.block_until_ready(out)
    assert out.shape == (B, L, 2 * H), out.shape

    ref = jax.block_until_ready(reference_bilstm(x, x_mask, params))
    assert jnp.allclose(out, ref, atol=1e-3, rtol=1e-3), \
        float(jnp.max(jnp.abs(out - ref)))

    print("KERNEL_OK")
</pallas_src>

<mosaic_0001>
module attributes {stable_mosaic.version = 11 : i64} {
  func.func @_bilstm_kernel(%arg0: i32, %arg1: i32, %arg2: memref<1x8x8x512xbf16, #tpu.memory_space<vmem>>, %arg3: memref<1x8x8x512xbf16, #tpu.memory_space<vmem>>, %arg4: memref<8x8x1xf32, #tpu.memory_space<vmem>>, %arg5: memref<8x8x1xf32, #tpu.memory_space<vmem>>, %arg6: memref<2x128x512xbf16, #tpu.memory_space<vmem>>, %arg7: memref<2x512xf32, #tpu.memory_space<vmem>>, %arg8: memref<8x8x128xf32, #tpu.memory_space<vmem>>, %arg9: memref<8x8x128xf32, #tpu.memory_space<vmem>>, %arg10: memref<8x128xf32, #tpu.memory_space<vmem>>, %arg11: memref<8x128xf32, #tpu.memory_space<vmem>>, %arg12: memref<8x128xf32, #tpu.memory_space<vmem>>, %arg13: memref<8x128xf32, #tpu.memory_space<vmem>>) attributes {dimension_semantics = [#tpu.dimension_semantics<parallel>, #tpu.dimension_semantics<arbitrary>], iteration_bounds = array<i64: 1, 1>, scalar_prefetch = 0 : i64, scratch_operands = 4 : i64, tpu.core_type = #tpu.core_type<tc>, window_params = [{transform_indices = @transform_0, window_bounds = array<i64: 1, 8, 8, 512>}, {transform_indices = @transform_1, window_bounds = array<i64: 1, 8, 8, 512>}, {transform_indices = @transform_2, window_bounds = array<i64: 8, 8, 1>}, {transform_indices = @transform_3, window_bounds = array<i64: 8, 8, 1>}, {pipeline_mode = #tpu.pipeline_mode<synchronous>, transform_indices = @transform_4, window_bounds = array<i64: 2, 128, 512>}, {pipeline_mode = #tpu.pipeline_mode<synchronous>, transform_indices = @transform_5, window_bounds = array<i64: 2, 512>}, {transform_indices = @transform_6, window_bounds = array<i64: 8, 8, 128>}, {transform_indices = @transform_7, window_bounds = array<i64: 8, 8, 128>}]} {
    %c0_i32 = arith.constant 0 : i32
    %0 = arith.cmpi eq, %arg1, %c0_i32 : i32
    %1 = arith.extui %0 : i1 to i32
    %c0_i32_0 = arith.constant 0 : i32
    %2 = arith.cmpi ne, %1, %c0_i32_0 : i32
    scf.if %2 {
      %cst_225 = arith.constant 0.000000e+00 : f32
      %797 = vector.broadcast %cst_225 : f32 to vector<8x128xf32>
      %c0_226 = arith.constant 0 : index
      %c0_227 = arith.constant 0 : index
      %798 = vector.load %arg10[%c0_226, %c0_227] : memref<8x128xf32, #tpu.memory_space<vmem>>, vector<8x128xf32>
      tpu.vector_store %arg10[%c0_226, %c0_227], %797 {strides = array<i32>} : memref<8x128xf32, #tpu.memory_space<vmem>>, vector<8x128xf32>,
      %cst_228 = arith.constant 0.000000e+00 : f32
      %799 = vector.broadcast %cst_228 : f32 to vector<8x128xf32>
      %c0_229 = arith.constant 0 : index
      %c0_230 = arith.constant 0 : index
      %800 = vector.load %arg11[%c0_229, %c0_230] : memref<8x128xf32, #tpu.memory_space<vmem>>, vector<8x128xf32>
      tpu.vector_store %arg11[%c0_229, %c0_230], %799 {strides = array<i32>} : memref<8x128xf32, #tpu.memory_space<vmem>>, vector<8x128xf32>,
      %cst_231 = arith.constant 0.000000e+00 : f32
      %801 = vector.broadcast %cst_231 : f32 to vector<8x128xf32>
      %c0_232 = arith.constant 0 : index
      %c0_233 = arith.constant 0 : index
      %802 = vector.load %arg12[%c0_232, %c0_233] : memref<8x128xf32, #tpu.memory_space<vmem>>, vector<8x128xf32>
      tpu.vector_store %arg12[%c0_232, %c0_233], %801 {strides = array<i32>} : memref<8x128xf32, #tpu.memory_space<vmem>>, vector<8x128xf32>,
      %cst_234 = arith.constant 0.000000e+00 : f32
      %803 = vector.broadcast %cst_234 : f32 to vector<8x128xf32>
      %c0_235 = arith.constant 0 : index
      %c0_236 = arith.constant 0 : index
      %804 = vector.load %arg13[%c0_235, %c0_236] : memref<8x128xf32, #tpu.memory_space<vmem>>, vector<8x128xf32>
      tpu.vector_store %arg13[%c0_235, %c0_236], %803 {strides = array<i32>} : memref<8x128xf32, #tpu.memory_space<vmem>>, vector<8x128xf32>,
    } else {
    }
    %c0 = arith.constant 0 : index
    %c0_1 = arith.constant 0 : index
    %c0_2 = arith.constant 0 : index
    %3 = vector.load %arg6[%c0, %c0_1, %c0_2] : memref<2x128x512xbf16, #tpu.memory_space<vmem>>, vector<1x128x512xbf16>
    %4 = vector.shape_cast %3 : vector<1x128x512xbf16> to vector<128x512xbf16>
    %c1 = arith.constant 1 : index
    %c0_3 = arith.constant 0 : index
    %c0_4 = arith.constant 0 : index
    %5 = vector.load %arg6[%c1, %c0_3, %c0_4] : memref<2x128x512xbf16, #tpu.memory_space<vmem>>, vector<1x128x512xbf16>
    %6 = vector.shape_cast %5 : vector<1x128x512xbf16> to vector<128x512xbf16>
    %c0_5 = arith.constant 0 : index
    %c0_6 = arith.constant 0 : index
    %7 = vector.load %arg7[%c0_5, %c0_6] : memref<2x512xf32, #tpu.memory_space<vmem>>, vector<1x512xf32>
    %8 = vector.shape_cast %7 : vector<1x512xf32> to vector<1x512xf32>
    %9 = vector.broadcast %8 : vector<1x512xf32> to vector<8x512xf32>
    %c1_7 = arith.constant 1 : index
    %c0_8 = arith.constant 0 : index
    %10 = vector.load %arg7[%c1_7, %c0_8] : memref<2x512xf32, #tpu.memory_space<vmem>>, vector<1x512xf32>
    %11 = vector.shape_cast %10 : vector<1x512xf32> to vector<1x512xf32>
    %12 = vector.broadcast %11 : vector<1x512xf32> to vector<8x512xf32>
    %c0_9 = arith.constant 0 : index
    %c0_10 = arith.constant 0 : index
    %13 = vector.load %arg10[%c0_9, %c0_10] : memref<8x128xf32, #tpu.memory_space<vmem>>, vector<8x128xf32>
    %c0_11 = arith.constant 0 : index
    %c0_12 = arith.constant 0 : index
    %14 = vector.load %arg11[%c0_11, %c0_12] : memref<8x128xf32, #tpu.memory_space<vmem>>, vector<8x128xf32>
    %c0_13 = arith.constant 0 : index
    %c0_14 = arith.constant 0 : index
    %15 = vector.load %arg12[%c0_13, %c0_14] : memref<8x128xf32, #tpu.memory_space<vmem>>, vector<8x128xf32>
    %c0_15 = arith.constant 0 : index
    %c0_16 = arith.constant 0 : index
    %16 = vector.load %arg13[%c0_15, %c0_16] : memref<8x128xf32, #tpu.memory_space<vmem>>, vector<8x128xf32>
    %c0_i32_17 = arith.constant 0 : i32
    %c7_i32 = arith.constant 7 : i32
    %17 = arith.subi %c7_i32, %c0_i32_17 : i32
    %18 = arith.truncf %13 : vector<8x128xf32> to vector<8x128xbf16>
    %cst = arith.constant dense<0.000000e+00> : vector<8x512xf32>
    %19 = tpu.matmul %18, %4, %cst {dimension_numbers = #tpu.dot_dimension_numbers<[1], [0], [0], [1], [0, 0, 1, 1], [], []>} : vector<8x128xbf16>, vector<128x512xbf16>, vector<8x512xf32> -> vector<8x512xf32>
    %20 = arith.truncf %15 : vector<8x128xf32> to vector<8x128xbf16>
    %cst_18 = arith.constant dense<0.000000e+00> : vector<8x512xf32>
    %21 = tpu.matmul %20, %6, %cst_18 {dimension_numbers = #tpu.dot_dimension_numbers<[1], [0], [0], [1], [0, 0, 1, 1], [], []>} : vector<8x128xbf16>, vector<128x512xbf16>, vector<8x512xf32> -> vector<8x512xf32>
    %c0_19 = arith.constant 0 : index
    %22 = arith.index_cast %c0_i32_17 : i32 to index
    %c0_20 = arith.constant 0 : index
    %c0_21 = arith.constant 0 : index
    %23 = vector.load %arg2[%c0_19, %22, %c0_20, %c0_21] : memref<1x8x8x512xbf16, #tpu.memory_space<vmem>>, vector<1x1x8x512xbf16>
    %24 = vector.shape_cast %23 : vector<1x1x8x512xbf16> to vector<8x512xbf16>
    %25 = arith.extf %24 : vector<8x512xbf16> to vector<8x512xf32>
    %26 = arith.addf %25, %9 : vector<8x512xf32>
    %27 = arith.addf %26, %19 : vector<8x512xf32>
    %c0_22 = arith.constant 0 : index
    %28 = arith.index_cast %17 : i32 to index
    %c0_23 = arith.constant 0 : index
    %c0_24 = arith.constant 0 : index
    %29 = vector.load %arg3[%c0_22, %28, %c0_23, %c0_24] : memref<1x8x8x512xbf16, #tpu.memory_space<vmem>>, vector<1x1x8x512xbf16>
    %30 = vector.shape_cast %29 : vector<1x1x8x512xbf16> to vector<8x512xbf16>
    %31 = arith.extf %30 : vector<8x512xbf16> to vector<8x512xf32>
    %32 = arith.addf %31, %12 : vector<8x512xf32>
    %33 = arith.addf %32, %21 : vector<8x512xf32>
    %34 = vector.extract_strided_slice %27 {offsets = [0, 0], sizes = [8, 128], strides = [1, 1]} : vector<8x512xf32> to vector<8x128xf32>
    %35 = arith.negf %34 : vector<8x128xf32>
    %36 = math.exp %35 : vector<8x128xf32>
    %cst_25 = arith.constant 1.000000e+00 : f32
    %37 = vector.broadcast %cst_25 : f32 to vector<8x128xf32>
    %38 = arith.addf %37, %36 : vector<8x128xf32>
    %39 = arith.divf %37, %38 : vector<8x128xf32>
    %40 = vector.extract_strided_slice %27 {offsets = [0, 128], sizes = [8, 128], strides = [1, 1]} : vector<8x512xf32> to vector<8x128xf32>
    %41 = arith.negf %40 : vector<8x128xf32>
    %42 = math.exp %41 : vector<8x128xf32>
    %cst_26 = arith.constant 1.000000e+00 : f32
    %43 = vector.broadcast %cst_26 : f32 to vector<8x128xf32>
    %44 = arith.addf %43, %42 : vector<8x128xf32>
    %45 = arith.divf %43, %44 : vector<8x128xf32>
    %46 = vector.extract_strided_slice %27 {offsets = [0, 256], sizes = [8, 128], strides = [1, 1]} : vector<8x512xf32> to vector<8x128xf32>
    %47 = math.tanh %46 : vector<8x128xf32>
    %48 = vector.extract_strided_slice %27 {offsets = [0, 384], sizes = [8, 128], strides = [1, 1]} : vector<8x512xf32> to vector<8x128xf32>
    %49 = arith.negf %48 : vector<8x128xf32>
    %50 = math.exp %49 : vector<8x128xf32>
    %cst_27 = arith.constant 1.000000e+00 : f32
    %51 = vector.broadcast %cst_27 : f32 to vector<8x128xf32>
    %52 = arith.addf %51, %50 : vector<8x128xf32>
    %53 = arith.divf %51, %52 : vector<8x128xf32>
    %54 = arith.mulf %45, %14 : vector<8x128xf32>
    %55 = arith.mulf %39, %47 : vector<8x128xf32>
    %56 = arith.addf %54, %55 : vector<8x128xf32>
    %57 = math.tanh %56 : vector<8x128xf32>
    %58 = arith.mulf %53, %57 : vector<8x128xf32>
    %59 = vector.extract_strided_slice %33 {offsets = [0, 0], sizes = [8, 128], strides = [1, 1]} : vector<8x512xf32> to vector<8x128xf32>
    %60 = arith.negf %59 : vector<8x128xf32>
    %61 = math.exp %60 : vector<8x128xf32>
    %cst_28 = arith.constant 1.000000e+00 : f32
    %62 = vector.broadcast %cst_28 : f32 to vector<8x128xf32>
    %63 = arith.addf %62, %61 : vector<8x128xf32>
    %64 = arith.divf %62, %63 : vector<8x128xf32>
    %65 = vector.extract_strided_slice %33 {offsets = [0, 128], sizes = [8, 128], strides = [1, 1]} : vector<8x512xf32> to vector<8x128xf32>
    %66 = arith.negf %65 : vector<8x128xf32>
    %67 = math.exp %66 : vector<8x128xf32>
    %cst_29 = arith.constant 1.000000e+00 : f32
    %68 = vector.broadcast %cst_29 : f32 to vector<8x128xf32>
    %69 = arith.addf %68, %67 : vector<8x128xf32>
    %70 = arith.divf %68, %69 : vector<8x128xf32>
    %71 = vector.extract_strided_slice %33 {offsets = [0, 256], sizes = [8, 128], strides = [1, 1]} : vector<8x512xf32> to vector<8x128xf32>
    %72 = math.tanh %71 : vector<8x128xf32>
    %73 = vector.extract_strided_slice %33 {offsets = [0, 384], sizes = [8, 128], strides = [1, 1]} : vector<8x512xf32> to vector<8x128xf32>
    %74 = arith.negf %73 : vector<8x128xf32>
    %75 = math.exp %74 : vector<8x128xf32>
    %cst_30 = arith.constant 1.000000e+00 : f32
    %76 = vector.broadcast %cst_30 : f32 to vector<8x128xf32>
    %77 = arith.addf %76, %75 : vector<8x128xf32>
    %78 = arith.divf %76, %77 : vector<8x128xf32>
    %79 = arith.mulf %70, %16 : vector<8x128xf32>
    %80 = arith.mulf %64, %72 : vector<8x128xf32>
    %81 = arith.addf %79, %80 : vector<8x128xf32>
    %82 = math.tanh %81 : vector<8x128xf32>
    %83 = arith.mulf %78, %82 : vector<8x128xf32>
    %84 = arith.index_cast %c0_i32_17 : i32 to index
    %c0_31 = arith.constant 0 : index
    %c0_32 = arith.constant 0 : index
    %85 = vector.load %arg4[%84, %c0_31, %c0_32] : memref<8x8x1xf32, #tpu.memory_space<vmem>>, vector<1x8x1xf32>
    %86 = vector.shape_cast %85 : vector<1x8x1xf32> to vector<8x1xf32>
    %cst_33 = arith.constant 5.000000e-01 : f32
    %87 = vector.broadcast %cst_33 : f32 to vector<8x1xf32>
    %88 = arith.cmpf ogt, %86, %87 : vector<8x1xf32>
    %89 = arith.index_cast %17 : i32 to index
    %c0_34 = arith.constant 0 : index
    %c0_35 = arith.constant 0 : index
    %90 = vector.load %arg5[%89, %c0_34, %c0_35] : memref<8x8x1xf32, #tpu.memory_space<vmem>>, vector<1x8x1xf32>
    %91 = vector.shape_cast %90 : vector<1x8x1xf32> to vector<8x1xf32>
    %cst_36 = arith.constant 5.000000e-01 : f32
    %92 = vector.broadcast %cst_36 : f32 to vector<8x1xf32>
    %93 = arith.cmpf ogt, %91, %92 : vector<8x1xf32>
    %94 = vector.shape_cast %88 : vector<8x1xi1> to vector<8x1xi1>
    %95 = vector.broadcast %94 : vector<8x1xi1> to vector<8x128xi1>
    %96 = arith.select %95, %58, %13 : vector<8x128xi1>, vector<8x128xf32>
    %97 = vector.shape_cast %88 : vector<8x1xi1> to vector<8x1xi1>
    %98 = vector.broadcast %97 : vector<8x1xi1> to vector<8x128xi1>
    %99 = arith.select %98, %56, %14 : vector<8x128xi1>, vector<8x128xf32>
    %100 = vector.shape_cast %93 : vector<8x1xi1> to vector<8x1xi1>
    %101 = vector.broadcast %100 : vector<8x1xi1> to vector<8x128xi1>
    %102 = arith.select %101, %83, %15 : vector<8x128xi1>, vector<8x128xf32>
    %103 = vector.shape_cast %93 : vector<8x1xi1> to vector<8x1xi1>
    %104 = vector.broadcast %103 : vector<8x1xi1> to vector<8x128xi1>
    %105 = arith.select %104, %81, %16 : vector<8x128xi1>, vector<8x128xf32>
    %106 = arith.index_cast %c0_i32_17 : i32 to index
    %c0_37 = arith.constant 0 : index
    %c0_38 = arith.constant 0 : index
    %107 = vector.load %arg8[%106, %c0_37, %c0_38] : memref<8x8x128xf32, #tpu.memory_space<vmem>>, vector<1x8x128xf32>
    %108 = vector.shape_cast %107 : vector<1x8x128xf32> to vector<8x128xf32>
    %109 = vector.shape_cast %96 : vector<8x128xf32> to vector<1x8x128xf32>
    tpu.vector_store %arg8[%106, %c0_37, %c0_38], %109 {strides = array<i32>} : memref<8x8x128xf32, #tpu.memory_space<vmem>>, vector<1x8x128xf32>,
    %110 = arith.index_cast %17 : i32 to index
    %c0_39 = arith.constant 0 : index
    %c0_40 = arith.constant 0 : index
    %111 = vector.load %arg9[%110, %c0_39, %c0_40] : memref<8x8x128xf32, #tpu.memory_space<vmem>>, vector<1x8x128xf32>
    %112 = vector.shape_cast %111 : vector<1x8x128xf32> to vector<8x128xf32>
    %113 = vector.shape_cast %102 : vector<8x128xf32> to vector<1x8x128xf32>
    tpu.vector_store %arg9[%110, %c0_39, %c0_40], %113 {strides = array<i32>} : memref<8x8x128xf32, #tpu.memory_space<vmem>>, vector<1x8x128xf32>,
    %c1_i32 = arith.constant 1 : i32
    %c7_i32_41 = arith.constant 7 : i32
    %114 = arith.subi %c7_i32_41, %c1_i32 : i32
    %115 = arith.truncf %96 : vector<8x128xf32> to vector<8x128xbf16>
    %cst_42 = arith.constant dense<0.000000e+00> : vector<8x512xf32>
    %116 = tpu.matmul %115, %4, %cst_42 {dimension_numbers = #tpu.dot_dimension_numbers<[1], [0], [0], [1], [0, 0, 1, 1], [], []>} : vector<8x128xbf16>, vector<128x512xbf16>, vector<8x512xf32> -> vector<8x512xf32>
    %117 = arith.truncf %102 : vector<8x128xf32> to vector<8x128xbf16>
    %cst_43 = arith.constant dense<0.000000e+00> : vector<8x512xf32>
    %118 = tpu.matmul %117, %6, %cst_43 {dimension_numbers = #tpu.dot_dimension_numbers<[1], [0], [0], [1], [0, 0, 1, 1], [], []>} : vector<8x128xbf16>, vector<128x512xbf16>, vector<8x512xf32> -> vector<8x512xf32>
    %c0_44 = arith.constant 0 : index
    %119 = arith.index_cast %c1_i32 : i32 to index
    %c0_45 = arith.constant 0 : index
    %c0_46 = arith.constant 0 : index
    %120 = vector.load %arg2[%c0_44, %119, %c0_45, %c0_46] : memref<1x8x8x512xbf16, #tpu.memory_space<vmem>>, vector<1x1x8x512xbf16>
    %121 = vector.shape_cast %120 : vector<1x1x8x512xbf16> to vector<8x512xbf16>
    %122 = arith.extf %121 : vector<8x512xbf16> to vector<8x512xf32>
    %123 = arith.addf %122, %9 : vector<8x512xf32>
    %124 = arith.addf %123, %116 : vector<8x512xf32>
    %c0_47 = arith.constant 0 : index
    %125 = arith.index_cast %114 : i32 to index
    %c0_48 = arith.constant 0 : index
    %c0_49 = arith.constant 0 : index
    %126 = vector.load %arg3[%c0_47, %125, %c0_48, %c0_49] : memref<1x8x8x512xbf16, #tpu.memory_space<vmem>>, vector<1x1x8x512xbf16>
    %127 = vector.shape_cast %126 : vector<1x1x8x512xbf16> to vector<8x512xbf16>
    %128 = arith.extf %127 : vector<8x512xbf16> to vector<8x512xf32>
    %129 = arith.addf %128, %12 : vector<8x512xf32>
    %130 = arith.addf %129, %118 : vector<8x512xf32>
    %131 = vector.extract_strided_slice %124 {offsets = [0, 0], sizes = [8, 128], strides = [1, 1]} : vector<8x512xf32> to vector<8x128xf32>
    %132 = arith.negf %131 : vector<8x128xf32>
    %133 = math.exp %132 : vector<8x128xf32>
    %cst_50 = arith.constant 1.000000e+00 : f32
    %134 = vector.broadcast %cst_50 : f32 to vector<8x128xf32>
    %135 = arith.addf %134, %133 : vector<8x128xf32>
    %136 = arith.divf %134, %135 : vector<8x128xf32>
    %137 = vector.extract_strided_slice %124 {offsets = [0, 128], sizes = [8, 128], strides = [1, 1]} : vector<8x512xf32> to vector<8x128xf32>
    %138 = arith.negf %137 : vector<8x128xf32>
    %139 = math.exp %138 : vector<8x128xf32>
    %cst_51 = arith.constant 1.000000e+00 : f32
    %140 = vector.broadcast %cst_51 : f32 to vector<8x128xf32>
    %141 = arith.addf %140, %139 : vector<8x128xf32>
    %142 = arith.divf %140, %141 : vector<8x128xf32>
    %143 = vector.extract_strided_slice %124 {offsets = [0, 256], sizes = [8, 128], strides = [1, 1]} : vector<8x512xf32> to vector<8x128xf32>
    %144 = math.tanh %143 : vector<8x128xf32>
    %145 = vector.extract_strided_slice %124 {offsets = [0, 384], sizes = [8, 128], strides = [1, 1]} : vector<8x512xf32> to vector<8x128xf32>
    %146 = arith.negf %145 : vector<8x128xf32>
    %147 = math.exp %146 : vector<8x128xf32>
    %cst_52 = arith.constant 1.000000e+00 : f32
    %148 = vector.broadcast %cst_52 : f32 to vector<8x128xf32>
    %149 = arith.addf %148, %147 : vector<8x128xf32>
    %150 = arith.divf %148, %149 : vector<8x128xf32>
    %151 = arith.mulf %142, %99 : vector<8x128xf32>
    %152 = arith.mulf %136, %144 : vector<8x128xf32>
    %153 = arith.addf %151, %152 : vector<8x128xf32>
    %154 = math.tanh %153 : vector<8x128xf32>
    %155 = arith.mulf %150, %154 : vector<8x128xf32>
    %156 = vector.extract_strided_slice %130 {offsets = [0, 0], sizes = [8, 128], strides = [1, 1]} : vector<8x512xf32> to vector<8x128xf32>
    %157 = arith.negf %156 : vector<8x128xf32>
    %158 = math.exp %157 : vector<8x128xf32>
    %cst_53 = arith.constant 1.000000e+00 : f32
    %159 = vector.broadcast %cst_53 : f32 to vector<8x128xf32>
    %160 = arith.addf %159, %158 : vector<8x128xf32>
    %161 = arith.divf %159, %160 : vector<8x128xf32>
    %162 = vector.extract_strided_slice %130 {offsets = [0, 128], sizes = [8, 128], strides = [1, 1]} : vector<8x512xf32> to vector<8x128xf32>
    %163 = arith.negf %162 : vector<8x128xf32>
    %164 = math.exp %163 : vector<8x128xf32>
    %cst_54 = arith.constant 1.000000e+00 : f32
    %165 = vector.broadcast %cst_54 : f32 to vector<8x128xf32>
    %166 = arith.addf %165, %164 : vector<8x128xf32>
    %167 = arith.divf %165, %166 : vector<8x128xf32>
    %168 = vector.extract_strided_slice %130 {offsets = [0, 256], sizes = [8, 128], strides = [1, 1]} : vector<8x512xf32> to vector<8x128xf32>
    %169 = math.tanh %168 : vector<8x128xf32>
    %170 = vector.extract_strided_slice %130 {offsets = [0, 384], sizes = [8, 128], strides = [1, 1]} : vector<8x512xf32> to vector<8x128xf32>
    %171 = arith.negf %170 : vector<8x128xf32>
    %172 = math.exp %171 : vector<8x128xf32>
    %cst_55 = arith.constant 1.000000e+00 : f32
    %173 = vector.broadcast %cst_55 : f32 to vector<8x128xf32>
    %174 = arith.addf %173, %172 : vector<8x128xf32>
    %175 = arith.divf %173, %174 : vector<8x128xf32>
    %176 = arith.mulf %167, %105 : vector<8x128xf32>
    %177 = arith.mulf %161, %169 : vector<8x128xf32>
    %178 = arith.addf %176, %177 : vector<8x128xf32>
    %179 = math.tanh %178 : vector<8x128xf32>
    %180 = arith.mulf %175, %179 : vector<8x128xf32>
    %181 = arith.index_cast %c1_i32 : i32 to index
    %c0_56 = arith.constant 0 : index
    %c0_57 = arith.constant 0 : index
    %182 = vector.load %arg4[%181, %c0_56, %c0_57] : memref<8x8x1xf32, #tpu.memory_space<vmem>>, vector<1x8x1xf32>
    %183 = vector.shape_cast %182 : vector<1x8x1xf32> to vector<8x1xf32>
    %cst_58 = arith.constant 5.000000e-01 : f32
    %184 = vector.broadcast %cst_58 : f32 to vector<8x1xf32>
    %185 = arith.cmpf ogt, %183, %184 : vector<8x1xf32>
    %186 = arith.index_cast %114 : i32 to index
    %c0_59 = arith.constant 0 : index
    %c0_60 = arith.constant 0 : index
    %187 = vector.load %arg5[%186, %c0_59, %c0_60] : memref<8x8x1xf32, #tpu.memory_space<vmem>>, vector<1x8x1xf32>
    %188 = vector.shape_cast %187 : vector<1x8x1xf32> to vector<8x1xf32>
    %cst_61 = arith.constant 5.000000e-01 : f32
    %189 = vector.broadcast %cst_61 : f32 to vector<8x1xf32>
    %190 = arith.cmpf ogt, %188, %189 : vector<8x1xf32>
    %191 = vector.shape_cast %185 : vector<8x1xi1> to vector<8x1xi1>
    %192 = vector.broadcast %191 : vector<8x1xi1> to vector<8x128xi1>
    %193 = arith.select %192, %155, %96 : vector<8x128xi1>, vector<8x128xf32>
    %194 = vector.shape_cast %185 : vector<8x1xi1> to vector<8x1xi1>
    %195 = vector.broadcast %194 : vector<8x1xi1> to vector<8x128xi1>
    %196 = arith.select %195, %153, %99 : vector<8x128xi1>, vector<8x128xf32>
    %197 = vector.shape_cast %190 : vector<8x1xi1> to vector<8x1xi1>
    %198 = vector.broadcast %197 : vector<8x1xi1> to vector<8x128xi1>
    %199 = arith.select %198, %180, %102 : vector<8x128xi1>, vector<8x128xf32>
    %200 = vector.shape_cast %190 : vector<8x1xi1> to vector<8x1xi1>
    %201 = vector.broadcast %200 : vector<8x1xi1> to vector<8x128xi1>
    %202 = arith.select %201, %178, %105 : vector<8x128xi1>, vector<8x128xf32>
    %203 = arith.index_cast %c1_i32 : i32 to index
    %c0_62 = arith.constant 0 : index
    %c0_63 = arith.constant 0 : index
    %204 = vector.load %arg8[%203, %c0_62, %c0_63] : memref<8x8x128xf32, #tpu.memory_space<vmem>>, vector<1x8x128xf32>
    %205 = vector.shape_cast %204 : vector<1x8x128xf32> to vector<8x128xf32>
    %206 = vector.shape_cast %193 : vector<8x128xf32> to vector<1x8x128xf32>
    tpu.vector_store %arg8[%203, %c0_62, %c0_63], %206 {strides = array<i32>} : memref<8x8x128xf32, #tpu.memory_space<vmem>>, vector<1x8x128xf32>,
    %207 = arith.index_cast %114 : i32 to index
    %c0_64 = arith.constant 0 : index
    %c0_65 = arith.constant 0 : index
    %208 = vector.load %arg9[%207, %c0_64, %c0_65] : memref<8x8x128xf32, #tpu.memory_space<vmem>>, vector<1x8x128xf32>
    %209 = vector.shape_cast %208 : vector<1x8x128xf32> to vector<8x128xf32>
    %210 = vector.shape_cast %199 : vector<8x128xf32> to vector<1x8x128xf32>
    tpu.vector_store %arg9[%207, %c0_64, %c0_65], %210 {strides = array<i32>} : memref<8x8x128xf32, #tpu.memory_space<vmem>>, vector<1x8x128xf32>,
    %c2_i32 = arith.constant 2 : i32
    %c7_i32_66 = arith.constant 7 : i32
    %211 = arith.subi %c7_i32_66, %c2_i32 : i32
    %212 = arith.truncf %193 : vector<8x128xf32> to vector<8x128xbf16>
    %cst_67 = arith.constant dense<0.000000e+00> : vector<8x512xf32>
    %213 = tpu.matmul %212, %4, %cst_67 {dimension_numbers = #tpu.dot_dimension_numbers<[1], [0], [0], [1], [0, 0, 1, 1], [], []>} : vector<8x128xbf16>, vector<128x512xbf16>, vector<8x512xf32> -> vector<8x512xf32>
    %214 = arith.truncf %199 : vector<8x128xf32> to vector<8x128xbf16>
    %cst_68 = arith.constant dense<0.000000e+00> : vector<8x512xf32>
    %215 = tpu.matmul %214, %6, %cst_68 {dimension_numbers = #tpu.dot_dimension_numbers<[1], [0], [0], [1], [0, 0, 1, 1], [], []>} : vector<8x128xbf16>, vector<128x512xbf16>, vector<8x512xf32> -> vector<8x512xf32>
    %c0_69 = arith.constant 0 : index
    %216 = arith.index_cast %c2_i32 : i32 to index
    %c0_70 = arith.constant 0 : index
    %c0_71 = arith.constant 0 : index
    %217 = vector.load %arg2[%c0_69, %216, %c0_70, %c0_71] : memref<1x8x8x512xbf16, #tpu.memory_space<vmem>>, vector<1x1x8x512xbf16>
    %218 = vector.shape_cast %217 : vector<1x1x8x512xbf16> to vector<8x512xbf16>
    %219 = arith.extf %218 : vector<8x512xbf16> to vector<8x512xf32>
    %220 = arith.addf %219, %9 : vector<8x512xf32>
    %221 = arith.addf %220, %213 : vector<8x512xf32>
    %c0_72 = arith.constant 0 : index
    %222 = arith.index_cast %211 : i32 to index
    %c0_73 = arith.constant 0 : index
    %c0_74 = arith.constant 0 : index
    %223 = vector.load %arg3[%c0_72, %222, %c0_73, %c0_74] : memref<1x8x8x512xbf16, #tpu.memory_space<vmem>>, vector<1x1x8x512xbf16>
    %224 = vector.shape_cast %223 : vector<1x1x8x512xbf16> to vector<8x512xbf16>
    %225 = arith.extf %224 : vector<8x512xbf16> to vector<8x512xf32>
    %226 = arith.addf %225, %12 : vector<8x512xf32>
    %227 = arith.addf %226, %215 : vector<8x512xf32>
    %228 = vector.extract_strided_slice %221 {offsets = [0, 0], sizes = [8, 128], strides = [1, 1]} : vector<8x512xf32> to vector<8x128xf32>
    %229 = arith.negf %228 : vector<8x128xf32>
    %230 = math.exp %229 : vector<8x128xf32>
    %cst_75 = arith.constant 1.000000e+00 : f32
    %231 = vector.broadcast %cst_75 : f32 to vector<8x128xf32>
    %232 = arith.addf %231, %230 : vector<8x128xf32>
    %233 = arith.divf %231, %232 : vector<8x128xf32>
    %234 = vector.extract_strided_slice %221 {offsets = [0, 128], sizes = [8, 128], strides = [1, 1]} : vector<8x512xf32> to vector<8x128xf32>
    %235 = arith.negf %234 : vector<8x128xf32>
    %236 = math.exp %235 : vector<8x128xf32>
    %cst_76 = arith.constant 1.000000e+00 : f32
    %237 = vector.broadcast %cst_76 : f32 to vector<8x128xf32>
    %238 = arith.addf %237, %236 : vector<8x128xf32>
    %239 = arith.divf %237, %238 : vector<8x128xf32>
    %240 = vector.extract_strided_slice %221 {offsets = [0, 256], sizes = [8, 128], strides = [1, 1]} : vector<8x512xf32> to vector<8x128xf32>
    %241 = math.tanh %240 : vector<8x128xf32>
    %242 = vector.extract_strided_slice %221 {offsets = [0, 384], sizes = [8, 128], strides = [1, 1]} : vector<8x512xf32> to vector<8x128xf32>
    %243 = arith.negf %242 : vector<8x128xf32>
    %244 = math.exp %243 : vector<8x128xf32>
    %cst_77 = arith.constant 1.000000e+00 : f32
    %245 = vector.broadcast %cst_77 : f32 to vector<8x128xf32>
    %246 = arith.addf %245, %244 : vector<8x128xf32>
    %247 = arith.divf %245, %246 : vector<8x128xf32>
    %248 = arith.mulf %239, %196 : vector<8x128xf32>
    %249 = arith.mulf %233, %241 : vector<8x128xf32>
    %250 = arith.addf %248, %249 : vector<8x128xf32>
    %251 = math.tanh %250 : vector<8x128xf32>
    %252 = arith.mulf %247, %251 : vector<8x128xf32>
    %253 = vector.extract_strided_slice %227 {offsets = [0, 0], sizes = [8, 128], strides = [1, 1]} : vector<8x512xf32> to vector<8x128xf32>
    %254 = arith.negf %253 : vector<8x128xf32>
    %255 = math.exp %254 : vector<8x128xf32>
    %cst_78 = arith.constant 1.000000e+00 : f32
    %256 = vector.broadcast %cst_78 : f32 to vector<8x128xf32>
    %257 = arith.addf %256, %255 : vector<8x128xf32>
    %258 = arith.divf %256, %257 : vector<8x128xf32>
    %259 = vector.extract_strided_slice %227 {offsets = [0, 128], sizes = [8, 128], strides = [1, 1]} : vector<8x512xf32> to vector<8x128xf32>
    %260 = arith.negf %259 : vector<8x128xf32>
    %261 = math.exp %260 : vector<8x128xf32>
    %cst_79 = arith.constant 1.000000e+00 : f32
    %262 = vector.broadcast %cst_79 : f32 to vector<8x128xf32>
    %263 = arith.addf %262, %261 : vector<8x128xf32>
    %264 = arith.divf %262, %263 : vector<8x128xf32>
    %265 = vector.extract_strided_slice %227 {offsets = [0, 256], sizes = [8, 128], strides = [1, 1]} : vector<8x512xf32> to vector<8x128xf32>
    %266 = math.tanh %265 : vector<8x128xf32>
    %267 = vector.extract_strided_slice %227 {offsets = [0, 384], sizes = [8, 128], strides = [1, 1]} : vector<8x512xf32> to vector<8x128xf32>
    %268 = arith.negf %267 : vector<8x128xf32>
    %269 = math.exp %268 : vector<8x128xf32>
    %cst_80 = arith.constant 1.000000e+00 : f32
    %270 = vector.broadcast %cst_80 : f32 to vector<8x128xf32>
    %271 = arith.addf %270, %269 : vector<8x128xf32>
    %272 = arith.divf %270, %271 : vector<8x128xf32>
    %273 = arith.mulf %264, %202 : vector<8x128xf32>
    %274 = arith.mulf %258, %266 : vector<8x128xf32>
    %275 = arith.addf %273, %274 : vector<8x128xf32>
    %276 = math.tanh %275 : vector<8x128xf32>
    %277 = arith.mulf %272, %276 : vector<8x128xf32>
    %278 = arith.index_cast %c2_i32 : i32 to index
    %c0_81 = arith.constant 0 : index
    %c0_82 = arith.constant 0 : index
    %279 = vector.load %arg4[%278, %c0_81, %c0_82] : memref<8x8x1xf32, #tpu.memory_space<vmem>>, vector<1x8x1xf32>
    %280 = vector.shape_cast %279 : vector<1x8x1xf32> to vector<8x1xf32>
    %cst_83 = arith.constant 5.000000e-01 : f32
    %281 = vector.broadcast %cst_83 : f32 to vector<8x1xf32>
    %282 = arith.cmpf ogt, %280, %281 : vector<8x1xf32>
    %283 = arith.index_cast %211 : i32 to index
    %c0_84 = arith.constant 0 : index
    %c0_85 = arith.constant 0 : index
    %284 = vector.load %arg5[%283, %c0_84, %c0_85] : memref<8x8x1xf32, #tpu.memory_space<vmem>>, vector<1x8x1xf32>
    %285 = vector.shape_cast %284 : vector<1x8x1xf32> to vector<8x1xf32>
    %cst_86 = arith.constant 5.000000e-01 : f32
    %286 = vector.broadcast %cst_86 : f32 to vector<8x1xf32>
    %287 = arith.cmpf ogt, %285, %286 : vector<8x1xf32>
    %288 = vector.shape_cast %282 : vector<8x1xi1> to vector<8x1xi1>
    %289 = vector.broadcast %288 : vector<8x1xi1> to vector<8x128xi1>
    %290 = arith.select %289, %252, %193 : vector<8x128xi1>, vector<8x128xf32>
    %291 = vector.shape_cast %282 : vector<8x1xi1> to vector<8x1xi1>
    %292 = vector.broadcast %291 : vector<8x1xi1> to vector<8x128xi1>
    %293 = arith.select %292, %250, %196 : vector<8x128xi1>, vector<8x128xf32>
    %294 = vector.shape_cast %287 : vector<8x1xi1> to vector<8x1xi1>
    %295 = vector.broadcast %294 : vector<8x1xi1> to vector<8x128xi1>
    %296 = arith.select %295, %277, %199 : vector<8x128xi1>, vector<8x128xf32>
    %297 = vector.shape_cast %287 : vector<8x1xi1> to vector<8x1xi1>
    %298 = vector.broadcast %297 : vector<8x1xi1> to vector<8x128xi1>
    %299 = arith.select %298, %275, %202 : vector<8x128xi1>, vector<8x128xf32>
    %300 = arith.index_cast %c2_i32 : i32 to index
    %c0_87 = arith.constant 0 : index
    %c0_88 = arith.constant 0 : index
    %301 = vector.load %arg8[%300, %c0_87, %c0_88] : memref<8x8x128xf32, #tpu.memory_space<vmem>>, vector<1x8x128xf32>
    %302 = vector.shape_cast %301 : vector<1x8x128xf32> to vector<8x128xf32>
    %303 = vector.shape_cast %290 : vector<8x128xf32> to vector<1x8x128xf32>
    tpu.vector_store %arg8[%300, %c0_87, %c0_88], %303 {strides = array<i32>} : memref<8x8x128xf32, #tpu.memory_space<vmem>>, vector<1x8x128xf32>,
    %304 = arith.index_cast %211 : i32 to index
    %c0_89 = arith.constant 0 : index
    %c0_90 = arith.constant 0 : index
    %305 = vector.load %arg9[%304, %c0_89, %c0_90] : memref<8x8x128xf32, #tpu.memory_space<vmem>>, vector<1x8x128xf32>
    %306 = vector.shape_cast %305 : vector<1x8x128xf32> to vector<8x128xf32>
    %307 = vector.shape_cast %296 : vector<8x128xf32> to vector<1x8x128xf32>
    tpu.vector_store %arg9[%304, %c0_89, %c0_90], %307 {strides = array<i32>} : memref<8x8x128xf32, #tpu.memory_space<vmem>>, vector<1x8x128xf32>,
    %c3_i32 = arith.constant 3 : i32
    %c7_i32_91 = arith.constant 7 : i32
    %308 = arith.subi %c7_i32_91, %c3_i32 : i32
    %309 = arith.truncf %290 : vector<8x128xf32> to vector<8x128xbf16>
    %cst_92 = arith.constant dense<0.000000e+00> : vector<8x512xf32>
    %310 = tpu.matmul %309, %4, %cst_92 {dimension_numbers = #tpu.dot_dimension_numbers<[1], [0], [0], [1], [0, 0, 1, 1], [], []>} : vector<8x128xbf16>, vector<128x512xbf16>, vector<8x512xf32> -> vector<8x512xf32>
    %311 = arith.truncf %296 : vector<8x128xf32> to vector<8x128xbf16>
    %cst_93 = arith.constant dense<0.000000e+00> : vector<8x512xf32>
    %312 = tpu.matmul %311, %6, %cst_93 {dimension_numbers = #tpu.dot_dimension_numbers<[1], [0], [0], [1], [0, 0, 1, 1], [], []>} : vector<8x128xbf16>, vector<128x512xbf16>, vector<8x512xf32> -> vector<8x512xf32>
    %c0_94 = arith.constant 0 : index
    %313 = arith.index_cast %c3_i32 : i32 to index
    %c0_95 = arith.constant 0 : index
    %c0_96 = arith.constant 0 : index
    %314 = vector.load %arg2[%c0_94, %313, %c0_95, %c0_96] : memref<1x8x8x512xbf16, #tpu.memory_space<vmem>>, vector<1x1x8x512xbf16>
    %315 = vector.shape_cast %314 : vector<1x1x8x512xbf16> to vector<8x512xbf16>
    %316 = arith.extf %315 : vector<8x512xbf16> to vector<8x512xf32>
    %317 = arith.addf %316, %9 : vector<8x512xf32>
    %318 = arith.addf %317, %310 : vector<8x512xf32>
    %c0_97 = arith.constant 0 : index
    %319 = arith.index_cast %308 : i32 to index
    %c0_98 = arith.constant 0 : index
    %c0_99 = arith.constant 0 : index
    %320 = vector.load %arg3[%c0_97, %319, %c0_98, %c0_99] : memref<1x8x8x512xbf16, #tpu.memory_space<vmem>>, vector<1x1x8x512xbf16>
    %321 = vector.shape_cast %320 : vector<1x1x8x512xbf16> to vector<8x512xbf16>
    %322 = arith.extf %321 : vector<8x512xbf16> to vector<8x512xf32>
    %323 = arith.addf %322, %12 : vector<8x512xf32>
    %324 = arith.addf %323, %312 : vector<8x512xf32>
    %325 = vector.extract_strided_slice %318 {offsets = [0, 0], sizes = [8, 128], strides = [1, 1]} : vector<8x512xf32> to vector<8x128xf32>
    %326 = arith.negf %325 : vector<8x128xf32>
    %327 = math.exp %326 : vector<8x128xf32>
    %cst_100 = arith.constant 1.000000e+00 : f32
    %328 = vector.broadcast %cst_100 : f32 to vector<8x128xf32>
    %329 = arith.addf %328, %327 : vector<8x128xf32>
    %330 = arith.divf %328, %329 : vector<8x128xf32>
    %331 = vector.extract_strided_slice %318 {offsets = [0, 128], sizes = [8, 128], strides = [1, 1]} : vector<8x512xf32> to vector<8x128xf32>
    %332 = arith.negf %331 : vector<8x128xf32>
    %333 = math.exp %332 : vector<8x128xf32>
    %cst_101 = arith.constant 1.000000e+00 : f32
    %334 = vector.broadcast %cst_101 : f32 to vector<8x128xf32>
    %335 = arith.addf %334, %333 : vector<8x128xf32>
    %336 = arith.divf %334, %335 : vector<8x128xf32>
    %337 = vector.extract_strided_slice %318 {offsets = [0, 256], sizes = [8, 128], strides = [1, 1]} : vector<8x512xf32> to vector<8x128xf32>
    %338 = math.tanh %337 : vector<8x128xf32>
    %339 = vector.extract_strided_slice %318 {offsets = [0, 384], sizes = [8, 128], strides = [1, 1]} : vector<8x512xf32> to vector<8x128xf32>
    %340 = arith.negf %339 : vector<8x128xf32>
    %341 = math.exp %340 : vector<8x128xf32>
    %cst_102 = arith.constant 1.000000e+00 : f32
    %342 = vector.broadcast %cst_102 : f32 to vector<8x128xf32>
    %343 = arith.addf %342, %341 : vector<8x128xf32>
    %344 = arith.divf %342, %343 : vector<8x128xf32>
    %345 = arith.mulf %336, %293 : vector<8x128xf32>
    %346 = arith.mulf %330, %338 : vector<8x128xf32>
    %347 = arith.addf %345, %346 : vector<8x128xf32>
    %348 = math.tanh %347 : vector<8x128xf32>
    %349 = arith.mulf %344, %348 : vector<8x128xf32>
    %350 = vector.extract_strided_slice %324 {offsets = [0, 0], sizes = [8, 128], strides = [1, 1]} : vector<8x512xf32> to vector<8x128xf32>
    %351 = arith.negf %350 : vector<8x128xf32>
    %352 = math.exp %351 : vector<8x128xf32>
    %cst_103 = arith.constant 1.000000e+00 : f32
    %353 = vector.broadcast %cst_103 : f32 to vector<8x128xf32>
    %354 = arith.addf %353, %352 : vector<8x128xf32>
    %355 = arith.divf %353, %354 : vector<8x128xf32>
    %356 = vector.extract_strided_slice %324 {offsets = [0, 128], sizes = [8, 128], strides = [1, 1]} : vector<8x512xf32> to vector<8x128xf32>
    %357 = arith.negf %356 : vector<8x128xf32>
    %358 = math.exp %357 : vector<8x128xf32>
    %cst_104 = arith.constant 1.000000e+00 : f32
    %359 = vector.broadcast %cst_104 : f32 to vector<8x128xf32>
    %360 = arith.addf %359, %358 : vector<8x128xf32>
    %361 = arith.divf %359, %360 : vector<8x128xf32>
    %362 = vector.extract_strided_slice %324 {offsets = [0, 256], sizes = [8, 128], strides = [1, 1]} : vector<8x512xf32> to vector<8x128xf32>
    %363 = math.tanh %362 : vector<8x128xf32>
    %364 = vector.extract_strided_slice %324 {offsets = [0, 384], sizes = [8, 128], strides = [1, 1]} : vector<8x512xf32> to vector<8x128xf32>
    %365 = arith.negf %364 : vector<8x128xf32>
    %366 = math.exp %365 : vector<8x128xf32>
    %cst_105 = arith.constant 1.000000e+00 : f32
    %367 = vector.broadcast %cst_105 : f32 to vector<8x128xf32>
    %368 = arith.addf %367, %366 : vector<8x128xf32>
    %369 = arith.divf %367, %368 : vector<8x128xf32>
    %370 = arith.mulf %361, %299 : vector<8x128xf32>
    %371 = arith.mulf %355, %363 : vector<8x128xf32>
    %372 = arith.addf %370, %371 : vector<8x128xf32>
    %373 = math.tanh %372 : vector<8x128xf32>
    %374 = arith.mulf %369, %373 : vector<8x128xf32>
    %375 = arith.index_cast %c3_i32 : i32 to index
    %c0_106 = arith.constant 0 : index
    %c0_107 = arith.constant 0 : index
    %376 = vector.load %arg4[%375, %c0_106, %c0_107] : memref<8x8x1xf32, #tpu.memory_space<vmem>>, vector<1x8x1xf32>
    %377 = vector.shape_cast %376 : vector<1x8x1xf32> to vector<8x1xf32>
    %cst_108 = arith.constant 5.000000e-01 : f32
    %378 = vector.broadcast %cst_108 : f32 to vector<8x1xf32>
    %379 = arith.cmpf ogt, %377, %378 : vector<8x1xf32>
    %380 = arith.index_cast %308 : i32 to index
    %c0_109 = arith.constant 0 : index
    %c0_110 = arith.constant 0 : index
    %381 = vector.load %arg5[%380, %c0_109, %c0_110] : memref<8x8x1xf32, #tpu.memory_space<vmem>>, vector<1x8x1xf32>
    %382 = vector.shape_cast %381 : vector<1x8x1xf32> to vector<8x1xf32>
    %cst_111 = arith.constant 5.000000e-01 : f32
    %383 = vector.broadcast %cst_111 : f32 to vector<8x1xf32>
    %384 = arith.cmpf ogt, %382, %383 : vector<8x1xf32>
    %385 = vector.shape_cast %379 : vector<8x1xi1> to vector<8x1xi1>
    %386 = vector.broadcast %385 : vector<8x1xi1> to vector<8x128xi1>
    %387 = arith.select %386, %349, %290 : vector<8x128xi1>, vector<8x128xf32>
    %388 = vector.shape_cast %379 : vector<8x1xi1> to vector<8x1xi1>
    %389 = vector.broadcast %388 : vector<8x1xi1> to vector<8x128xi1>
    %390 = arith.select %389, %347, %293 : vector<8x128xi1>, vector<8x128xf32>
    %391 = vector.shape_cast %384 : vector<8x1xi1> to vector<8x1xi1>
    %392 = vector.broadcast %391 : vector<8x1xi1> to vector<8x128xi1>
    %393 = arith.select %392, %374, %296 : vector<8x128xi1>, vector<8x128xf32>
    %394 = vector.shape_cast %384 : vector<8x1xi1> to vector<8x1xi1>
    %395 = vector.broadcast %394 : vector<8x1xi1> to vector<8x128xi1>
    %396 = arith.select %395, %372, %299 : vector<8x128xi1>, vector<8x128xf32>
    %397 = arith.index_cast %c3_i32 : i32 to index
    %c0_112 = arith.constant 0 : index
    %c0_113 = arith.constant 0 : index
    %398 = vector.load %arg8[%397, %c0_112, %c0_113] : memref<8x8x128xf32, #tpu.memory_space<vmem>>, vector<1x8x128xf32>
    %399 = vector.shape_cast %398 : vector<1x8x128xf32> to vector<8x128xf32>
    %400 = vector.shape_cast %387 : vector<8x128xf32> to vector<1x8x128xf32>
    tpu.vector_store %arg8[%397, %c0_112, %c0_113], %400 {strides = array<i32>} : memref<8x8x128xf32, #tpu.memory_space<vmem>>, vector<1x8x128xf32>,
    %401 = arith.index_cast %308 : i32 to index
    %c0_114 = arith.constant 0 : index
    %c0_115 = arith.constant 0 : index
    %402 = vector.load %arg9[%401, %c0_114, %c0_115] : memref<8x8x128xf32, #tpu.memory_space<vmem>>, vector<1x8x128xf32>
    %403 = vector.shape_cast %402 : vector<1x8x128xf32> to vector<8x128xf32>
    %404 = vector.shape_cast %393 : vector<8x128xf32> to vector<1x8x128xf32>
    tpu.vector_store %arg9[%401, %c0_114, %c0_115], %404 {strides = array<i32>} : memref<8x8x128xf32, #tpu.memory_space<vmem>>, vector<1x8x128xf32>,
    %c4_i32 = arith.constant 4 : i32
    %c7_i32_116 = arith.constant 7 : i32
    %405 = arith.subi %c7_i32_116, %c4_i32 : i32
    %406 = arith.truncf %387 : vector<8x128xf32> to vector<8x128xbf16>
    %cst_117 = arith.constant dense<0.000000e+00> : vector<8x512xf32>
    %407 = tpu.matmul %406, %4, %cst_117 {dimension_numbers = #tpu.dot_dimension_numbers<[1], [0], [0], [1], [0, 0, 1, 1], [], []>} : vector<8x128xbf16>, vector<128x512xbf16>, vector<8x512xf32> -> vector<8x512xf32>
    %408 = arith.truncf %393 : vector<8x128xf32> to vector<8x128xbf16>
    %cst_118 = arith.constant dense<0.000000e+00> : vector<8x512xf32>
    %409 = tpu.matmul %408, %6, %cst_118 {dimension_numbers = #tpu.dot_dimension_numbers<[1], [0], [0], [1], [0, 0, 1, 1], [], []>} : vector<8x128xbf16>, vector<128x512xbf16>, vector<8x512xf32> -> vector<8x512xf32>
    %c0_119 = arith.constant 0 : index
    %410 = arith.index_cast %c4_i32 : i32 to index
    %c0_120 = arith.constant 0 : index
    %c0_121 = arith.constant 0 : index
    %411 = vector.load %arg2[%c0_119, %410, %c0_120, %c0_121] : memref<1x8x8x512xbf16, #tpu.memory_space<vmem>>, vector<1x1x8x512xbf16>
    %412 = vector.shape_cast %411 : vector<1x1x8x512xbf16> to vector<8x512xbf16>
    %413 = arith.extf %412 : vector<8x512xbf16> to vector<8x512xf32>
    %414 = arith.addf %413, %9 : vector<8x512xf32>
    %415 = arith.addf %414, %407 : vector<8x512xf32>
    %c0_122 = arith.constant 0 : index
    %416 = arith.index_cast %405 : i32 to index
    %c0_123 = arith.constant 0 : index
    %c0_124 = arith.constant 0 : index
    %417 = vector.load %arg3[%c0_122, %416, %c0_123, %c0_124] : memref<1x8x8x512xbf16, #tpu.memory_space<vmem>>, vector<1x1x8x512xbf16>
    %418 = vector.shape_cast %417 : vector<1x1x8x512xbf16> to vector<8x512xbf16>
    %419 = arith.extf %418 : vector<8x512xbf16> to vector<8x512xf32>
    %420 = arith.addf %419, %12 : vector<8x512xf32>
    %421 = arith.addf %420, %409 : vector<8x512xf32>
    %422 = vector.extract_strided_slice %415 {offsets = [0, 0], sizes = [8, 128], strides = [1, 1]} : vector<8x512xf32> to vector<8x128xf32>
    %423 = arith.negf %422 : vector<8x128xf32>
    %424 = math.exp %423 : vector<8x128xf32>
    %cst_125 = arith.constant 1.000000e+00 : f32
    %425 = vector.broadcast %cst_125 : f32 to vector<8x128xf32>
    %426 = arith.addf %425, %424 : vector<8x128xf32>
    %427 = arith.divf %425, %426 : vector<8x128xf32>
    %428 = vector.extract_strided_slice %415 {offsets = [0, 128], sizes = [8, 128], strides = [1, 1]} : vector<8x512xf32> to vector<8x128xf32>
    %429 = arith.negf %428 : vector<8x128xf32>
    %430 = math.exp %429 : vector<8x128xf32>
    %cst_126 = arith.constant 1.000000e+00 : f32
    %431 = vector.broadcast %cst_126 : f32 to vector<8x128xf32>
    %432 = arith.addf %431, %430 : vector<8x128xf32>
    %433 = arith.divf %431, %432 : vector<8x128xf32>
    %434 = vector.extract_strided_slice %415 {offsets = [0, 256], sizes = [8, 128], strides = [1, 1]} : vector<8x512xf32> to vector<8x128xf32>
    %435 = math.tanh %434 : vector<8x128xf32>
    %436 = vector.extract_strided_slice %415 {offsets = [0, 384], sizes = [8, 128], strides = [1, 1]} : vector<8x512xf32> to vector<8x128xf32>
    %437 = arith.negf %436 : vector<8x128xf32>
    %438 = math.exp %437 : vector<8x128xf32>
    %cst_127 = arith.constant 1.000000e+00 : f32
    %439 = vector.broadcast %cst_127 : f32 to vector<8x128xf32>
    %440 = arith.addf %439, %438 : vector<8x128xf32>
    %441 = arith.divf %439, %440 : vector<8x128xf32>
    %442 = arith.mulf %433, %390 : vector<8x128xf32>
    %443 = arith.mulf %427, %435 : vector<8x128xf32>
    %444 = arith.addf %442, %443 : vector<8x128xf32>
    %445 = math.tanh %444 : vector<8x128xf32>
    %446 = arith.mulf %441, %445 : vector<8x128xf32>
    %447 = vector.extract_strided_slice %421 {offsets = [0, 0], sizes = [8, 128], strides = [1, 1]} : vector<8x512xf32> to vector<8x128xf32>
    %448 = arith.negf %447 : vector<8x128xf32>
    %449 = math.exp %448 : vector<8x128xf32>
    %cst_128 = arith.constant 1.000000e+00 : f32
    %450 = vector.broadcast %cst_128 : f32 to vector<8x128xf32>
    %451 = arith.addf %450, %449 : vector<8x128xf32>
    %452 = arith.divf %450, %451 : vector<8x128xf32>
    %453 = vector.extract_strided_slice %421 {offsets = [0, 128], sizes = [8, 128], strides = [1, 1]} : vector<8x512xf32> to vector<8x128xf32>
    %454 = arith.negf %453 : vector<8x128xf32>
    %455 = math.exp %454 : vector<8x128xf32>
    %cst_129 = arith.constant 1.000000e+00 : f32
    %456 = vector.broadcast %cst_129 : f32 to vector<8x128xf32>
    %457 = arith.addf %456, %455 : vector<8x128xf32>
    %458 = arith.divf %456, %457 : vector<8x128xf32>
    %459 = vector.extract_strided_slice %421 {offsets = [0, 256], sizes = [8, 128], strides = [1, 1]} : vector<8x512xf32> to vector<8x128xf32>
    %460 = math.tanh %459 : vector<8x128xf32>
    %461 = vector.extract_strided_slice %421 {offsets = [0, 384], sizes = [8, 128], strides = [1, 1]} : vector<8x512xf32> to vector<8x128xf32>
    %462 = arith.negf %461 : vector<8x128xf32>
    %463 = math.exp %462 : vector<8x128xf32>
    %cst_130 = arith.constant 1.000000e+00 : f32
    %464 = vector.broadcast %cst_130 : f32 to vector<8x128xf32>
    %465 = arith.addf %464, %463 : vector<8x128xf32>
    %466 = arith.divf %464, %465 : vector<8x128xf32>
    %467 = arith.mulf %458, %396 : vector<8x128xf32>
    %468 = arith.mulf %452, %460 : vector<8x128xf32>
    %469 = arith.addf %467, %468 : vector<8x128xf32>
    %470 = math.tanh %469 : vector<8x128xf32>
    %471 = arith.mulf %466, %470 : vector<8x128xf32>
    %472 = arith.index_cast %c4_i32 : i32 to index
    %c0_131 = arith.constant 0 : index
    %c0_132 = arith.constant 0 : index
    %473 = vector.load %arg4[%472, %c0_131, %c0_132] : memref<8x8x1xf32, #tpu.memory_space<vmem>>, vector<1x8x1xf32>
    %474 = vector.shape_cast %473 : vector<1x8x1xf32> to vector<8x1xf32>
    %cst_133 = arith.constant 5.000000e-01 : f32
    %475 = vector.broadcast %cst_133 : f32 to vector<8x1xf32>
    %476 = arith.cmpf ogt, %474, %475 : vector<8x1xf32>
    %477 = arith.index_cast %405 : i32 to index
    %c0_134 = arith.constant 0 : index
    %c0_135 = arith.constant 0 : index
    %478 = vector.load %arg5[%477, %c0_134, %c0_135] : memref<8x8x1xf32, #tpu.memory_space<vmem>>, vector<1x8x1xf32>
    %479 = vector.shape_cast %478 : vector<1x8x1xf32> to vector<8x1xf32>
    %cst_136 = arith.constant 5.000000e-01 : f32
    %480 = vector.broadcast %cst_136 : f32 to vector<8x1xf32>
    %481 = arith.cmpf ogt, %479, %480 : vector<8x1xf32>
    %482 = vector.shape_cast %476 : vector<8x1xi1> to vector<8x1xi1>
    %483 = vector.broadcast %482 : vector<8x1xi1> to vector<8x128xi1>
    %484 = arith.select %483, %446, %387 : vector<8x128xi1>, vector<8x128xf32>
    %485 = vector.shape_cast %476 : vector<8x1xi1> to vector<8x1xi1>
    %486 = vector.broadcast %485 : vector<8x1xi1> to vector<8x128xi1>
    %487 = arith.select %486, %444, %390 : vector<8x128xi1>, vector<8x128xf32>
    %488 = vector.shape_cast %481 : vector<8x1xi1> to vector<8x1xi1>
    %489 = vector.broadcast %488 : vector<8x1xi1> to vector<8x128xi1>
    %490 = arith.select %489, %471, %393 : vector<8x128xi1>, vector<8x128xf32>
    %491 = vector.shape_cast %481 : vector<8x1xi1> to vector<8x1xi1>
    %492 = vector.broadcast %491 : vector<8x1xi1> to vector<8x128xi1>
    %493 = arith.select %492, %469, %396 : vector<8x128xi1>, vector<8x128xf32>
    %494 = arith.index_cast %c4_i32 : i32 to index
    %c0_137 = arith.constant 0 : index
    %c0_138 = arith.constant 0 : index
    %495 = vector.load %arg8[%494, %c0_137, %c0_138] : memref<8x8x128xf32, #tpu.memory_space<vmem>>, vector<1x8x128xf32>
    %496 = vector.shape_cast %495 : vector<1x8x128xf32> to vector<8x128xf32>
    %497 = vector.shape_cast %484 : vector<8x128xf32> to vector<1x8x128xf32>
    tpu.vector_store %arg8[%494, %c0_137, %c0_138], %497 {strides = array<i32>} : memref<8x8x128xf32, #tpu.memory_space<vmem>>, vector<1x8x128xf32>,
    %498 = arith.index_cast %405 : i32 to index
    %c0_139 = arith.constant 0 : index
    %c0_140 = arith.constant 0 : index
    %499 = vector.load %arg9[%498, %c0_139, %c0_140] : memref<8x8x128xf32, #tpu.memory_space<vmem>>, vector<1x8x128xf32>
    %500 = vector.shape_cast %499 : vector<1x8x128xf32> to vector<8x128xf32>
    %501 = vector.shape_cast %490 : vector<8x128xf32> to vector<1x8x128xf32>
    tpu.vector_store %arg9[%498, %c0_139, %c0_140], %501 {strides = array<i32>} : memref<8x8x128xf32, #tpu.memory_space<vmem>>, vector<1x8x128xf32>,
    %c5_i32 = arith.constant 5 : i32
    %c7_i32_141 = arith.constant 7 : i32
    %502 = arith.subi %c7_i32_141, %c5_i32 : i32
    %503 = arith.truncf %484 : vector<8x128xf32> to vector<8x128xbf16>
    %cst_142 = arith.constant dense<0.000000e+00> : vector<8x512xf32>
    %504 = tpu.matmul %503, %4, %cst_142 {dimension_numbers = #tpu.dot_dimension_numbers<[1], [0], [0], [1], [0, 0, 1, 1], [], []>} : vector<8x128xbf16>, vector<128x512xbf16>, vector<8x512xf32> -> vector<8x512xf32>
    %505 = arith.truncf %490 : vector<8x128xf32> to vector<8x128xbf16>
    %cst_143 = arith.constant dense<0.000000e+00> : vector<8x512xf32>
    %506 = tpu.matmul %505, %6, %cst_143 {dimension_numbers = #tpu.dot_dimension_numbers<[1], [0], [0], [1], [0, 0, 1, 1], [], []>} : vector<8x128xbf16>, vector<128x512xbf16>, vector<8x512xf32> -> vector<8x512xf32>
    %c0_144 = arith.constant 0 : index
    %507 = arith.index_cast %c5_i32 : i32 to index
    %c0_145 = arith.constant 0 : index
    %c0_146 = arith.constant 0 : index
    %508 = vector.load %arg2[%c0_144, %507, %c0_145, %c0_146] : memref<1x8x8x512xbf16, #tpu.memory_space<vmem>>, vector<1x1x8x512xbf16>
    %509 = vector.shape_cast %508 : vector<1x1x8x512xbf16> to vector<8x512xbf16>
    %510 = arith.extf %509 : vector<8x512xbf16> to vector<8x512xf32>
    %511 = arith.addf %510, %9 : vector<8x512xf32>
    %512 = arith.addf %511, %504 : vector<8x512xf32>
    %c0_147 = arith.constant 0 : index
    %513 = arith.index_cast %502 : i32 to index
    %c0_148 = arith.constant 0 : index
    %c0_149 = arith.constant 0 : index
    %514 = vector.load %arg3[%c0_147, %513, %c0_148, %c0_149] : memref<1x8x8x512xbf16, #tpu.memory_space<vmem>>, vector<1x1x8x512xbf16>
    %515 = vector.shape_cast %514 : vector<1x1x8x512xbf16> to vector<8x512xbf16>
    %516 = arith.extf %515 : vector<8x512xbf16> to vector<8x512xf32>
    %517 = arith.addf %516, %12 : vector<8x512xf32>
    %518 = arith.addf %517, %506 : vector<8x512xf32>
    %519 = vector.extract_strided_slice %512 {offsets = [0, 0], sizes = [8, 128], strides = [1, 1]} : vector<8x512xf32> to vector<8x128xf32>
    %520 = arith.negf %519 : vector<8x128xf32>
    %521 = math.exp %520 : vector<8x128xf32>
    %cst_150 = arith.constant 1.000000e+00 : f32
    %522 = vector.broadcast %cst_150 : f32 to vector<8x128xf32>
    %523 = arith.addf %522, %521 : vector<8x128xf32>
    %524 = arith.divf %522, %523 : vector<8x128xf32>
    %525 = vector.extract_strided_slice %512 {offsets = [0, 128], sizes = [8, 128], strides = [1, 1]} : vector<8x512xf32> to vector<8x128xf32>
    %526 = arith.negf %525 : vector<8x128xf32>
    %527 = math.exp %526 : vector<8x128xf32>
    %cst_151 = arith.constant 1.000000e+00 : f32
    %528 = vector.broadcast %cst_151 : f32 to vector<8x128xf32>
    %529 = arith.addf %528, %527 : vector<8x128xf32>
    %530 = arith.divf %528, %529 : vector<8x128xf32>
    %531 = vector.extract_strided_slice %512 {offsets = [0, 256], sizes = [8, 128], strides = [1, 1]} : vector<8x512xf32> to vector<8x128xf32>
    %532 = math.tanh %531 : vector<8x128xf32>
    %533 = vector.extract_strided_slice %512 {offsets = [0, 384], sizes = [8, 128], strides = [1, 1]} : vector<8x512xf32> to vector<8x128xf32>
    %534 = arith.negf %533 : vector<8x128xf32>
    %535 = math.exp %534 : vector<8x128xf32>
    %cst_152 = arith.constant 1.000000e+00 : f32
    %536 = vector.broadcast %cst_152 : f32 to vector<8x128xf32>
    %537 = arith.addf %536, %535 : vector<8x128xf32>
    %538 = arith.divf %536, %537 : vector<8x128xf32>
    %539 = arith.mulf %530, %487 : vector<8x128xf32>
    %540 = arith.mulf %524, %532 : vector<8x128xf32>
    %541 = arith.addf %539, %540 : vector<8x128xf32>
    %542 = math.tanh %541 : vector<8x128xf32>
    %543 = arith.mulf %538, %542 : vector<8x128xf32>
    %544 = vector.extract_strided_slice %518 {offsets = [0, 0], sizes = [8, 128], strides = [1, 1]} : vector<8x512xf32> to vector<8x128xf32>
    %545 = arith.negf %544 : vector<8x128xf32>
    %546 = math.exp %545 : vector<8x128xf32>
    %cst_153 = arith.constant 1.000000e+00 : f32
    %547 = vector.broadcast %cst_153 : f32 to vector<8x128xf32>
    %548 = arith.addf %547, %546 : vector<8x128xf32>
    %549 = arith.divf %547, %548 : vector<8x128xf32>
    %550 = vector.extract_strided_slice %518 {offsets = [0, 128], sizes = [8, 128], strides = [1, 1]} : vector<8x512xf32> to vector<8x128xf32>
    %551 = arith.negf %550 : vector<8x128xf32>
    %552 = math.exp %551 : vector<8x128xf32>
    %cst_154 = arith.constant 1.000000e+00 : f32
    %553 = vector.broadcast %cst_154 : f32 to vector<8x128xf32>
    %554 = arith.addf %553, %552 : vector<8x128xf32>
    %555 = arith.divf %553, %554 : vector<8x128xf32>
    %556 = vector.extract_strided_slice %518 {offsets = [0, 256], sizes = [8, 128], strides = [1, 1]} : vector<8x512xf32> to vector<8x128xf32>
    %557 = math.tanh %556 : vector<8x128xf32>
    %558 = vector.extract_strided_slice %518 {offsets = [0, 384], sizes = [8, 128], strides = [1, 1]} : vector<8x512xf32> to vector<8x128xf32>
    %559 = arith.negf %558 : vector<8x128xf32>
    %560 = math.exp %559 : vector<8x128xf32>
    %cst_155 = arith.constant 1.000000e+00 : f32
    %561 = vector.broadcast %cst_155 : f32 to vector<8x128xf32>
    %562 = arith.addf %561, %560 : vector<8x128xf32>
    %563 = arith.divf %561, %562 : vector<8x128xf32>
    %564 = arith.mulf %555, %493 : vector<8x128xf32>
    %565 = arith.mulf %549, %557 : vector<8x128xf32>
    %566 = arith.addf %564, %565 : vector<8x128xf32>
    %567 = math.tanh %566 : vector<8x128xf32>
    %568 = arith.mulf %563, %567 : vector<8x128xf32>
    %569 = arith.index_cast %c5_i32 : i32 to index
    %c0_156 = arith.constant 0 : index
    %c0_157 = arith.constant 0 : index
    %570 = vector.load %arg4[%569, %c0_156, %c0_157] : memref<8x8x1xf32, #tpu.memory_space<vmem>>, vector<1x8x1xf32>
    %571 = vector.shape_cast %570 : vector<1x8x1xf32> to vector<8x1xf32>
    %cst_158 = arith.constant 5.000000e-01 : f32
    %572 = vector.broadcast %cst_158 : f32 to vector<8x1xf32>
    %573 = arith.cmpf ogt, %571, %572 : vector<8x1xf32>
    %574 = arith.index_cast %502 : i32 to index
    %c0_159 = arith.constant 0 : index
    %c0_160 = arith.constant 0 : index
    %575 = vector.load %arg5[%574, %c0_159, %c0_160] : memref<8x8x1xf32, #tpu.memory_space<vmem>>, vector<1x8x1xf32>
    %576 = vector.shape_cast %575 : vector<1x8x1xf32> to vector<8x1xf32>
    %cst_161 = arith.constant 5.000000e-01 : f32
    %577 = vector.broadcast %cst_161 : f32 to vector<8x1xf32>
    %578 = arith.cmpf ogt, %576, %577 : vector<8x1xf32>
    %579 = vector.shape_cast %573 : vector<8x1xi1> to vector<8x1xi1>
    %580 = vector.broadcast %579 : vector<8x1xi1> to vector<8x128xi1>
    %581 = arith.select %580, %543, %484 : vector<8x128xi1>, vector<8x128xf32>
    %582 = vector.shape_cast %573 : vector<8x1xi1> to vector<8x1xi1>
    %583 = vector.broadcast %582 : vector<8x1xi1> to vector<8x128xi1>
    %584 = arith.select %583, %541, %487 : vector<8x128xi1>, vector<8x128xf32>
    %585 = vector.shape_cast %578 : vector<8x1xi1> to vector<8x1xi1>
    %586 = vector.broadcast %585 : vector<8x1xi1> to vector<8x128xi1>
    %587 = arith.select %586, %568, %490 : vector<8x128xi1>, vector<8x128xf32>
    %588 = vector.shape_cast %578 : vector<8x1xi1> to vector<8x1xi1>
    %589 = vector.broadcast %588 : vector<8x1xi1> to vector<8x128xi1>
    %590 = arith.select %589, %566, %493 : vector<8x128xi1>, vector<8x128xf32>
    %591 = arith.index_cast %c5_i32 : i32 to index
    %c0_162 = arith.constant 0 : index
    %c0_163 = arith.constant 0 : index
    %592 = vector.load %arg8[%591, %c0_162, %c0_163] : memref<8x8x128xf32, #tpu.memory_space<vmem>>, vector<1x8x128xf32>
    %593 = vector.shape_cast %592 : vector<1x8x128xf32> to vector<8x128xf32>
    %594 = vector.shape_cast %581 : vector<8x128xf32> to vector<1x8x128xf32>
    tpu.vector_store %arg8[%591, %c0_162, %c0_163], %594 {strides = array<i32>} : memref<8x8x128xf32, #tpu.memory_space<vmem>>, vector<1x8x128xf32>,
    %595 = arith.index_cast %502 : i32 to index
    %c0_164 = arith.constant 0 : index
    %c0_165 = arith.constant 0 : index
    %596 = vector.load %arg9[%595, %c0_164, %c0_165] : memref<8x8x128xf32, #tpu.memory_space<vmem>>, vector<1x8x128xf32>
    %597 = vector.shape_cast %596 : vector<1x8x128xf32> to vector<8x128xf32>
    %598 = vector.shape_cast %587 : vector<8x128xf32> to vector<1x8x128xf32>
    tpu.vector_store %arg9[%595, %c0_164, %c0_165], %598 {strides = array<i32>} : memref<8x8x128xf32, #tpu.memory_space<vmem>>, vector<1x8x128xf32>,
    %c6_i32 = arith.constant 6 : i32
    %c7_i32_166 = arith.constant 7 : i32
    %599 = arith.subi %c7_i32_166, %c6_i32 : i32
    %600 = arith.truncf %581 : vector<8x128xf32> to vector<8x128xbf16>
    %cst_167 = arith.constant dense<0.000000e+00> : vector<8x512xf32>
    %601 = tpu.matmul %600, %4, %cst_167 {dimension_numbers = #tpu.dot_dimension_numbers<[1], [0], [0], [1], [0, 0, 1, 1], [], []>} : vector<8x128xbf16>, vector<128x512xbf16>, vector<8x512xf32> -> vector<8x512xf32>
    %602 = arith.truncf %587 : vector<8x128xf32> to vector<8x128xbf16>
    %cst_168 = arith.constant dense<0.000000e+00> : vector<8x512xf32>
    %603 = tpu.matmul %602, %6, %cst_168 {dimension_numbers = #tpu.dot_dimension_numbers<[1], [0], [0], [1], [0, 0, 1, 1], [], []>} : vector<8x128xbf16>, vector<128x512xbf16>, vector<8x512xf32> -> vector<8x512xf32>
    %c0_169 = arith.constant 0 : index
    %604 = arith.index_cast %c6_i32 : i32 to index
    %c0_170 = arith.constant 0 : index
    %c0_171 = arith.constant 0 : index
    %605 = vector.load %arg2[%c0_169, %604, %c0_170, %c0_171] : memref<1x8x8x512xbf16, #tpu.memory_space<vmem>>, vector<1x1x8x512xbf16>
    %606 = vector.shape_cast %605 : vector<1x1x8x512xbf16> to vector<8x512xbf16>
    %607 = arith.extf %606 : vector<8x512xbf16> to vector<8x512xf32>
    %608 = arith.addf %607, %9 : vector<8x512xf32>
    %609 = arith.addf %608, %601 : vector<8x512xf32>
    %c0_172 = arith.constant 0 : index
    %610 = arith.index_cast %599 : i32 to index
    %c0_173 = arith.constant 0 : index
    %c0_174 = arith.constant 0 : index
    %611 = vector.load %arg3[%c0_172, %610, %c0_173, %c0_174] : memref<1x8x8x512xbf16, #tpu.memory_space<vmem>>, vector<1x1x8x512xbf16>
    %612 = vector.shape_cast %611 : vector<1x1x8x512xbf16> to vector<8x512xbf16>
    %613 = arith.extf %612 : vector<8x512xbf16> to vector<8x512xf32>
    %614 = arith.addf %613, %12 : vector<8x512xf32>
    %615 = arith.addf %614, %603 : vector<8x512xf32>
    %616 = vector.extract_strided_slice %609 {offsets = [0, 0], sizes = [8, 128], strides = [1, 1]} : vector<8x512xf32> to vector<8x128xf32>
    %617 = arith.negf %616 : vector<8x128xf32>
    %618 = math.exp %617 : vector<8x128xf32>
    %cst_175 = arith.constant 1.000000e+00 : f32
    %619 = vector.broadcast %cst_175 : f32 to vector<8x128xf32>
    %620 = arith.addf %619, %618 : vector<8x128xf32>
    %621 = arith.divf %619, %620 : vector<8x128xf32>
    %622 = vector.extract_strided_slice %609 {offsets = [0, 128], sizes = [8, 128], strides = [1, 1]} : vector<8x512xf32> to vector<8x128xf32>
    %623 = arith.negf %622 : vector<8x128xf32>
    %624 = math.exp %623 : vector<8x128xf32>
    %cst_176 = arith.constant 1.000000e+00 : f32
    %625 = vector.broadcast %cst_176 : f32 to vector<8x128xf32>
    %626 = arith.addf %625, %624 : vector<8x128xf32>
    %627 = arith.divf %625, %626 : vector<8x128xf32>
    %628 = vector.extract_strided_slice %609 {offsets = [0, 256], sizes = [8, 128], strides = [1, 1]} : vector<8x512xf32> to vector<8x128xf32>
    %629 = math.tanh %628 : vector<8x128xf32>
    %630 = vector.extract_strided_slice %609 {offsets = [0, 384], sizes = [8, 128], strides = [1, 1]} : vector<8x512xf32> to vector<8x128xf32>
    %631 = arith.negf %630 : vector<8x128xf32>
    %632 = math.exp %631 : vector<8x128xf32>
    %cst_177 = arith.constant 1.000000e+00 : f32
    %633 = vector.broadcast %cst_177 : f32 to vector<8x128xf32>
    %634 = arith.addf %633, %632 : vector<8x128xf32>
    %635 = arith.divf %633, %634 : vector<8x128xf32>
    %636 = arith.mulf %627, %584 : vector<8x128xf32>
    %637 = arith.mulf %621, %629 : vector<8x128xf32>
    %638 = arith.addf %636, %637 : vector<8x128xf32>
    %639 = math.tanh %638 : vector<8x128xf32>
    %640 = arith.mulf %635, %639 : vector<8x128xf32>
    %641 = vector.extract_strided_slice %615 {offsets = [0, 0], sizes = [8, 128], strides = [1, 1]} : vector<8x512xf32> to vector<8x128xf32>
    %642 = arith.negf %641 : vector<8x128xf32>
    %643 = math.exp %642 : vector<8x128xf32>
    %cst_178 = arith.constant 1.000000e+00 : f32
    %644 = vector.broadcast %cst_178 : f32 to vector<8x128xf32>
    %645 = arith.addf %644, %643 : vector<8x128xf32>
    %646 = arith.divf %644, %645 : vector<8x128xf32>
    %647 = vector.extract_strided_slice %615 {offsets = [0, 128], sizes = [8, 128], strides = [1, 1]} : vector<8x512xf32> to vector<8x128xf32>
    %648 = arith.negf %647 : vector<8x128xf32>
    %649 = math.exp %648 : vector<8x128xf32>
    %cst_179 = arith.constant 1.000000e+00 : f32
    %650 = vector.broadcast %cst_179 : f32 to vector<8x128xf32>
    %651 = arith.addf %650, %649 : vector<8x128xf32>
    %652 = arith.divf %650, %651 : vector<8x128xf32>
    %653 = vector.extract_strided_slice %615 {offsets = [0, 256], sizes = [8, 128], strides = [1, 1]} : vector<8x512xf32> to vector<8x128xf32>
    %654 = math.tanh %653 : vector<8x128xf32>
    %655 = vector.extract_strided_slice %615 {offsets = [0, 384], sizes = [8, 128], strides = [1, 1]} : vector<8x512xf32> to vector<8x128xf32>
    %656 = arith.negf %655 : vector<8x128xf32>
    %657 = math.exp %656 : vector<8x128xf32>
    %cst_180 = arith.constant 1.000000e+00 : f32
    %658 = vector.broadcast %cst_180 : f32 to vector<8x128xf32>
    %659 = arith.addf %658, %657 : vector<8x128xf32>
    %660 = arith.divf %658, %659 : vector<8x128xf32>
    %661 = arith.mulf %652, %590 : vector<8x128xf32>
    %662 = arith.mulf %646, %654 : vector<8x128xf32>
    %663 = arith.addf %661, %662 : vector<8x128xf32>
    %664 = math.tanh %663 : vector<8x128xf32>
    %665 = arith.mulf %660, %664 : vector<8x128xf32>
    %666 = arith.index_cast %c6_i32 : i32 to index
    %c0_181 = arith.constant 0 : index
    %c0_182 = arith.constant 0 : index
    %667 = vector.load %arg4[%666, %c0_181, %c0_182] : memref<8x8x1xf32, #tpu.memory_space<vmem>>, vector<1x8x1xf32>
    %668 = vector.shape_cast %667 : vector<1x8x1xf32> to vector<8x1xf32>
    %cst_183 = arith.constant 5.000000e-01 : f32
    %669 = vector.broadcast %cst_183 : f32 to vector<8x1xf32>
    %670 = arith.cmpf ogt, %668, %669 : vector<8x1xf32>
    %671 = arith.index_cast %599 : i32 to index
    %c0_184 = arith.constant 0 : index
    %c0_185 = arith.constant 0 : index
    %672 = vector.load %arg5[%671, %c0_184, %c0_185] : memref<8x8x1xf32, #tpu.memory_space<vmem>>, vector<1x8x1xf32>
    %673 = vector.shape_cast %672 : vector<1x8x1xf32> to vector<8x1xf32>
    %cst_186 = arith.constant 5.000000e-01 : f32
    %674 = vector.broadcast %cst_186 : f32 to vector<8x1xf32>
    %675 = arith.cmpf ogt, %673, %674 : vector<8x1xf32>
    %676 = vector.shape_cast %670 : vector<8x1xi1> to vector<8x1xi1>
    %677 = vector.broadcast %676 : vector<8x1xi1> to vector<8x128xi1>
    %678 = arith.select %677, %640, %581 : vector<8x128xi1>, vector<8x128xf32>
    %679 = vector.shape_cast %670 : vector<8x1xi1> to vector<8x1xi1>
    %680 = vector.broadcast %679 : vector<8x1xi1> to vector<8x128xi1>
    %681 = arith.select %680, %638, %584 : vector<8x128xi1>, vector<8x128xf32>
    %682 = vector.shape_cast %675 : vector<8x1xi1> to vector<8x1xi1>
    %683 = vector.broadcast %682 : vector<8x1xi1> to vector<8x128xi1>
    %684 = arith.select %683, %665, %587 : vector<8x128xi1>, vector<8x128xf32>
    %685 = vector.shape_cast %675 : vector<8x1xi1> to vector<8x1xi1>
    %686 = vector.broadcast %685 : vector<8x1xi1> to vector<8x128xi1>
    %687 = arith.select %686, %663, %590 : vector<8x128xi1>, vector<8x128xf32>
    %688 = arith.index_cast %c6_i32 : i32 to index
    %c0_187 = arith.constant 0 : index
    %c0_188 = arith.constant 0 : index
    %689 = vector.load %arg8[%688, %c0_187, %c0_188] : memref<8x8x128xf32, #tpu.memory_space<vmem>>, vector<1x8x128xf32>
    %690 = vector.shape_cast %689 : vector<1x8x128xf32> to vector<8x128xf32>
    %691 = vector.shape_cast %678 : vector<8x128xf32> to vector<1x8x128xf32>
    tpu.vector_store %arg8[%688, %c0_187, %c0_188], %691 {strides = array<i32>} : memref<8x8x128xf32, #tpu.memory_space<vmem>>, vector<1x8x128xf32>,
    %692 = arith.index_cast %599 : i32 to index
    %c0_189 = arith.constant 0 : index
    %c0_190 = arith.constant 0 : index
    %693 = vector.load %arg9[%692, %c0_189, %c0_190] : memref<8x8x128xf32, #tpu.memory_space<vmem>>, vector<1x8x128xf32>
    %694 = vector.shape_cast %693 : vector<1x8x128xf32> to vector<8x128xf32>
    %695 = vector.shape_cast %684 : vector<8x128xf32> to vector<1x8x128xf32>
    tpu.vector_store %arg9[%692, %c0_189, %c0_190], %695 {strides = array<i32>} : memref<8x8x128xf32, #tpu.memory_space<vmem>>, vector<1x8x128xf32>,
    %c7_i32_191 = arith.constant 7 : i32
    %c7_i32_192 = arith.constant 7 : i32
    %696 = arith.subi %c7_i32_192, %c7_i32_191 : i32
    %697 = arith.truncf %678 : vector<8x128xf32> to vector<8x128xbf16>
    %cst_193 = arith.constant dense<0.000000e+00> : vector<8x512xf32>
    %698 = tpu.matmul %697, %4, %cst_193 {dimension_numbers = #tpu.dot_dimension_numbers<[1], [0], [0], [1], [0, 0, 1, 1], [], []>} : vector<8x128xbf16>, vector<128x512xbf16>, vector<8x512xf32> -> vector<8x512xf32>
    %699 = arith.truncf %684 : vector<8x128xf32> to vector<8x128xbf16>
    %cst_194 = arith.constant dense<0.000000e+00> : vector<8x512xf32>
    %700 = tpu.matmul %699, %6, %cst_194 {dimension_numbers = #tpu.dot_dimension_numbers<[1], [0], [0], [1], [0, 0, 1, 1], [], []>} : vector<8x128xbf16>, vector<128x512xbf16>, vector<8x512xf32> -> vector<8x512xf32>
    %c0_195 = arith.constant 0 : index
    %701 = arith.index_cast %c7_i32_191 : i32 to index
    %c0_196 = arith.constant 0 : index
    %c0_197 = arith.constant 0 : index
    %702 = vector.load %arg2[%c0_195, %701, %c0_196, %c0_197] : memref<1x8x8x512xbf16, #tpu.memory_space<vmem>>, vector<1x1x8x512xbf16>
    %703 = vector.shape_cast %702 : vector<1x1x8x512xbf16> to vector<8x512xbf16>
    %704 = arith.extf %703 : vector<8x512xbf16> to vector<8x512xf32>
    %705 = arith.addf %704, %9 : vector<8x512xf32>
    %706 = arith.addf %705, %698 : vector<8x512xf32>
    %c0_198 = arith.constant 0 : index
    %707 = arith.index_cast %696 : i32 to index
    %c0_199 = arith.constant 0 : index
    %c0_200 = arith.constant 0 : index
    %708 = vector.load %arg3[%c0_198, %707, %c0_199, %c0_200] : memref<1x8x8x512xbf16, #tpu.memory_space<vmem>>, vector<1x1x8x512xbf16>
    %709 = vector.shape_cast %708 : vector<1x1x8x512xbf16> to vector<8x512xbf16>
    %710 = arith.extf %709 : vector<8x512xbf16> to vector<8x512xf32>
    %711 = arith.addf %710, %12 : vector<8x512xf32>
    %712 = arith.addf %711, %700 : vector<8x512xf32>
    %713 = vector.extract_strided_slice %706 {offsets = [0, 0], sizes = [8, 128], strides = [1, 1]} : vector<8x512xf32> to vector<8x128xf32>
    %714 = arith.negf %713 : vector<8x128xf32>
    %715 = math.exp %714 : vector<8x128xf32>
    %cst_201 = arith.constant 1.000000e+00 : f32
    %716 = vector.broadcast %cst_201 : f32 to vector<8x128xf32>
    %717 = arith.addf %716, %715 : vector<8x128xf32>
    %718 = arith.divf %716, %717 : vector<8x128xf32>
    %719 = vector.extract_strided_slice %706 {offsets = [0, 128], sizes = [8, 128], strides = [1, 1]} : vector<8x512xf32> to vector<8x128xf32>
    %720 = arith.negf %719 : vector<8x128xf32>
    %721 = math.exp %720 : vector<8x128xf32>
    %cst_202 = arith.constant 1.000000e+00 : f32
    %722 = vector.broadcast %cst_202 : f32 to vector<8x128xf32>
    %723 = arith.addf %722, %721 : vector<8x128xf32>
    %724 = arith.divf %722, %723 : vector<8x128xf32>
    %725 = vector.extract_strided_slice %706 {offsets = [0, 256], sizes = [8, 128], strides = [1, 1]} : vector<8x512xf32> to vector<8x128xf32>
    %726 = math.tanh %725 : vector<8x128xf32>
    %727 = vector.extract_strided_slice %706 {offsets = [0, 384], sizes = [8, 128], strides = [1, 1]} : vector<8x512xf32> to vector<8x128xf32>
    %728 = arith.negf %727 : vector<8x128xf32>
    %729 = math.exp %728 : vector<8x128xf32>
    %cst_203 = arith.constant 1.000000e+00 : f32
    %730 = vector.broadcast %cst_203 : f32 to vector<8x128xf32>
    %731 = arith.addf %730, %729 : vector<8x128xf32>
    %732 = arith.divf %730, %731 : vector<8x128xf32>
    %733 = arith.mulf %724, %681 : vector<8x128xf32>
    %734 = arith.mulf %718, %726 : vector<8x128xf32>
    %735 = arith.addf %733, %734 : vector<8x128xf32>
    %736 = math.tanh %735 : vector<8x128xf32>
    %737 = arith.mulf %732, %736 : vector<8x128xf32>
    %738 = vector.extract_strided_slice %712 {offsets = [0, 0], sizes = [8, 128], strides = [1, 1]} : vector<8x512xf32> to vector<8x128xf32>
    %739 = arith.negf %738 : vector<8x128xf32>
    %740 = math.exp %739 : vector<8x128xf32>
    %cst_204 = arith.constant 1.000000e+00 : f32
    %741 = vector.broadcast %cst_204 : f32 to vector<8x128xf32>
    %742 = arith.addf %741, %740 : vector<8x128xf32>
    %743 = arith.divf %741, %742 : vector<8x128xf32>
    %744 = vector.extract_strided_slice %712 {offsets = [0, 128], sizes = [8, 128], strides = [1, 1]} : vector<8x512xf32> to vector<8x128xf32>
    %745 = arith.negf %744 : vector<8x128xf32>
    %746 = math.exp %745 : vector<8x128xf32>
    %cst_205 = arith.constant 1.000000e+00 : f32
    %747 = vector.broadcast %cst_205 : f32 to vector<8x128xf32>
    %748 = arith.addf %747, %746 : vector<8x128xf32>
    %749 = arith.divf %747, %748 : vector<8x128xf32>
    %750 = vector.extract_strided_slice %712 {offsets = [0, 256], sizes = [8, 128], strides = [1, 1]} : vector<8x512xf32> to vector<8x128xf32>
    %751 = math.tanh %750 : vector<8x128xf32>
    %752 = vector.extract_strided_slice %712 {offsets = [0, 384], sizes = [8, 128], strides = [1, 1]} : vector<8x512xf32> to vector<8x128xf32>
    %753 = arith.negf %752 : vector<8x128xf32>
    %754 = math.exp %753 : vector<8x128xf32>
    %cst_206 = arith.constant 1.000000e+00 : f32
    %755 = vector.broadcast %cst_206 : f32 to vector<8x128xf32>
    %756 = arith.addf %755, %754 : vector<8x128xf32>
    %757 = arith.divf %755, %756 : vector<8x128xf32>
    %758 = arith.mulf %749, %687 : vector<8x128xf32>
    %759 = arith.mulf %743, %751 : vector<8x128xf32>
    %760 = arith.addf %758, %759 : vector<8x128xf32>
    %761 = math.tanh %760 : vector<8x128xf32>
    %762 = arith.mulf %757, %761 : vector<8x128xf32>
    %763 = arith.index_cast %c7_i32_191 : i32 to index
    %c0_207 = arith.constant 0 : index
    %c0_208 = arith.constant 0 : index
    %764 = vector.load %arg4[%763, %c0_207, %c0_208] : memref<8x8x1xf32, #tpu.memory_space<vmem>>, vector<1x8x1xf32>
    %765 = vector.shape_cast %764 : vector<1x8x1xf32> to vector<8x1xf32>
    %cst_209 = arith.constant 5.000000e-01 : f32
    %766 = vector.broadcast %cst_209 : f32 to vector<8x1xf32>
    %767 = arith.cmpf ogt, %765, %766 : vector<8x1xf32>
    %768 = arith.index_cast %696 : i32 to index
    %c0_210 = arith.constant 0 : index
    %c0_211 = arith.constant 0 : index
    %769 = vector.load %arg5[%768, %c0_210, %c0_211] : memref<8x8x1xf32, #tpu.memory_space<vmem>>, vector<1x8x1xf32>
    %770 = vector.shape_cast %769 : vector<1x8x1xf32> to vector<8x1xf32>
    %cst_212 = arith.constant 5.000000e-01 : f32
    %771 = vector.broadcast %cst_212 : f32 to vector<8x1xf32>
    %772 = arith.cmpf ogt, %770, %771 : vector<8x1xf32>
    %773 = vector.shape_cast %767 : vector<8x1xi1> to vector<8x1xi1>
    %774 = vector.broadcast %773 : vector<8x1xi1> to vector<8x128xi1>
    %775 = arith.select %774, %737, %678 : vector<8x128xi1>, vector<8x128xf32>
    %776 = vector.shape_cast %767 : vector<8x1xi1> to vector<8x1xi1>
    %777 = vector.broadcast %776 : vector<8x1xi1> to vector<8x128xi1>
    %778 = arith.select %777, %735, %681 : vector<8x128xi1>, vector<8x128xf32>
    %779 = vector.shape_cast %772 : vector<8x1xi1> to vector<8x1xi1>
    %780 = vector.broadcast %779 : vector<8x1xi1> to vector<8x128xi1>
    %781 = arith.select %780, %762, %684 : vector<8x128xi1>, vector<8x128xf32>
    %782 = vector.shape_cast %772 : vector<8x1xi1> to vector<8x1xi1>
    %783 = vector.broadcast %782 : vector<8x1xi1> to vector<8x128xi1>
    %784 = arith.select %783, %760, %687 : vector<8x128xi1>, vector<8x128xf32>
    %785 = arith.index_cast %c7_i32_191 : i32 to index
    %c0_213 = arith.constant 0 : index
    %c0_214 = arith.constant 0 : index
    %786 = vector.load %arg8[%785, %c0_213, %c0_214] : memref<8x8x128xf32, #tpu.memory_space<vmem>>, vector<1x8x128xf32>
    %787 = vector.shape_cast %786 : vector<1x8x128xf32> to vector<8x128xf32>
    %788 = vector.shape_cast %775 : vector<8x128xf32> to vector<1x8x128xf32>
    tpu.vector_store %arg8[%785, %c0_213, %c0_214], %788 {strides = array<i32>} : memref<8x8x128xf32, #tpu.memory_space<vmem>>, vector<1x8x128xf32>,
    %789 = arith.index_cast %696 : i32 to index
    %c0_215 = arith.constant 0 : index
    %c0_216 = arith.constant 0 : index
    %790 = vector.load %arg9[%789, %c0_215, %c0_216] : memref<8x8x128xf32, #tpu.memory_space<vmem>>, vector<1x8x128xf32>
    %791 = vector.shape_cast %790 : vector<1x8x128xf32> to vector<8x128xf32>
    %792 = vector.shape_cast %781 : vector<8x128xf32> to vector<1x8x128xf32>
    tpu.vector_store %arg9[%789, %c0_215, %c0_216], %792 {strides = array<i32>} : memref<8x8x128xf32, #tpu.memory_space<vmem>>, vector<1x8x128xf32>,
    %c8_i32 = arith.constant 8 : i32
    %c0_217 = arith.constant 0 : index
    %c0_218 = arith.constant 0 : index
    %793 = vector.load %arg10[%c0_217, %c0_218] : memref<8x128xf32, #tpu.memory_space<vmem>>, vector<8x128xf32>
    tpu.vector_store %arg10[%c0_217, %c0_218], %775 {strides = array<i32>} : memref<8x128xf32, #tpu.memory_space<vmem>>, vector<8x128xf32>,
    %c0_219 = arith.constant 0 : index
    %c0_220 = arith.constant 0 : index
    %794 = vector.load %arg11[%c0_219, %c0_220] : memref<8x128xf32, #tpu.memory_space<vmem>>, vector<8x128xf32>
    tpu.vector_store %arg11[%c0_219, %c0_220], %778 {strides = array<i32>} : memref<8x128xf32, #tpu.memory_space<vmem>>, vector<8x128xf32>,
    %c0_221 = arith.constant 0 : index
    %c0_222 = arith.constant 0 : index
    %795 = vector.load %arg12[%c0_221, %c0_222] : memref<8x128xf32, #tpu.memory_space<vmem>>, vector<8x128xf32>
    tpu.vector_store %arg12[%c0_221, %c0_222], %781 {strides = array<i32>} : memref<8x128xf32, #tpu.memory_space<vmem>>, vector<8x128xf32>,
    %c0_223 = arith.constant 0 : index
    %c0_224 = arith.constant 0 : index
    %796 = vector.load %arg13[%c0_223, %c0_224] : memref<8x128xf32, #tpu.memory_space<vmem>>, vector<8x128xf32>
    tpu.vector_store %arg13[%c0_223, %c0_224], %784 {strides = array<i32>} : memref<8x128xf32, #tpu.memory_space<vmem>>, vector<8x128xf32>,
    return
  }
  func.func @transform_0(%arg0: i32, %arg1: i32) -> (i32, i32, i32, i32) {
    %c0_i32 = arith.constant 0 : i32
    %c0_i32_0 = arith.constant 0 : i32
    %c0_i32_1 = arith.constant 0 : i32
    return %c0_i32, %arg1, %arg0, %c0_i32_0 : i32, i32, i32, i32
  }
  func.func @transform_1(%arg0: i32, %arg1: i32) -> (i32, i32, i32, i32) {
    %c0_i32 = arith.constant 0 : i32
    %0 = arith.subi %c0_i32, %arg1 : i32
    %c1_i32 = arith.constant 1 : i32
    %c0_i32_0 = arith.constant 0 : i32
    %c0_i32_1 = arith.constant 0 : i32
    return %c1_i32, %0, %arg0, %c0_i32_0 : i32, i32, i32, i32
  }
  func.func @transform_2(%arg0: i32, %arg1: i32) -> (i32, i32, i32) {
    %c0_i32 = arith.constant 0 : i32
    %c0_i32_0 = arith.constant 0 : i32
    return %arg1, %arg0, %c0_i32 : i32, i32, i32
  }
  func.func @transform_3(%arg0: i32, %arg1: i32) -> (i32, i32, i32) {
    %c0_i32 = arith.constant 0 : i32
    %0 = arith.subi %c0_i32, %arg1 : i32
    %c0_i32_0 = arith.constant 0 : i32
    %c0_i32_1 = arith.constant 0 : i32
    return %0, %arg0, %c0_i32_0 : i32, i32, i32
  }
  func.func @transform_4(%arg0: i32, %arg1: i32) -> (i32, i32, i32) {
    %c0_i32 = arith.constant 0 : i32
    %c0_i32_0 = arith.constant 0 : i32
    %c0_i32_1 = arith.constant 0 : i32
    %c0_i32_2 = arith.constant 0 : i32
    return %c0_i32, %c0_i32_0, %c0_i32_1 : i32, i32, i32
  }
  func.func @transform_5(%arg0: i32, %arg1: i32) -> (i32, i32) {
    %c0_i32 = arith.constant 0 : i32
    %c0_i32_0 = arith.constant 0 : i32
    %c0_i32_1 = arith.constant 0 : i32
    return %c0_i32, %c0_i32_0 : i32, i32
  }
  func.func @transform_6(%arg0: i32, %arg1: i32) -> (i32, i32, i32) {
    %c0_i32 = arith.constant 0 : i32
    %c0_i32_0 = arith.constant 0 : i32
    return %arg1, %arg0, %c0_i32 : i32, i32, i32
  }
  func.func @transform_7(%arg0: i32, %arg1: i32) -> (i32, i32, i32) {
    %c0_i32 = arith.constant 0 : i32
    %0 = arith.subi %c0_i32, %arg1 : i32
    %c0_i32_0 = arith.constant 0 : i32
    %c0_i32_1 = arith.constant 0 : i32
    return %0, %arg0, %c0_i32_0 : i32, i32, i32
  }
}

</mosaic_0001>

<bundles_post_ra>
// kernel: tpu_custom_call.1
= control target key start
LH: loop header
LB: loop body
LE: loop exit
PB: predicated region body
PF: predicated region fallthrough
CT: control target
= control target key end

     0   :  { %13 = vsyncpa [#allocation7], 0  ;;  %s4882_s0 = inlined_call_operand.hbm [shape: bf16[2,8,8,512], index: 0, kind: input, shape index: {}]   ;;  %s4883_s1 = inlined_call_operand.hbm [shape: bf16[2,8,8,512], index: 1, kind: input, shape index: {}]   ;;  %s4884_s2 = inlined_call_operand.vmem [shape: f32[8,8,1], index: 2, kind: input, shape index: {}]   ;;  %s4885_s3 = inlined_call_operand.vmem [shape: f32[8,8,1], index: 3, kind: input, shape index: {}]   ;;  %s4886_s4 = inlined_call_operand.hbm [shape: bf16[2,128,512], index: 4, kind: input, shape index: {}]   ;;  %s4887_s5 = inlined_call_operand.vmem [shape: f32[2,512], index: 5, kind: input, shape index: {}]   ;;  %s4888_s6 = inlined_call_operand.hbm [shape: f32[8,8,128], index: 6, kind: output, shape index: {0}]   ;;  %s4889_s7 = inlined_call_operand.hbm [shape: f32[8,8,128], index: 7, kind: output, shape index: {1}]  }
   0x1   :  { %14 = vsyncpa [#allocation10], 0 }
   0x2   :  { %15 = vsyncpa [#allocation8], 0 }
   0x3   :  { %16 = vsyncpa [#allocation14], 0  ;;  %s2726_s26 = scalar_lea.hbm %s4883_s1, 2048  ;;  %s3488_s27 = smov [#allocation9]  }
   0x4   :  { %s40_s28 = sshll.u32 %s3488_s27, 4  ;;  %s3489_s29 = smov [#allocation6]   ;;  %s41_s28 = int_to_ptr.vmem [resolvable:$true] %s40_s28 }
   0x5   :  { %s22_s30 = sshll.u32 %s3489_s29, 4  ;;  %s3391_s10 = scalar_lea.hbm %s4883_s1, 4096  ;;  %s23_s30 = int_to_ptr.vmem [resolvable:$true] %s22_s30 }
   0x6   :  { %p3368_p0 = scmp.ne.s32.totalorder %s2726_s26, %s3391_s10  ;;  %p3370_p1 = scmp.lt.u32.totalorder %s2726_s26, %s4883_s1 }
   0x7   :  { %p3371_p2 = scmp.lt.u32.totalorder %s3391_s10, %s3391_s10  ;;  %p3373_p4 = scmp.lt.u32.totalorder %s3391_s10, %s2726_s26 }
   0x9   :  { %p3372_p3 = por %p3371_p2, %p3370_p1 }
   0xb   :  { %p3374_p5 = por %p3373_p4, %p3372_p3 }
   0xd   :  { %p3375_p6 = pnand %p3374_p5, %p3368_p0 }
   0xf   :  { %3378 = shalt.err (!%p3375_p6)
}
  0x10   :  { %s3379_s13 = scalar_lea.vmem %s41_s28, 2048  ;;  %p3384_p8 = scmp.lt.s32.totalorder %s41_s28, %s41_s28 }
  0x11   :  { %p3380_p7 = scmp.ne.s32.totalorder %s41_s28, %s3379_s13  ;;  %p3385_p9 = scmp.lt.s32.totalorder %s3379_s13, %s3379_s13 }
  0x13   :  { %p3386_p10 = por %p3385_p9, %p3384_p8 }
  0x15   :  { %p3387_p11 = pnand %p3386_p10, %p3380_p7 }
  0x17   :  { %3390 = shalt.err (!%p3387_p11)
}
  0x18   :  { %s3490_s14 = smov 256   ;;  %s3491_s15 = smov 16  }
  0x19   :  { %46 = dma.hbm_to_vmem [thread:$0]  %s2726_s26, 2048, %s41_s28, [#allocation10], %s3490_s14, %s3490_s14, %s3491_s15  }
  0x1a   :  { %s3392_s17 = scalar_lea.hbm %s4882_s0, 2048  ;;  %s3394_s22 = scalar_lea.hbm %s4882_s0, 4096 }
  0x1b   :  { %p3393_p12 = scmp.ne.s32.totalorder %s4882_s0, %s3392_s17  ;;  %p3395_p13 = scmp.lt.u32.totalorder %s3394_s22, %s3392_s17 }
  0x1c   :  { %p3396_p0 = scmp.lt.u32.totalorder %s3392_s17, %s4882_s0 }
  0x1e   :  { %p3397_p1 = por %p3396_p0, %p3395_p13 }
  0x20   :  { %p3398_p2 = pnand %p3397_p1, %p3393_p12 }
  0x22   :  { %3401 = shalt.err (!%p3398_p2)
}
  0x23   :  { %s3402_s25 = scalar_lea.vmem %s23_s30, 2048  ;;  %p3407_p4 = scmp.lt.s32.totalorder %s23_s30, %s23_s30 }
  0x24   :  { %p3403_p3 = scmp.ne.s32.totalorder %s23_s30, %s3402_s25  ;;  %p3408_p5 = scmp.lt.s32.totalorder %s3402_s25, %s3402_s25 }
  0x26   :  { %p3409_p6 = por %p3408_p5, %p3407_p4 }
  0x28   :  { %p3410_p7 = pnand %p3409_p6, %p3403_p3 }
  0x2a   :  { %3413 = shalt.err (!%p3410_p7)
}
  0x2b   :  { %28 = dma.hbm_to_vmem [thread:$0]  %s4882_s0, 2048, %s23_s30, [#allocation7], %s3490_s14, %s3490_s14, %s3491_s15  }
  0x2c   :  { %s3492_s28 = smov [#allocation11]   ;;  %s3414_s10 = scalar_lea.hbm %s4886_s4, 8192 }
  0x2d   :  { %s64_s29 = sshll.u32 %s3492_s28, 4  ;;  %p3415_p8 = scmp.ne.s32.totalorder %s4886_s4, %s3414_s10  ;;  %s65_s29 = int_to_ptr.vmem [resolvable:$true] %s64_s29 }
  0x2e   :  { %p3418_p9 = scmp.lt.u32.totalorder %s3414_s10, %s4886_s4 }
  0x30   :  { %p3420_p10 = pnand %p3418_p9, %p3415_p8 }
  0x32   :  { %3423 = shalt.err (!%p3420_p10)
}
  0x33   :  { %s3424_s16 = scalar_lea.vmem %s65_s29, 8192  ;;  %p3429_p12 = scmp.lt.s32.totalorder %s65_s29, %s65_s29 }
  0x34   :  { %p3425_p11 = scmp.ne.s32.totalorder %s65_s29, %s3424_s16  ;;  %p3430_p13 = scmp.lt.s32.totalorder %s3424_s16, %s3424_s16 }
  0x36   :  { %p3431_p0 = por %p3430_p13, %p3429_p12 }
  0x38   :  { %p3432_p1 = pnand %p3431_p0, %p3425_p11 }
  0x3a   :  { %3435 = shalt.err (!%p3432_p1)
}
  0x3b   :  { %70 = dma.hbm_to_vmem [thread:$0]  %s4886_s4, 8192, %s65_s29, [#allocation10], %s3490_s14, %s3490_s14, %s3491_s15  }
  0x3c   :  { %3480 = dma.done.wait [#allocation7], 2048  }
  0x3d   :  { %3481 = vsyncadd [#allocation7], 4294965248 }
  0x3e   :  { %3482 = dma.done.wait [#allocation10], 10240  }
  0x3f   :  { %3483 = vsyncadd [#allocation10], 4294957056  ;;  %v4910_v0 = vmov 0   ;;  %v3588_v1 = vld [vmem:[#allocation11 + $0x4] ss:$16 sps:$4 sm:$0xff]   ;;  %v4890_v37 = vmov 0.0|0.0  }
  0x40   :  { %416 = vmatprep.mubr.bf16.mxu0 %v4910_v0  ;;  %457 = vmatprep.mubr.bf16.mxu1 %v4910_v0  ;;  %v3590_v2 = vld [vmem:[#allocation11] ss:$16 sps:$4 sm:$0xff]   ;;  %v3593_v3 = vld [vmem:[#allocation11 + $0x24] ss:$16 sps:$4 sm:$0xff]   ;;  %v3601_v6 = vld [vmem:[#allocation11 + $0xc] ss:$16 sps:$4 sm:$0xff]  }
  0x41   :  { %2885 = vset.pattern.permute.xlu0 %v4910_v0  ;;  %2886 = vset.pattern.permute.xlu1 %v4910_v0  ;;  %v3596_v4 = vld [vmem:[#allocation11 + $0x20] ss:$16 sps:$4 sm:$0xff]   ;;  %v3599_v5 = vld [vmem:[#allocation11 + $0x44] ss:$16 sps:$4 sm:$0xff]   ;;  %v3603_v7 = vld [vmem:[#allocation11 + $0x8] ss:$16 sps:$4 sm:$0xff]  }
  0x42   :  { %384 = vmatprep.subr.bf16.mxu0 %v3588_v1  ;;  %v3606_v8 = vld [vmem:[#allocation11 + $0x40] ss:$16 sps:$4 sm:$0xff]   ;;  %425 = vmatprep.subr.bf16.mxu1 %v3601_v6  ;;  %v3610_v9 = vld [vmem:[#allocation11 + $0x64] ss:$16 sps:$4 sm:$0xff]   ;;  %v3613_v10 = vld [vmem:[#allocation11 + $0x2c] ss:$16 sps:$4 sm:$0xff]  }
  0x43   :  { %385 = vmatpush1.bf16.msra.mxu0 %v3590_v2  ;;  %426 = vmatpush1.bf16.msra.mxu1 %v3603_v7  ;;  %v3615_v11 = vld [vmem:[#allocation11 + $0x28] ss:$16 sps:$4 sm:$0xff]   ;;  %v3619_v12 = vld [vmem:[#allocation11 + $0x60] ss:$16 sps:$4 sm:$0xff]   ;;  %v3621_v13 = vld [vmem:[#allocation11 + $0x84] ss:$16 sps:$4 sm:$0xff]  }
  0x44   :  { %386 = vmatprep.subr.bf16.mxu0 %v3593_v3  ;;  %427 = vmatprep.subr.bf16.mxu1 %v3613_v10  ;;  %5001 = vst [vmem:[#allocation19_spill] sm:$0xff] %v3619_v12  ;;  %5002 = vst [vmem:[#allocation20_spill] sm:$0xff] %v3621_v13  ;;  %v3623_v14 = vld [vmem:[#allocation11 + $0x4c] ss:$16 sps:$4 sm:$0xff]   ;;  %v3627_v15 = vld [vmem:[#allocation11 + $0x48] ss:$16 sps:$4 sm:$0xff]  }
  0x45   :  { %v3630_v16 = vld [vmem:[#allocation11 + $0x6c] ss:$16 sps:$4 sm:$0xff]   ;;  %v3633_v17 = vld [vmem:[#allocation11 + $0x80] ss:$16 sps:$4 sm:$0xff]   ;;  %v3636_v18 = vld [vmem:[#allocation11 + $0xa4] ss:$16 sps:$4 sm:$0xff]  }
  0x46   :  { %5003 = vst [vmem:[#allocation21_spill] sm:$0xff] %v3633_v17  ;;  %5004 = vst [vmem:[#allocation22_spill] sm:$0xff] %v3636_v18  ;;  %v3639_v19 = vld [vmem:[#allocation11 + $0x68] ss:$16 sps:$4 sm:$0xff]   ;;  %v3642_v20 = vld [vmem:[#allocation11 + $0x8c] ss:$16 sps:$4 sm:$0xff]  }
  0x47   :  { %387 = vmatpush1.bf16.msra.mxu0 %v3596_v4  ;;  %428 = vmatpush1.bf16.msra.mxu1 %v3615_v11  ;;  %5005 = vst [vmem:[#allocation23_spill] sm:$0xff] %v3639_v19  ;;  %5006 = vst [vmem:[#allocation24_spill] sm:$0xff] %v3642_v20  ;;  %v3645_v21 = vld [vmem:[#allocation11 + $0xa0] ss:$16 sps:$4 sm:$0xff]   ;;  %v3647_v22 = vld [vmem:[#allocation11 + $0xc4] ss:$16 sps:$4 sm:$0xff]  }
  0x48   :  { %388 = vmatprep.subr.bf16.mxu0 %v3599_v5  ;;  %429 = vmatprep.subr.bf16.mxu1 %v3623_v14  ;;  %5007 = vst [vmem:[#allocation25_spill] sm:$0xff] %v3645_v21  ;;  %5008 = vst [vmem:[#allocation26_spill] sm:$0xff] %v3647_v22  ;;  %v3651_v23 = vld [vmem:[#allocation11 + $0x88] ss:$16 sps:$4 sm:$0xff]   ;;  %v3654_v24 = vld [vmem:[#allocation11 + $0xac] ss:$16 sps:$4 sm:$0xff]  }
  0x49   :  { %5009 = vst [vmem:[#allocation27_spill] sm:$0xff] %v3651_v23  ;;  %5010 = vst [vmem:[#allocation28_spill] sm:$0xff] %v3654_v24  ;;  %v3657_v25 = vld [vmem:[#allocation11 + $0xc0] ss:$16 sps:$4 sm:$0xff]   ;;  %v3660_v26 = vld [vmem:[#allocation11 + $0xe4] ss:$16 sps:$4 sm:$0xff]  }
  0x4a   :  { %5011 = vst [vmem:[#allocation29_spill] sm:$0xff] %v3657_v25  ;;  %5012 = vst [vmem:[#allocation30_spill] sm:$0xff] %v3660_v26  ;;  %v3663_v27 = vld [vmem:[#allocation11 + $0xa8] ss:$16 sps:$4 sm:$0xff]   ;;  %v3666_v28 = vld [vmem:[#allocation11 + $0xcc] ss:$16 sps:$4 sm:$0xff]  }
  0x4b   :  { %389 = vmatpush1.bf16.msra.mxu0 %v3606_v8  ;;  %430 = vmatpush1.bf16.msra.mxu1 %v3627_v15  ;;  %5013 = vst [vmem:[#allocation31_spill] sm:$0xff] %v3663_v27  ;;  %5014 = vst [vmem:[#allocation32_spill] sm:$0xff] %v3666_v28  ;;  %v3669_v29 = vld [vmem:[#allocation11 + $0xe0] ss:$16 sps:$4 sm:$0xff]   ;;  %v3671_v30 = vld [vmem:[#allocation11 + $0x104] ss:$16 sps:$4 sm:$0xff]  }
  0x4c   :  { %390 = vmatprep.subr.bf16.mxu0 %v3610_v9  ;;  %431 = vmatprep.subr.bf16.mxu1 %v3630_v16  ;;  %5015 = vst [vmem:[#allocation33_spill] sm:$0xff] %v3669_v29  ;;  %5016 = vst [vmem:[#allocation34_spill] sm:$0xff] %v3671_v30  ;;  %v3675_v31 = vld [vmem:[#allocation11 + $0xc8] ss:$16 sps:$4 sm:$0xff]   ;;  %v3678_v32 = vld [vmem:[#allocation11 + $0xec] ss:$16 sps:$4 sm:$0xff]  }
  0x4d   :  { %5017 = vst [vmem:[#allocation35_spill] sm:$0xff] %v3675_v31  ;;  %5018 = vst [vmem:[#allocation36_spill] sm:$0xff] %v3678_v32  ;;  %v3681_v33 = vld [vmem:[#allocation11 + $0x100] ss:$16 sps:$4 sm:$0xff]   ;;  %v3684_v34 = vld [vmem:[#allocation11 + $0x124] ss:$16 sps:$4 sm:$0xff]  }
  0x4e   :  { %v3687_v35 = vld [vmem:[#allocation11 + $0xe8] ss:$16 sps:$4 sm:$0xff]   ;;  %v3690_v36 = vld [vmem:[#allocation11 + $0x10c] ss:$16 sps:$4 sm:$0xff]   ;;  %v3694_v38 = vld [vmem:[#allocation11 + $0x120] ss:$16 sps:$4 sm:$0xff]  }
  0x4f   :  { %391 = vmatpush1.bf16.msra.mxu0 %v3619_v12  ;;  %432 = vmatpush1.bf16.msra.mxu1 %v3639_v19  ;;  %5019 = vst [vmem:[#allocation37_spill] sm:$0xff] %v3687_v35  ;;  %5020 = vst [vmem:[#allocation38_spill] sm:$0xff] %v3690_v36  ;;  %v3696_v39 = vld [vmem:[#allocation11 + $0x144] ss:$16 sps:$4 sm:$0xff]   ;;  %v3701_v40 = vld [vmem:[#allocation11 + $0x108] ss:$16 sps:$4 sm:$0xff]  }
  0x50   :  { %392 = vmatprep.subr.bf16.mxu0 %v3621_v13  ;;  %433 = vmatprep.subr.bf16.mxu1 %v3642_v20  ;;  %v3704_v41 = vld [vmem:[#allocation11 + $0x12c] ss:$16 sps:$4 sm:$0xff]   ;;  %v3707_v42 = vld [vmem:[#allocation11 + $0x140] ss:$16 sps:$4 sm:$0xff]   ;;  %v3709_v43 = vld [vmem:[#allocation11 + $0x164] ss:$16 sps:$4 sm:$0xff]  }
  0x51   :  { %v3714_v44 = vld [vmem:[#allocation11 + $0x128] ss:$16 sps:$4 sm:$0xff]   ;;  %v3717_v45 = vld [vmem:[#allocation11 + $0x14c] ss:$16 sps:$4 sm:$0xff]   ;;  %v786_v46 = vld [vmem:[%s4884_s2] sm:$0xff] }
  0x52   :  { %v3724_v47 = vld [vmem:[#allocation11 + $0x160] ss:$16 sps:$4 sm:$0xff]   ;;  %v3726_v48 = vld [vmem:[#allocation11 + $0x184] ss:$16 sps:$4 sm:$0xff]   ;;  %vm787_vm0 = vcmp.gt.f32.partialorder %v786_v46, 0.5  ;;  %v2806_v49 = vld [vmem:[%s4885_s3 + $0x38] sm:$0xff] }
  0x53   :  { %393 = vmatpush1.bf16.msra.mxu0 %v3633_v17  ;;  %434 = vmatpush1.bf16.msra.mxu1 %v3651_v23  ;;  %v3733_v50 = vld [vmem:[#allocation11 + $0x148] ss:$16 sps:$4 sm:$0xff]   ;;  %v791_v51 = vsel %vm787_vm0, 1, %v4910_v0  ;;  %vm790_vm1 = vcmp.gt.f32.partialorder %v2806_v49, 0.5  ;;  %v2821_v52 = vld [vmem:[%s4884_s2 + $0x10] sm:$0xff]  ;;  %v2837_v46 = vld [vmem:[%s4884_s2 + $0x20] sm:$0xff] }
  0x54   :  { %394 = vmatprep.subr.bf16.mxu0 %v3636_v18  ;;  %435 = vmatprep.subr.bf16.mxu1 %v3654_v24  ;;  %v3740_v53 = vld [vmem:[#allocation11 + $0x16c] ss:$16 sps:$4 sm:$0xff]   ;;  %v798_v54 = vsel %vm790_vm1, 1, %v4910_v0  ;;  %v3744_v55 = vld [vmem:[#allocation11 + $0x180] ss:$16 sps:$4 sm:$0xff]   ;;  %vm1322_vm2 = vcmp.gt.f32.partialorder %v2821_v52, 0.5 }
  0x55   :  { %793 = vperm.xlu0 %2885, %v791_v51   ;;  %v3747_v56 = vld [vmem:[#allocation11 + $0x1a4] ss:$16 sps:$4 sm:$0xff]   ;;  %v3750_v57 = vld [vmem:[#allocation11 + $0x168] ss:$16 sps:$4 sm:$0xff]   ;;  %v3756_v59 = vld [vmem:[#allocation11 + $0x18c] ss:$16 sps:$4 sm:$0xff]  }
  0x56   :  { %v2829_v58 = vld [vmem:[%s4884_s2 + $0x18] sm:$0xff]  ;;  %v1326_v60 = vsel %vm1322_vm2, 1, %v4910_v0  ;;  %v3760_v61 = vld [vmem:[#allocation11 + $0x1a0] ss:$16 sps:$4 sm:$0xff]   ;;  %v3763_v62 = vld [vmem:[#allocation11 + $0x1c4] ss:$16 sps:$4 sm:$0xff]  }
  0x57   :  { %395 = vmatpush1.bf16.msra.mxu0 %v3645_v21  ;;  %436 = vmatpush1.bf16.msra.mxu1 %v3663_v27  ;;  %5021 = vst [vmem:[#allocation39_spill] sm:$0xff] %v3760_v61  ;;  %vm1590_vm3 = vcmp.gt.f32.partialorder %v2829_v58, 0.5  ;;  %5022 = vst [vmem:[#allocation40_spill] sm:$0xff] %v3763_v62  ;;  %v3766_v63 = vld [vmem:[#allocation11 + $0x188] ss:$16 sps:$4 sm:$0xff]   ;;  %vm1858_vm4 = vcmp.gt.f32.partialorder %v2837_v46, 0.5 }
  0x58   :  { %396 = vmatprep.subr.bf16.mxu0 %v3647_v22  ;;  %437 = vmatprep.subr.bf16.mxu1 %v3666_v28  ;;  %v3772_v49 = vld [vmem:[#allocation11 + $0x1ac] ss:$16 sps:$4 sm:$0xff]   ;;  %v1594_v51 = vsel %vm1590_vm3, 1, %v4910_v0  ;;  %v3776_v52 = vld [vmem:[#allocation11 + $0x1c0] ss:$16 sps:$4 sm:$0xff]  }
  0x59   :  { %800 = vperm.xlu0 %2885, %v798_v54   ;;  %5023 = vst [vmem:[#allocation41_spill] sm:$0xff] %v3772_v49  ;;  %5024 = vst [vmem:[#allocation42_spill] sm:$0xff] %v3776_v52  ;;  %v3779_v54 = vld [vmem:[#allocation11 + $0x1e4] ss:$16 sps:$4 sm:$0xff]   ;;  %v3782_v58 = vld [vmem:[#allocation11 + $0x1a8] ss:$16 sps:$4 sm:$0xff]  }
  0x5a   :  { %5025 = vst [vmem:[#allocation43_spill] sm:$0xff] %v3779_v54  ;;  %v3792_v46 = vld [vmem:[#allocation11 + $0x1e0] ss:$16 sps:$4 sm:$0xff]  }
  0x5b   :  { %397 = vmatpush1.bf16.msra.mxu0 %v3657_v25  ;;  %438 = vmatpush1.bf16.msra.mxu1 %v3675_v31 }
  0x5c   :  { %398 = vmatprep.subr.bf16.mxu0 %v3660_v26  ;;  %439 = vmatprep.subr.bf16.mxu1 %v3678_v32 }
  0x5d   :  { %1328 = vperm.xlu0 %2885, %v1326_v60   ;;  %v3788_v60 = vld [vmem:[#allocation11 + $0x1cc] ss:$16 sps:$4 sm:$0xff]  }
  0x5e   :  { %5026 = vst [vmem:[#allocation44_spill] sm:$0xff] %v3788_v60 }
  0x5f   :  { %399 = vmatpush1.bf16.msra.mxu0 %v3669_v29  ;;  %440 = vmatpush1.bf16.msra.mxu1 %v3687_v35 }
  0x60   :  { %627 = vmatprep.subr.bf16.mxu0 %v3671_v30  ;;  %668 = vmatprep.subr.bf16.mxu1 %v3690_v36 }
  0x61   :  { %1596 = vperm.xlu0 %2885, %v1594_v51   ;;  %v3802_v51 = vld [vmem:[#allocation11 + $0x1ec] ss:$16 sps:$4 sm:$0xff]  }
  0x62   :  { %417 = vmatmul.mubr.bf16.vlgmr.msra.gmra.mrb[0].mxu0 %v4890_v37  ;;  %458 = vmatmul.mubr.bf16.vlgmr.msra.gmra.mrb[0].mxu1 %v4890_v37  ;;  %v2845_v37 = vld [vmem:[%s4884_s2 + $0x28] sm:$0xff] }
  0x63   :  { %628 = vmatpush1.bf16.msra.mxu0 %v3681_v33  ;;  %659 = vmatprep.mubr.bf16.mxu0 %v4910_v0  ;;  %vm2126_vm5 = vcmp.gt.f32.partialorder %v2845_v37, 0.5  ;;  %v3807_v37 = vld [vmem:[#allocation11 + $0x1e8] ss:$16 sps:$4 sm:$0xff]  }
  0x64   :  { %629 = vmatprep.subr.bf16.mxu0 %v3684_v34  ;;  %669 = vmatpush1.bf16.msra.mxu1 %v3701_v40 }
  0x65   :  { %670 = vmatprep.subr.bf16.mxu1 %v3704_v41  ;;  %700 = vmatprep.mubr.bf16.mxu1 %v4910_v0 }
  0x67   :  { %630 = vmatpush1.bf16.msra.mxu0 %v3694_v38 }
  0x68   :  { %631 = vmatprep.subr.bf16.mxu0 %v3696_v39  ;;  %671 = vmatpush1.bf16.msra.mxu1 %v3714_v44 }
  0x69   :  { %672 = vmatprep.subr.bf16.mxu1 %v3717_v45 }
  0x6b   :  { %632 = vmatpush1.bf16.msra.mxu0 %v3707_v42 }
  0x6c   :  { %633 = vmatprep.subr.bf16.mxu0 %v3709_v43  ;;  %673 = vmatpush1.bf16.msra.mxu1 %v3733_v50 }
  0x6d   :  { %674 = vmatprep.subr.bf16.mxu1 %v3740_v53 }
  0x6f   :  { %634 = vmatpush1.bf16.msra.mxu0 %v3724_v47 }
  0x70   :  { %635 = vmatprep.subr.bf16.mxu0 %v3726_v48  ;;  %675 = vmatpush1.bf16.msra.mxu1 %v3750_v57 }
  0x71   :  { %676 = vmatprep.subr.bf16.mxu1 %v3756_v59 }
  0x73   :  { %636 = vmatpush1.bf16.msra.mxu0 %v3744_v55 }
  0x74   :  { %637 = vmatprep.subr.bf16.mxu0 %v3747_v56  ;;  %677 = vmatpush1.bf16.msra.mxu1 %v3766_v63 }
  0x75   :  { %678 = vmatprep.subr.bf16.mxu1 %v3772_v49  ;;  %v2853_v49 = vld [vmem:[%s4884_s2 + $0x30] sm:$0xff] }
  0x76   :  { %vm2394_vm6 = vcmp.gt.f32.partialorder %v2853_v49, 0.5 }
  0x77   :  { %638 = vmatpush1.bf16.msra.mxu0 %v3760_v61  ;;  %v1862_v61 = vsel %vm1858_vm4, 1, %v4910_v0 }
  0x78   :  { %639 = vmatprep.subr.bf16.mxu0 %v3763_v62  ;;  %679 = vmatpush1.bf16.msra.mxu1 %v3782_v58  ;;  %v3796_v62 = vld [vmem:[#allocation11 + $0x1c8] ss:$16 sps:$4 sm:$0xff]  }
  0x79   :  { %680 = vmatprep.subr.bf16.mxu1 %v3788_v60  ;;  %1864 = vperm.xlu0 %2885, %v1862_v61   ;;  %v5027_v60 = vmov 0.0|0.0   ;;  %v2398_v61 = vsel %vm2394_vm6, 1, %v4910_v0 }
  0x7b   :  { %640 = vmatpush1.bf16.msra.mxu0 %v3776_v52  ;;  %v2130_v52 = vsel %vm2126_vm5, 1, %v4910_v0 }
  0x7c   :  { %641 = vmatprep.subr.bf16.mxu0 %v3779_v54  ;;  %681 = vmatpush1.bf16.msra.mxu1 %v3796_v62  ;;  %v2861_v54 = vld [vmem:[%s4884_s2 + $0x38] sm:$0xff] }
  0x7d   :  { %682 = vmatprep.subr.bf16.mxu1 %v3802_v51  ;;  %2132 = vperm.xlu0 %2885, %v2130_v52   ;;  %vm2661_vm7 = vcmp.gt.f32.partialorder %v2861_v54, 0.5  ;;  %v2813_v52 = vld [vmem:[%s4884_s2 + $0x8] sm:$0xff]  ;;  %v2814_v54 = vld [vmem:[%s4885_s3 + $0x30] sm:$0xff] }
  0x7e   :  { %v2664_v49 = vsel %vm2661_vm7, 1, %v4910_v0  ;;  %vm1054_vm8 = vcmp.gt.f32.partialorder %v2813_v52, 0.5  ;;  %vm1057_vm9 = vcmp.gt.f32.partialorder %v2814_v54, 0.5  ;;  %v2838_v52 = vld [vmem:[%s4885_s3 + $0x18] sm:$0xff] }
  0x7f   :  { %642 = vmatpush1.bf16.msra.mxu0 %v3792_v46  ;;  %vm1861_vm12 = vcmp.gt.f32.partialorder %v2838_v52, 0.5 }
  0x80   :  { %809 = vmatprep.subr.bf16.mxu0 %v3588_v1  ;;  %683 = vmatpush1.bf16.msra.mxu1 %v3807_v37 }
  0x81   :  { %2400 = vperm.xlu0 %2885, %v2398_v61   ;;  %850 = vmatprep.subr.bf16.mxu1 %v3601_v6  ;;  %v2822_v61 = vld [vmem:[%s4885_s3 + $0x28] sm:$0xff] }
  0x82   :  { %660 = vmatmul.mubr.bf16.vlgmr.msra.gmra.mrb[4].mxu0 %v5027_v60  ;;  %vm1325_vm10 = vcmp.gt.f32.partialorder %v2822_v61, 0.5  ;;  %v1869_v61 = vsel %vm1861_vm12, 1, %v4910_v0 }
  0x83   :  { %810 = vmatpush1.bf16.msra.mxu0 %v3590_v2  ;;  %841 = vmatprep.mubr.bf16.mxu0 %v4910_v0 }
  0x84   :  { %811 = vmatprep.subr.bf16.mxu0 %v3593_v3  ;;  %701 = vmatmul.mubr.bf16.vlgmr.msra.gmra.mrb[4].mxu1 %v5027_v60  ;;  %v1058_v60 = vsel %vm1054_vm8, 1, %v4910_v0 }
  0x85   :  { %851 = vmatpush1.bf16.msra.mxu1 %v3603_v7  ;;  %2666 = vperm.xlu0 %2885, %v2664_v49   ;;  %v1065_v49 = vsel %vm1057_vm9, 1, %v4910_v0 }
  0x86   :  { %852 = vmatprep.subr.bf16.mxu1 %v3613_v10  ;;  %882 = vmatprep.mubr.bf16.mxu1 %v4910_v0 }
  0x87   :  { %812 = vmatpush1.bf16.msra.mxu0 %v3596_v4  ;;  %1060 = vperm.xlu1 %2886, %v1058_v60   ;;  %v2846_v60 = vld [vmem:[%s4885_s3 + $0x10] sm:$0xff] }
  0x88   :  { %813 = vmatprep.subr.bf16.mxu0 %v3599_v5  ;;  %vm2129_vm13 = vcmp.gt.f32.partialorder %v2846_v60, 0.5 }
  0x89   :  { %853 = vmatpush1.bf16.msra.mxu1 %v3615_v11 }
  0x8a   :  { %854 = vmatprep.subr.bf16.mxu1 %v3623_v14 }
  0x8b   :  { %814 = vmatpush1.bf16.msra.mxu0 %v3606_v8  ;;  %1067 = vperm.xlu1 %2886, %v1065_v49   ;;  %v2137_v49 = vsel %vm2129_vm13, 1, %v4910_v0 }
  0x8c   :  { %815 = vmatprep.subr.bf16.mxu0 %v3610_v9 }
  0x8d   :  { %855 = vmatpush1.bf16.msra.mxu1 %v3627_v15 }
  0x8e   :  { %856 = vmatprep.subr.bf16.mxu1 %v3630_v16 }
  0x8f   :  { %816 = vmatpush1.bf16.msra.mxu0 %v3619_v12 }
  0x90   :  { %817 = vmatprep.subr.bf16.mxu0 %v3621_v13 }
  0x91   :  { %857 = vmatpush1.bf16.msra.mxu1 %v3639_v19 }
  0x92   :  { %858 = vmatprep.subr.bf16.mxu1 %v3642_v20 }
  0x93   :  { %818 = vmatpush1.bf16.msra.mxu0 %v3633_v17 }
  0x94   :  { %819 = vmatprep.subr.bf16.mxu0 %v3636_v18 }
  0x95   :  { %859 = vmatpush1.bf16.msra.mxu1 %v3651_v23 }
  0x96   :  { %860 = vmatprep.subr.bf16.mxu1 %v3654_v24 }
  0x97   :  { %820 = vmatpush1.bf16.msra.mxu0 %v3645_v21 }
  0x98   :  { %821 = vmatprep.subr.bf16.mxu0 %v3647_v22 }
  0x99   :  { %861 = vmatpush1.bf16.msra.mxu1 %v3663_v27 }
  0x9a   :  { %862 = vmatprep.subr.bf16.mxu1 %v3666_v28 }
  0x9b   :  { %822 = vmatpush1.bf16.msra.mxu0 %v3657_v25 }
  0x9c   :  { %823 = vmatprep.subr.bf16.mxu0 %v3660_v26 }
  0x9d   :  { %863 = vmatpush1.bf16.msra.mxu1 %v3675_v31 }
  0x9e   :  { %864 = vmatprep.subr.bf16.mxu1 %v3678_v32 }
  0x9f   :  { %824 = vmatpush1.bf16.msra.mxu0 %v3669_v29  ;;  %v709_v29 = vld [vmem:[#allocation6] sm:$0xff] }
  0xa0   :  { %892 = vmatprep.subr.bf16.mxu0 %v3671_v30  ;;  %v1333_v30 = vsel %vm1325_vm10, 1, %v4910_v0  ;;  %v711_v26 = vunpack.c.l.bf16 %v709_v29 }
  0xa1   :  { %865 = vmatpush1.bf16.msra.mxu1 %v3687_v35  ;;  %1335 = vperm.xlu1 %2886, %v1333_v30   ;;  %v2662_v30 = vld [vmem:[%s4885_s3] sm:$0xff] }
  0xa2   :  { %933 = vmatprep.subr.bf16.mxu1 %v3690_v36  ;;  %v2830_v36 = vld [vmem:[%s4885_s3 + $0x20] sm:$0xff]  ;;  %vm2663_vm15 = vcmp.gt.f32.partialorder %v2662_v30, 0.5 }
  0xa3   :  { %vm1593_vm11 = vcmp.gt.f32.partialorder %v2830_v36, 0.5  ;;  %v2854_v36 = vld [vmem:[%s4885_s3 + $0x8] sm:$0xff]  ;;  %v2671_v60 = vsel %vm2663_vm15, 1, %v4910_v0 }
  0xa4   :  { %v1601_v54 = vsel %vm1593_vm11, 1, %v4910_v0  ;;  %vm2397_vm14 = vcmp.gt.f32.partialorder %v2854_v36, 0.5  ;;  %v174_v36 = vld [vmem:[%s4887_s5] ss:$2 sm:$0xf] }
  0xa5   :  { %1603 = vperm.xlu1 %2886, %v1601_v54   ;;  %v2405_v52 = vsel %vm2397_vm14, 1, %v4910_v0  ;;  %v176_v54 = vlaneseq }
  0xa7   :  { %v3886_v35 = vshrl.u32 %v176_v54, 7 }
  0xa9   :  { %1871 = vperm.xlu1 %2886, %v1869_v61   ;;  %v178_v61 = vsub.s32 0, %v3886_v35  ;;  %v182_v32 = vsub.s32 1, %v3886_v35  ;;  %v190_v0 = vsub.s32 3, %v3886_v35  ;;  %v186_v27 = vsub.s32 2, %v3886_v35 }
  0xab   :  { %v3895_v30 = vrot.slane %v174_v36, %v182_v32  ;;  %v3900_v25 = vrot.slane %v174_v36, %v190_v0  ;;  %v3904_v19 = vrot.slane %v174_v36, %v186_v27 }
  0xad   :  { %2139 = vperm.xlu1 %2886, %v2137_v49   ;;  %v3893_v49 = vrot.slane %v174_v36, %v178_v61  ;;  %5029 = vst [vmem:[#allocation46_spill] sm:$0xff] %v3895_v30  ;;  %5030 = vst [vmem:[#allocation47_spill] sm:$0xff] %v3904_v19 }
  0xaf   :  { %5028 = vst [vmem:[#allocation45_spill] sm:$0xff] %v3893_v49  ;;  %v715_v54 = vadd.f32 %v711_v26, %v3893_v49 }
  0xb1   :  { %2407 = vperm.xlu1 %2886, %v2405_v52   ;;  %v712_v52 = vunpack.c.h.bf16 %v709_v29 }
  0xb3   :  { %v716_v31 = vadd.f32 %v712_v52, %v3895_v30 }
  0xb5   :  { %2673 = vperm.xlu1 %2886, %v2671_v60   ;;  %v710_v60 = vld [vmem:[#allocation6 + $0x8] sm:$0xff] }
  0xb6   :  { %v714_v28 = vunpack.c.h.bf16 %v710_v60  ;;  %v713_v26 = vunpack.c.l.bf16 %v710_v60 }
  0xb8   :  { %v718_v29 = vadd.f32 %v714_v28, %v3900_v25  ;;  %v717_v35 = vadd.f32 %v713_v26, %v3904_v19  ;;  %v725_v26 = vld [vmem:[#allocation9 + $0x78] sm:$0xff] }
 0x135   :  { %v418_v22 = vpop.f32.mrb[0].mxu0  ;;  %v459_v52 = vpop.f32.mrb[0].mxu1 }
 0x136   :  { %v719_v21 = vadd.f32 %v715_v54, %v418_v22  ;;  %v420_v24 = vpop.f32.mrb[1].mxu0  ;;  %v461_v30 = vpop.f32.mrb[1].mxu1 }
 0x137   :  { %v720_v18 = vadd.f32 %v716_v31, %v420_v24  ;;  %v422_v23 = vpop.f32.mrb[2].mxu0  ;;  %v722_v49 = vadd.f32 %v718_v29, %v461_v30  ;;  %v463_v12 = vpop.f32.mrb[2].mxu1  ;;  %v721_v24 = vadd.f32 %v717_v35, %v459_v52 }
 0x138   :  { %v2800_v17 = vmul.f32 -1.442695, %v719_v21  ;;  %v423_v20 = vpop.f32.mrb[3].mxu0  ;;  %v464_v22 = vpop.f32.mrb[3].mxu1 }
 0x139   :  { %v2801_v13 = vmul.f32 -1.442695, %v720_v18  ;;  %v2802_v54 = vmul.f32 -1.442695, %v722_v49 }
 0x13a   :  { %2983 = vpow2.f32 %v2800_v17  ;;  %v724_v17 = vld [vmem:[#allocation9 + $0x70] sm:$0xff] }
 0x13b   :  { %2985 = vpow2.f32 %v2801_v13  ;;  %v2735_v13 = vld [vmem:[%s4887_s5 + $0x1] ss:$2 sm:$0xf]  ;;  %v726_v31 = vunpack.c.l.bf16 %v724_v17  ;;  %v727_v30 = vunpack.c.h.bf16 %v724_v17  ;;  %s3495_s5 = smov [#allocation12]  }
 0x13c   :  { %2987 = vpow2.f32 %v2802_v54  ;;  %v3910_v12 = vrot.slane %v2735_v13, %v178_v61  ;;  %v3912_v49 = vrot.slane %v2735_v13, %v182_v32  ;;  %s2690_s22 = sshll.u32 %s3495_s5, 4  ;;  %s2691_s22 = int_to_ptr.vmem [resolvable:$true] %s2690_s22 }
 0x13d   :  { %2989 = vtanh.f32 %v721_v24  ;;  %s3436_s23 = scalar_lea.vmem %s2691_s22, 1024  ;;  %p3441_p3 = scmp.lt.s32.totalorder %s2691_s22, %s2691_s22 }
 0x13e   :  { %5031 = vst [vmem:[#allocation48_spill] sm:$0xff] %v3912_v49  ;;  %v730_v22 = vadd.f32 %v726_v31, %v3910_v12  ;;  %v731_v24 = vadd.f32 %v727_v30, %v3912_v49  ;;  %p3437_p2 = scmp.ne.s32.totalorder %s2691_s22, %s3436_s23  ;;  %p3442_p4 = scmp.lt.s32.totalorder %s3436_s23, %s3436_s23 }
 0x140   :  { %p3443_p5 = por %p3442_p4, %p3441_p3 }
 0x142   :  { %p3444_p6 = pnand %p3443_p5, %p3437_p2 }
 0x144   :  { %v2984_v23 = vpop.eup %2983 }
 0x145   :  { %v2986_v20 = vpop.eup %2985  ;;  %v741_v21 = vadd.f32 1.0, %v2984_v23  ;;  %v3916_v23 = vrot.slane %v2735_v13, %v190_v0  ;;  %v728_v0 = vunpack.c.l.bf16 %v725_v26 }
 0x146   :  { %v747_v18 = vadd.f32 1.0, %v2986_v20  ;;  %v2988_v28 = vpop.eup %2987  ;;  %v729_v20 = vunpack.c.h.bf16 %v725_v26 }
 0x147   :  { %2991 = vrcp.f32 %v741_v21  ;;  %v2990_v36 = vpop.eup %2989  ;;  %v754_v29 = vadd.f32 1.0, %v2988_v28 }
 0x148   :  { %2993 = vrcp.f32 %v747_v18  ;;  %v733_v31 = vadd.f32 %v729_v20, %v3916_v23 }
 0x149   :  { %2995 = vrcp.f32 %v754_v29 }
 0x151   :  { %v2992_v60 = vpop.eup %2991 }
 0x152   :  { %v2994_v52 = vpop.eup %2993  ;;  %v758_v35 = vmul.f32 %v2992_v60, %v2990_v36 }
 0x153   :  { %v757_v54 = vmul.f32 0.0, %v2994_v52  ;;  %v3922_v52 = vrot.slane %v2735_v13, %v186_v27  ;;  %v2996_v49 = vpop.eup %2995 }
 0x155   :  { %v3918_v61 = vadd.f32 %v758_v35, %v757_v54  ;;  %v661_v21 = vpop.f32.mrb[4].mxu0 }
 0x156   :  { %v734_v32 = vadd.f32 %v730_v22, %v661_v21  ;;  %v663_v18 = vpop.f32.mrb[5].mxu0  ;;  %v732_v22 = vadd.f32 %v728_v0, %v3922_v52 }
 0x157   :  { %2997 = vtanh.f32 %v3918_v61  ;;  %v735_v17 = vadd.f32 %v731_v24, %v663_v18  ;;  %v665_v28 = vpop.f32.mrb[6].mxu0  ;;  %v702_v30 = vpop.f32.mrb[4].mxu1 }
 0x158   :  { %v2803_v19 = vmul.f32 -1.442695, %v734_v32  ;;  %v666_v36 = vpop.f32.mrb[7].mxu0  ;;  %v704_v29 = vpop.f32.mrb[5].mxu1  ;;  %v736_v28 = vadd.f32 %v732_v22, %v702_v30 }
 0x159   :  { %v2804_v60 = vmul.f32 -1.442695, %v735_v17  ;;  %v737_v35 = vadd.f32 %v733_v31, %v704_v29  ;;  %v706_v54 = vpop.f32.mrb[6].mxu1  ;;  %v3925_v32 = vpop.permute.xlu0 %793 }
 0x15a   :  { %2999 = vpow2.f32 %v2803_v19  ;;  %v707_v21 = vpop.f32.mrb[7].mxu1  ;;  %vm795_vm0 = vcmp.eq.s32.totalorder %v3925_v32, 1 }
 0x15b   :  { %3001 = vpow2.f32 %v2804_v60  ;;  %v2805_v24 = vmul.f32 -1.442695, %v737_v35  ;;  %vm2862_vm1 = vmpackc.low %vm795_vm0, %vm795_vm0  ;;  %v5033_v21 = vld [vmem:[#allocation41_spill] sm:$0xff] }
 0x15d   :  { %3003 = vpow2.f32 %v2805_v24  ;;  %v5034_v24 = vld [vmem:[#allocation39_spill] sm:$0xff] }
 0x15e   :  { %3005 = vtanh.f32 %v736_v28  ;;  %v5036_v28 = vld [vmem:[#allocation44_spill] sm:$0xff] }
 0x161   :  { %v2998_v18 = vpop.eup %2997 }
 0x162   :  { %v761_v20 = vmul.f32 %v2998_v18, %v2996_v49  ;;  %v5032_v49 = vmov 0   ;;  %v5035_v18 = vld [vmem:[#allocation40_spill] sm:$0xff] }
 0x164   :  { %v3000_v19 = vpop.eup %2999  ;;  %v3933_v27 = vsel %vm795_vm0, %v761_v20, 0.0  ;;  %v2863_v13 = vpack.c.bf16 %v761_v20, %v761_v20 }
 0x165   :  { %v3002_v26 = vpop.eup %3001  ;;  %805 = vst [vmem:[#allocation12] sm:$0xff] %v3933_v27  ;;  %v765_v17 = vadd.f32 1.0, %v3000_v19  ;;  %v5037_v19 = vld [vmem:[#allocation42_spill] sm:$0xff] }
 0x166   :  { %v771_v36 = vadd.f32 1.0, %v3002_v26  ;;  %2864 = vmatmul.mubr.msk.bf16.vlgmr.msra.gmra.mrb[8].mxu0 %vm2862_vm1, %v2863_v13  ;;  %2867 = vmatmul.mubr.msk.bf16.vlgmr.msra.gmra.mrb[8].mxu1 %vm2862_vm1, %v2863_v13  ;;  %v5038_v13 = vld [vmem:[#allocation43_spill] sm:$0xff] }
 0x167   :  { %3007 = vrcp.f32 %v765_v17  ;;  %893 = vmatpush1.bf16.msra.mxu0 %v3681_v33  ;;  %934 = vmatpush1.bf16.msra.mxu1 %v3701_v40  ;;  %v3004_v31 = vpop.eup %3003  ;;  %v3969_v17 = vpop.permute.xlu0 %800 }
 0x168   :  { %3009 = vrcp.f32 %v771_v36  ;;  %894 = vmatprep.subr.bf16.mxu0 %v3684_v34  ;;  %935 = vmatprep.subr.bf16.mxu1 %v3704_v41  ;;  %v3006_v60 = vpop.eup %3005  ;;  %v778_v30 = vadd.f32 1.0, %v3004_v31  ;;  %vm802_vm2 = vcmp.eq.s32.totalorder %v3969_v17, 1  ;;  %v4131_v17 = vld [vmem:[#allocation11 + $0x68] ss:$16 sps:$4 sm:$0xff]  }
 0x169   :  { %924 = vmatprep.mubr.bf16.mxu0 %v5032_v49  ;;  %965 = vmatprep.mubr.bf16.mxu1 %v5032_v49  ;;  %vm2868_vm3 = vmpackc.low %vm802_vm2, %vm802_vm2  ;;  %5066 = vst [vmem:[#allocation40_spill] sm:$0xff] %v4131_v17 }
 0x16a   :  { %3011 = vrcp.f32 %v778_v30  ;;  %v5055_v30 = vld [vmem:[#allocation36_spill] sm:$0xff] }
 0x16b   :  { %895 = vmatpush1.bf16.msra.mxu0 %v3694_v38  ;;  %936 = vmatpush1.bf16.msra.mxu1 %v3714_v44 }
 0x16c   :  { %896 = vmatprep.subr.bf16.mxu0 %v3696_v39  ;;  %937 = vmatprep.subr.bf16.mxu1 %v3717_v45 }
 0x16f   :  { %897 = vmatpush1.bf16.msra.mxu0 %v3707_v42  ;;  %938 = vmatpush1.bf16.msra.mxu1 %v3733_v50 }
 0x170   :  { %898 = vmatprep.subr.bf16.mxu0 %v3709_v43  ;;  %939 = vmatprep.subr.bf16.mxu1 %v3740_v53 }
 0x171   :  { %v3008_v0 = vpop.eup %3007 }
 0x172   :  { %v3010_v29 = vpop.eup %3009  ;;  %v782_v35 = vmul.f32 %v3008_v0, %v3006_v60  ;;  %v5054_v0 = vld [vmem:[#allocation30_spill] sm:$0xff] }
 0x173   :  { %v781_v54 = vmul.f32 0.0, %v3010_v29  ;;  %899 = vmatpush1.bf16.msra.mxu0 %v3724_v47  ;;  %940 = vmatpush1.bf16.msra.mxu1 %v3750_v57  ;;  %v5056_v29 = vld [vmem:[#allocation33_spill] sm:$0xff] }
 0x174   :  { %900 = vmatprep.subr.bf16.mxu0 %v3726_v48  ;;  %941 = vmatprep.subr.bf16.mxu1 %v3756_v59  ;;  %v3012_v20 = vpop.eup %3011 }
 0x175   :  { %v3954_v22 = vadd.f32 %v782_v35, %v781_v54  ;;  %v5057_v35 = vld [vmem:[#allocation37_spill] sm:$0xff]  ;;  %v5058_v54 = vld [vmem:[#allocation34_spill] sm:$0xff] }
 0x177   :  { %3013 = vtanh.f32 %v3954_v22  ;;  %901 = vmatpush1.bf16.msra.mxu0 %v3744_v55  ;;  %942 = vmatpush1.bf16.msra.mxu1 %v3766_v63 }
 0x178   :  { %902 = vmatprep.subr.bf16.mxu0 %v3747_v56  ;;  %943 = vmatprep.subr.bf16.mxu1 %v5033_v21 }
 0x17b   :  { %903 = vmatpush1.bf16.msra.mxu0 %v5034_v24  ;;  %944 = vmatpush1.bf16.msra.mxu1 %v3782_v58 }
 0x17c   :  { %904 = vmatprep.subr.bf16.mxu0 %v5035_v18  ;;  %945 = vmatprep.subr.bf16.mxu1 %v5036_v28 }
 0x17f   :  { %905 = vmatpush1.bf16.msra.mxu0 %v5037_v19  ;;  %946 = vmatpush1.bf16.msra.mxu1 %v3796_v62 }
 0x180   :  { %906 = vmatprep.subr.bf16.mxu0 %v5038_v13  ;;  %947 = vmatprep.subr.bf16.mxu1 %v3802_v51 }
 0x181   :  { %v3014_v26 = vpop.eup %3013 }
 0x182   :  { %v785_v36 = vmul.f32 %v3014_v26, %v3012_v20  ;;  %v5059_v20 = vld [vmem:[#allocation38_spill] sm:$0xff]  ;;  %v975_v26 = vld [vmem:[#allocation6 + $0x10] sm:$0xff] }
 0x183   :  { %907 = vmatpush1.bf16.msra.mxu0 %v3792_v46  ;;  %948 = vmatpush1.bf16.msra.mxu1 %v3807_v37 }
 0x184   :  { %v2869_v31 = vpack.c.bf16 %v785_v36, %v785_v36  ;;  %1077 = vmatprep.subr.bf16.mxu0 %v3588_v1  ;;  %1118 = vmatprep.subr.bf16.mxu1 %v3601_v6  ;;  %v3978_v60 = vsel %vm802_vm2, %v785_v36, 0.0  ;;  %v5040_v1 = vld [vmem:[#allocation19_spill] sm:$0xff]  ;;  %v5044_v6 = vld [vmem:[#allocation21_spill] sm:$0xff]  ;;  %v977_v36 = vunpack.c.l.bf16 %v975_v26 }
 0x185   :  { %5039 = vst [vmem:[#allocation41_spill] sm:$0xff] %v3978_v60  ;;  %807 = vst [vmem:[#allocation13 + $0x38] sm:$0xff] %v3978_v60 }
 0x186   :  { %2870 = vmatmul.mubr.msk.bf16.vlgmr.msra.gmra.mrb[12].mxu0 %vm2868_vm3, %v2869_v31  ;;  %2873 = vmatmul.mubr.msk.bf16.vlgmr.msra.gmra.mrb[12].mxu1 %vm2868_vm3, %v2869_v31  ;;  %v978_v31 = vunpack.c.h.bf16 %v975_v26 }
 0x187   :  { %1078 = vmatpush1.bf16.msra.mxu0 %v3590_v2  ;;  %1119 = vmatpush1.bf16.msra.mxu1 %v3603_v7  ;;  %v5041_v2 = vld [vmem:[#allocation23_spill] sm:$0xff]  ;;  %v5046_v7 = vld [vmem:[#allocation22_spill] sm:$0xff] }
 0x188   :  { %1079 = vmatprep.subr.bf16.mxu0 %v3593_v3  ;;  %1120 = vmatprep.subr.bf16.mxu1 %v3613_v10  ;;  %v5042_v3 = vld [vmem:[#allocation20_spill] sm:$0xff]  ;;  %v5048_v10 = vld [vmem:[#allocation25_spill] sm:$0xff] }
 0x189   :  { %1109 = vmatprep.mubr.bf16.mxu0 %v5032_v49  ;;  %1150 = vmatprep.mubr.bf16.mxu1 %v5032_v49 }
 0x18b   :  { %1080 = vmatpush1.bf16.msra.mxu0 %v3596_v4  ;;  %1121 = vmatpush1.bf16.msra.mxu1 %v3615_v11  ;;  %v5043_v4 = vld [vmem:[#allocation24_spill] sm:$0xff]  ;;  %v5050_v11 = vld [vmem:[#allocation26_spill] sm:$0xff] }
 0x18c   :  { %1081 = vmatprep.subr.bf16.mxu0 %v3599_v5  ;;  %1122 = vmatprep.subr.bf16.mxu1 %v3623_v14  ;;  %v5045_v5 = vld [vmem:[#allocation27_spill] sm:$0xff]  ;;  %v5051_v14 = vld [vmem:[#allocation32_spill] sm:$0xff] }
 0x18f   :  { %1082 = vmatpush1.bf16.msra.mxu0 %v3606_v8  ;;  %1123 = vmatpush1.bf16.msra.mxu1 %v3627_v15  ;;  %v5047_v8 = vld [vmem:[#allocation28_spill] sm:$0xff]  ;;  %v5052_v15 = vld [vmem:[#allocation29_spill] sm:$0xff] }
 0x190   :  { %1083 = vmatprep.subr.bf16.mxu0 %v3610_v9  ;;  %1124 = vmatprep.subr.bf16.mxu1 %v3630_v16  ;;  %v5049_v9 = vld [vmem:[#allocation31_spill] sm:$0xff] }
 0x191   :  { %v5053_v16 = vld [vmem:[#allocation35_spill] sm:$0xff] }
 0x193   :  { %1084 = vmatpush1.bf16.msra.mxu0 %v5040_v1  ;;  %1125 = vmatpush1.bf16.msra.mxu1 %v5041_v2  ;;  %v5060_v1 = vld [vmem:[#allocation45_spill] sm:$0xff] }
 0x194   :  { %1085 = vmatprep.subr.bf16.mxu0 %v5042_v3  ;;  %1126 = vmatprep.subr.bf16.mxu1 %v5043_v4  ;;  %v981_v2 = vadd.f32 %v977_v36, %v5060_v1  ;;  %v976_v3 = vld [vmem:[#allocation6 + $0x18] sm:$0xff]  ;;  %v5062_v36 = vld [vmem:[#allocation47_spill] sm:$0xff] }
 0x195   :  { %v5061_v4 = vld [vmem:[#allocation46_spill] sm:$0xff] }
 0x197   :  { %1086 = vmatpush1.bf16.msra.mxu0 %v5044_v6  ;;  %1127 = vmatpush1.bf16.msra.mxu1 %v5045_v5  ;;  %v982_v6 = vadd.f32 %v978_v31, %v5061_v4 }
 0x198   :  { %1087 = vmatprep.subr.bf16.mxu0 %v5046_v7  ;;  %1128 = vmatprep.subr.bf16.mxu1 %v5047_v8  ;;  %v980_v8 = vunpack.c.h.bf16 %v976_v3 }
 0x19b   :  { %1088 = vmatpush1.bf16.msra.mxu0 %v5048_v10  ;;  %1129 = vmatpush1.bf16.msra.mxu1 %v5049_v9 }
 0x19c   :  { %1089 = vmatprep.subr.bf16.mxu0 %v5050_v11  ;;  %1130 = vmatprep.subr.bf16.mxu1 %v5051_v14 }
 0x19f   :  { %1090 = vmatpush1.bf16.msra.mxu0 %v5052_v15  ;;  %1131 = vmatpush1.bf16.msra.mxu1 %v5053_v16 }
 0x1a0   :  { %1091 = vmatprep.subr.bf16.mxu0 %v5054_v0  ;;  %1132 = vmatprep.subr.bf16.mxu1 %v5055_v30 }
 0x1a3   :  { %1092 = vmatpush1.bf16.msra.mxu0 %v5056_v29  ;;  %1133 = vmatpush1.bf16.msra.mxu1 %v5057_v35 }
 0x1a4   :  { %1160 = vmatprep.subr.bf16.mxu0 %v5058_v54  ;;  %1201 = vmatprep.subr.bf16.mxu1 %v5059_v20  ;;  %v984_v54 = vadd.f32 %v980_v8, %v3900_v25  ;;  %v979_v20 = vunpack.c.l.bf16 %v976_v3 }
 0x1a6   :  { %v983_v31 = vadd.f32 %v979_v20, %v5062_v36 }
 0x239   :  { %v843_v5 = vpop.f32.mrb[8].mxu0  ;;  %v884_v7 = vpop.f32.mrb[8].mxu1 }
 0x23a   :  { %v985_v10 = vadd.f32 %v981_v2, %v843_v5  ;;  %v845_v9 = vpop.f32.mrb[9].mxu0  ;;  %v886_v11 = vpop.f32.mrb[9].mxu1  ;;  %v987_v1 = vadd.f32 %v983_v31, %v884_v7 }
 0x23b   :  { %v986_v14 = vadd.f32 %v982_v6, %v845_v9  ;;  %v847_v15 = vpop.f32.mrb[10].mxu0  ;;  %v888_v16 = vpop.f32.mrb[10].mxu1  ;;  %v988_v26 = vadd.f32 %v984_v54, %v886_v11  ;;  %v797_v11 = vsel %vm795_vm0, %v3918_v61, 0.0 }
 0x23c   :  { %v2807_v0 = vmul.f32 -1.442695, %v985_v10  ;;  %v848_v30 = vpop.f32.mrb[11].mxu0  ;;  %v889_v29 = vpop.f32.mrb[11].mxu1  ;;  %v990_v10 = vld [vmem:[#allocation9 + $0x60] sm:$0xff] }
 0x23d   :  { %v2808_v35 = vmul.f32 -1.442695, %v986_v14  ;;  %v2809_v4 = vmul.f32 -1.442695, %v988_v26  ;;  %v992_v9 = vunpack.c.l.bf16 %v990_v10  ;;  %v993_v8 = vunpack.c.h.bf16 %v990_v10 }
 0x23e   :  { %3015 = vpow2.f32 %v2807_v0 }
 0x23f   :  { %3017 = vpow2.f32 %v2808_v35  ;;  %v996_v30 = vadd.f32 %v992_v9, %v3910_v12 }
 0x240   :  { %3019 = vpow2.f32 %v2809_v4  ;;  %v991_v4 = vld [vmem:[#allocation9 + $0x68] sm:$0xff] }
 0x241   :  { %3021 = vtanh.f32 %v987_v1  ;;  %v1061_v1 = vpop.permute.xlu1 %1060  ;;  %v995_v31 = vunpack.c.h.bf16 %v991_v4 }
 0x242   :  { %vm1062_vm4 = vcmp.eq.s32.totalorder %v1061_v1, 1  ;;  %v4134_v1 = vld [vmem:[#allocation11 + $0x84] ss:$16 sps:$4 sm:$0xff]  }
 0x243   :  { %5067 = vst [vmem:[#allocation44_spill] sm:$0xff] %v4134_v1 }
 0x248   :  { %v3016_v2 = vpop.eup %3015 }
 0x249   :  { %v3018_v5 = vpop.eup %3017  ;;  %v1007_v60 = vadd.f32 1.0, %v3016_v2 }
 0x24a   :  { %v1013_v6 = vadd.f32 1.0, %v3018_v5  ;;  %v3020_v14 = vpop.eup %3019 }
 0x24b   :  { %3023 = vrcp.f32 %v1007_v60  ;;  %v3022_v15 = vpop.eup %3021  ;;  %v1020_v7 = vadd.f32 1.0, %v3020_v14  ;;  %v5063_v60 = vld [vmem:[#allocation48_spill] sm:$0xff] }
 0x24c   :  { %3025 = vrcp.f32 %v1013_v6  ;;  %v997_v35 = vadd.f32 %v993_v8, %v5063_v60 }
 0x24d   :  { %3027 = vrcp.f32 %v1020_v7 }
 0x255   :  { %v3024_v3 = vpop.eup %3023 }
 0x256   :  { %v3026_v16 = vpop.eup %3025  ;;  %v1024_v0 = vmul.f32 %v3024_v3, %v3022_v15 }
 0x257   :  { %v1023_v29 = vmul.f32 %v3026_v16, %v797_v11  ;;  %v999_v16 = vadd.f32 %v995_v31, %v3916_v23 }
 0x259   :  { %v1025_v54 = vadd.f32 %v1024_v0, %v1023_v29  ;;  %v926_v20 = vpop.f32.mrb[12].mxu0  ;;  %v967_v26 = vpop.f32.mrb[12].mxu1  ;;  %v994_v0 = vunpack.c.l.bf16 %v991_v4 }
 0x25a   :  { %v1000_v2 = vadd.f32 %v996_v30, %v926_v20  ;;  %v928_v5 = vpop.f32.mrb[13].mxu0  ;;  %v969_v6 = vpop.f32.mrb[13].mxu1 }
 0x25b   :  { %3029 = vtanh.f32 %v1025_v54  ;;  %v4028_v61 = vsel %vm1062_vm4, %v1025_v54, %v797_v11  ;;  %v1001_v32 = vadd.f32 %v997_v35, %v928_v5  ;;  %v930_v10 = vpop.f32.mrb[14].mxu0  ;;  %v971_v9 = vpop.f32.mrb[14].mxu1  ;;  %v1003_v7 = vadd.f32 %v999_v16, %v969_v6  ;;  %v4164_v16 = vld [vmem:[#allocation11 + $0xc0] ss:$16 sps:$4 sm:$0xff]  }
 0x25c   :  { %v2810_v14 = vmul.f32 -1.442695, %v1000_v2  ;;  %v931_v15 = vpop.f32.mrb[15].mxu0  ;;  %v972_v3 = vpop.f32.mrb[15].mxu1  ;;  %v998_v30 = vadd.f32 %v994_v0, %v3922_v52  ;;  %v4146_v10 = vld [vmem:[#allocation11 + $0xa4] ss:$16 sps:$4 sm:$0xff]  }
 0x25d   :  { %v2811_v8 = vmul.f32 -1.442695, %v1001_v32  ;;  %v3028_v29 = vpop.eup %3027  ;;  %v2812_v60 = vmul.f32 -1.442695, %v1003_v7  ;;  %v4143_v32 = vld [vmem:[#allocation11 + $0x88] ss:$16 sps:$4 sm:$0xff]  }
 0x25e   :  { %3031 = vpow2.f32 %v2810_v14  ;;  %v1002_v54 = vadd.f32 %v998_v30, %v967_v26  ;;  %v4140_v26 = vld [vmem:[#allocation11 + $0x80] ss:$16 sps:$4 sm:$0xff]   ;;  %5070 = vst [vmem:[#allocation19_spill] sm:$0xff] %v4143_v32  ;;  %5071 = vst [vmem:[#allocation23_spill] sm:$0xff] %v4146_v10  ;;  %v4149_v9 = vld [vmem:[#allocation11 + $0xac] ss:$16 sps:$4 sm:$0xff]  }
 0x25f   :  { %3033 = vpow2.f32 %v2811_v8  ;;  %5069 = vst [vmem:[#allocation43_spill] sm:$0xff] %v4140_v26  ;;  %5072 = vst [vmem:[#allocation20_spill] sm:$0xff] %v4149_v9  ;;  %v4152_v14 = vld [vmem:[#allocation11 + $0xa0] ss:$16 sps:$4 sm:$0xff]   ;;  %v4155_v15 = vld [vmem:[#allocation11 + $0xa8] ss:$16 sps:$4 sm:$0xff]  }
 0x260   :  { %3035 = vpow2.f32 %v2812_v60  ;;  %v4137_v60 = vld [vmem:[#allocation11 + $0x8c] ss:$16 sps:$4 sm:$0xff]   ;;  %5073 = vst [vmem:[#allocation24_spill] sm:$0xff] %v4152_v14  ;;  %5074 = vst [vmem:[#allocation21_spill] sm:$0xff] %v4155_v15  ;;  %v4158_v3 = vld [vmem:[#allocation11 + $0xc4] ss:$16 sps:$4 sm:$0xff]  }
 0x261   :  { %3037 = vtanh.f32 %v1002_v54  ;;  %5068 = vst [vmem:[#allocation42_spill] sm:$0xff] %v4137_v60  ;;  %5075 = vst [vmem:[#allocation27_spill] sm:$0xff] %v4158_v3  ;;  %v4161_v8 = vld [vmem:[#allocation11 + $0xcc] ss:$16 sps:$4 sm:$0xff]   ;;  %v4167_v0 = vld [vmem:[#allocation11 + $0xc8] ss:$16 sps:$4 sm:$0xff]  }
 0x262   :  { %5076 = vst [vmem:[#allocation22_spill] sm:$0xff] %v4161_v8  ;;  %5077 = vst [vmem:[#allocation28_spill] sm:$0xff] %v4164_v16  ;;  %v4170_v7 = vld [vmem:[#allocation11 + $0xe4] ss:$16 sps:$4 sm:$0xff]   ;;  %v4173_v30 = vld [vmem:[#allocation11 + $0xec] ss:$16 sps:$4 sm:$0xff]  }
 0x263   :  { %5078 = vst [vmem:[#allocation25_spill] sm:$0xff] %v4167_v0  ;;  %5079 = vst [vmem:[#allocation31_spill] sm:$0xff] %v4170_v7  ;;  %v4185_v54 = vld [vmem:[#allocation11 + $0x10c] ss:$16 sps:$4 sm:$0xff]  }
 0x264   :  { %5080 = vst [vmem:[#allocation26_spill] sm:$0xff] %v4173_v30  ;;  %5084 = vst [vmem:[#allocation30_spill] sm:$0xff] %v4185_v54 }
 0x265   :  { %v3030_v20 = vpop.eup %3029 }
 0x266   :  { %v1027_v11 = vmul.f32 %v3030_v20, %v3028_v29  ;;  %v4176_v29 = vld [vmem:[#allocation11 + $0xe0] ss:$16 sps:$4 sm:$0xff]   ;;  %v4179_v20 = vld [vmem:[#allocation11 + $0xe8] ss:$16 sps:$4 sm:$0xff]  }
 0x267   :  { %5081 = vst [vmem:[#allocation32_spill] sm:$0xff] %v4176_v29  ;;  %5082 = vst [vmem:[#allocation29_spill] sm:$0xff] %v4179_v20 }
 0x268   :  { %v3032_v35 = vpop.eup %3031  ;;  %v4034_v2 = vsel %vm1062_vm4, %v1027_v11, %v3933_v27  ;;  %v4182_v11 = vld [vmem:[#allocation11 + $0x104] ss:$16 sps:$4 sm:$0xff]  }
 0x269   :  { %v3034_v5 = vpop.eup %3033  ;;  %1073 = vst [vmem:[#allocation12 + $0x8] sm:$0xff] %v4034_v2  ;;  %v1076_v4 = vpack.c.bf16 %v4034_v2, %v4034_v2  ;;  %v1031_v31 = vadd.f32 1.0, %v3032_v35  ;;  %5083 = vst [vmem:[#allocation35_spill] sm:$0xff] %v4182_v11  ;;  %v1243_v35 = vld [vmem:[#allocation6 + $0x20] sm:$0xff] }
 0x26a   :  { %v1037_v6 = vadd.f32 1.0, %v3034_v5  ;;  %v3036_v27 = vpop.eup %3035  ;;  %v1245_v5 = vunpack.c.l.bf16 %v1243_v35 }
 0x26b   :  { %3039 = vrcp.f32 %v1031_v31  ;;  %1110 = vmatmul.mubr.bf16.vlgmr.msra.gmra.mrb[16].mxu0 %v1076_v4  ;;  %1151 = vmatmul.mubr.bf16.vlgmr.msra.gmra.mrb[16].mxu1 %v1076_v4  ;;  %v1246_v4 = vunpack.c.h.bf16 %v1243_v35  ;;  %v5085_v31 = vld [vmem:[#allocation45_spill] sm:$0xff] }
 0x26c   :  { %3041 = vrcp.f32 %v1037_v6  ;;  %1161 = vmatpush1.bf16.msra.mxu0 %v3681_v33  ;;  %1202 = vmatpush1.bf16.msra.mxu1 %v3701_v40  ;;  %v3038_v33 = vpop.eup %3037  ;;  %v1249_v6 = vadd.f32 %v1245_v5, %v5085_v31 }
 0x26d   :  { %1162 = vmatprep.subr.bf16.mxu0 %v3684_v34  ;;  %1203 = vmatprep.subr.bf16.mxu1 %v3704_v41 }
 0x26e   :  { %1192 = vmatprep.mubr.bf16.mxu0 %v5032_v49  ;;  %1233 = vmatprep.mubr.bf16.mxu1 %v5032_v49 }
 0x270   :  { %1163 = vmatpush1.bf16.msra.mxu0 %v3694_v38  ;;  %1204 = vmatpush1.bf16.msra.mxu1 %v3714_v44  ;;  %v804_v38 = vsel %vm802_vm2, %v3954_v22, 0.0  ;;  %v4110_v22 = vld [vmem:[#allocation11 + $0x44] ss:$16 sps:$4 sm:$0xff]  }
 0x271   :  { %1164 = vmatprep.subr.bf16.mxu0 %v3696_v39  ;;  %1205 = vmatprep.subr.bf16.mxu1 %v3717_v45  ;;  %v1044_v39 = vadd.f32 1.0, %v3036_v27  ;;  %v1244_v27 = vld [vmem:[#allocation6 + $0x28] sm:$0xff] }
 0x272   :  { %v1247_v5 = vunpack.c.l.bf16 %v1244_v27 }
 0x273   :  { %3043 = vrcp.f32 %v1044_v39 }
 0x274   :  { %1165 = vmatpush1.bf16.msra.mxu0 %v3707_v42  ;;  %1206 = vmatpush1.bf16.msra.mxu1 %v3733_v50  ;;  %v1068_v42 = vpop.permute.xlu1 %1067 }
 0x275   :  { %v3040_v34 = vpop.eup %3039  ;;  %1166 = vmatprep.subr.bf16.mxu0 %v3709_v43  ;;  %1207 = vmatprep.subr.bf16.mxu1 %v3740_v53  ;;  %vm1069_vm5 = vcmp.eq.s32.totalorder %v1068_v42, 1  ;;  %v5064_v53 = vld [vmem:[#allocation41_spill] sm:$0xff] }
 0x276   :  { %v3042_v40 = vpop.eup %3041  ;;  %v1048_v41 = vmul.f32 %v3040_v34, %v3038_v33  ;;  %v5086_v33 = vld [vmem:[#allocation46_spill] sm:$0xff] }
 0x277   :  { %v1047_v44 = vmul.f32 %v3042_v40, %v804_v38  ;;  %v1250_v34 = vadd.f32 %v1246_v4, %v5086_v33  ;;  %v1251_v4 = vadd.f32 %v1247_v5, %v5062_v36 }
 0x278   :  { %1167 = vmatpush1.bf16.msra.mxu0 %v3724_v47  ;;  %1208 = vmatpush1.bf16.msra.mxu1 %v3750_v57  ;;  %v4084_v57 = vld [vmem:[#allocation11 + $0x4] ss:$16 sps:$4 sm:$0xff]  }
 0x279   :  { %v1049_v45 = vadd.f32 %v1048_v41, %v1047_v44  ;;  %1168 = vmatprep.subr.bf16.mxu0 %v3726_v48  ;;  %1209 = vmatprep.subr.bf16.mxu1 %v3756_v59  ;;  %v4087_v59 = vld [vmem:[#allocation11 + $0xc] ss:$16 sps:$4 sm:$0xff]   ;;  %v1248_v41 = vunpack.c.h.bf16 %v1244_v27 }
 0x27b   :  { %3045 = vtanh.f32 %v1049_v45  ;;  %v4061_v43 = vsel %vm1069_vm5, %v1049_v45, %v804_v38  ;;  %v1252_v35 = vadd.f32 %v1248_v41, %v3900_v25 }
 0x27c   :  { %1169 = vmatpush1.bf16.msra.mxu0 %v3744_v55  ;;  %1210 = vmatpush1.bf16.msra.mxu1 %v3766_v63  ;;  %v4093_v63 = vld [vmem:[#allocation11 + $0x8] ss:$16 sps:$4 sm:$0xff]  }
 0x27d   :  { %1170 = vmatprep.subr.bf16.mxu0 %v3747_v56  ;;  %1211 = vmatprep.subr.bf16.mxu1 %v5033_v21  ;;  %v3044_v47 = vpop.eup %3043  ;;  %v4113_v21 = vld [vmem:[#allocation11 + $0x4c] ss:$16 sps:$4 sm:$0xff]  }
 0x280   :  { %1171 = vmatpush1.bf16.msra.mxu0 %v5034_v24  ;;  %1212 = vmatpush1.bf16.msra.mxu1 %v3782_v58  ;;  %v4096_v58 = vld [vmem:[#allocation11 + $0x24] ss:$16 sps:$4 sm:$0xff]   ;;  %v4116_v24 = vld [vmem:[#allocation11 + $0x40] ss:$16 sps:$4 sm:$0xff]  }
 0x281   :  { %1172 = vmatprep.subr.bf16.mxu0 %v5035_v18  ;;  %1213 = vmatprep.subr.bf16.mxu1 %v5036_v28  ;;  %v4119_v18 = vld [vmem:[#allocation11 + $0x48] ss:$16 sps:$4 sm:$0xff]   ;;  %v4122_v28 = vld [vmem:[#allocation11 + $0x64] ss:$16 sps:$4 sm:$0xff]  }
 0x284   :  { %1173 = vmatpush1.bf16.msra.mxu0 %v5037_v19  ;;  %1214 = vmatpush1.bf16.msra.mxu1 %v3796_v62  ;;  %v4090_v62 = vld [vmem:[#allocation11] ss:$16 sps:$4 sm:$0xff]   ;;  %v4125_v19 = vld [vmem:[#allocation11 + $0x6c] ss:$16 sps:$4 sm:$0xff]  }
 0x285   :  { %v3046_v48 = vpop.eup %3045  ;;  %1174 = vmatprep.subr.bf16.mxu0 %v5038_v13  ;;  %1215 = vmatprep.subr.bf16.mxu1 %v3802_v51  ;;  %v4104_v51 = vld [vmem:[#allocation11 + $0x20] ss:$16 sps:$4 sm:$0xff]  }
 0x286   :  { %v1051_v50 = vmul.f32 %v3046_v48, %v3044_v47  ;;  %v4128_v13 = vld [vmem:[#allocation11 + $0x60] ss:$16 sps:$4 sm:$0xff]  }
 0x287   :  { %5065 = vst [vmem:[#allocation39_spill] sm:$0xff] %v4128_v13 }
 0x288   :  { %1175 = vmatpush1.bf16.msra.mxu0 %v3792_v46  ;;  %1216 = vmatpush1.bf16.msra.mxu1 %v3807_v37  ;;  %v4079_v55 = vsel %vm1069_vm5, %v1051_v50, %v5064_v53  ;;  %v4099_v46 = vld [vmem:[#allocation11 + $0x2c] ss:$16 sps:$4 sm:$0xff]   ;;  %v4107_v37 = vld [vmem:[#allocation11 + $0x28] ss:$16 sps:$4 sm:$0xff]  }
 0x289   :  { %1075 = vst [vmem:[#allocation13 + $0x30] sm:$0xff] %v4079_v55  ;;  %v1159_v56 = vpack.c.bf16 %v4079_v55, %v4079_v55  ;;  %1345 = vmatprep.subr.bf16.mxu0 %v4084_v57  ;;  %1386 = vmatprep.subr.bf16.mxu1 %v4087_v59 }
 0x28b   :  { %1193 = vmatmul.mubr.bf16.vlgmr.msra.gmra.mrb[20].mxu0 %v1159_v56  ;;  %1234 = vmatmul.mubr.bf16.vlgmr.msra.gmra.mrb[20].mxu1 %v1159_v56 }
 0x28c   :  { %1346 = vmatpush1.bf16.msra.mxu0 %v4090_v62  ;;  %1387 = vmatpush1.bf16.msra.mxu1 %v4093_v63 }
 0x28d   :  { %1347 = vmatprep.subr.bf16.mxu0 %v4096_v58  ;;  %1388 = vmatprep.subr.bf16.mxu1 %v4099_v46 }
 0x28e   :  { %1377 = vmatprep.mubr.bf16.mxu0 %v5032_v49  ;;  %1418 = vmatprep.mubr.bf16.mxu1 %v5032_v49 }
 0x290   :  { %1348 = vmatpush1.bf16.msra.mxu0 %v4104_v51  ;;  %1389 = vmatpush1.bf16.msra.mxu1 %v4107_v37 }
 0x291   :  { %1349 = vmatprep.subr.bf16.mxu0 %v4110_v22  ;;  %1390 = vmatprep.subr.bf16.mxu1 %v4113_v21 }
 0x294   :  { %1350 = vmatpush1.bf16.msra.mxu0 %v4116_v24  ;;  %1391 = vmatpush1.bf16.msra.mxu1 %v4119_v18 }
 0x295   :  { %1351 = vmatprep.subr.bf16.mxu0 %v4122_v28  ;;  %1392 = vmatprep.subr.bf16.mxu1 %v4125_v19 }
 0x298   :  { %1352 = vmatpush1.bf16.msra.mxu0 %v4128_v13  ;;  %1393 = vmatpush1.bf16.msra.mxu1 %v4131_v17 }
 0x299   :  { %1353 = vmatprep.subr.bf16.mxu0 %v4134_v1  ;;  %1394 = vmatprep.subr.bf16.mxu1 %v4137_v60 }
 0x29c   :  { %1354 = vmatpush1.bf16.msra.mxu0 %v4140_v26  ;;  %1395 = vmatpush1.bf16.msra.mxu1 %v4143_v32 }
 0x29d   :  { %1355 = vmatprep.subr.bf16.mxu0 %v4146_v10  ;;  %1396 = vmatprep.subr.bf16.mxu1 %v4149_v9 }
 0x2a0   :  { %1356 = vmatpush1.bf16.msra.mxu0 %v4152_v14  ;;  %1397 = vmatpush1.bf16.msra.mxu1 %v4155_v15 }
 0x2a1   :  { %1357 = vmatprep.subr.bf16.mxu0 %v4158_v3  ;;  %1398 = vmatprep.subr.bf16.mxu1 %v4161_v8 }
 0x2a4   :  { %1358 = vmatpush1.bf16.msra.mxu0 %v4164_v16  ;;  %1399 = vmatpush1.bf16.msra.mxu1 %v4167_v0 }
 0x2a5   :  { %1359 = vmatprep.subr.bf16.mxu0 %v4170_v7  ;;  %1400 = vmatprep.subr.bf16.mxu1 %v4173_v30 }
 0x2a8   :  { %1360 = vmatpush1.bf16.msra.mxu0 %v4176_v29  ;;  %1401 = vmatpush1.bf16.msra.mxu1 %v4179_v20 }
 0x2a9   :  { %1428 = vmatprep.subr.bf16.mxu0 %v4182_v11  ;;  %1469 = vmatprep.subr.bf16.mxu1 %v4185_v54 }
 0x33e   :  { %v1111_v40 = vpop.f32.mrb[16].mxu0  ;;  %v1152_v38 = vpop.f32.mrb[16].mxu1 }
 0x33f   :  { %v1253_v39 = vadd.f32 %v1249_v6, %v1111_v40  ;;  %v1113_v44 = vpop.f32.mrb[17].mxu0  ;;  %v1154_v42 = vpop.f32.mrb[17].mxu1  ;;  %v1255_v11 = vadd.f32 %v1251_v4, %v1152_v38  ;;  %v1259_v38 = vld [vmem:[#allocation9 + $0x58] sm:$0xff] }
 0x340   :  { %v1254_v45 = vadd.f32 %v1250_v34, %v1113_v44  ;;  %v1115_v47 = vpop.f32.mrb[18].mxu0  ;;  %v1156_v48 = vpop.f32.mrb[18].mxu1  ;;  %v1256_v31 = vadd.f32 %v1252_v35, %v1154_v42  ;;  %v1263_v5 = vunpack.c.h.bf16 %v1259_v38 }
 0x341   :  { %v2815_v50 = vmul.f32 -1.442695, %v1253_v39  ;;  %v1116_v53 = vpop.f32.mrb[19].mxu0  ;;  %v1157_v56 = vpop.f32.mrb[19].mxu1  ;;  %v1258_v39 = vld [vmem:[#allocation9 + $0x50] sm:$0xff] }
 0x342   :  { %v2816_v54 = vmul.f32 -1.442695, %v1254_v45  ;;  %v2817_v33 = vmul.f32 -1.442695, %v1256_v31  ;;  %v1260_v44 = vunpack.c.l.bf16 %v1258_v39  ;;  %v1261_v41 = vunpack.c.h.bf16 %v1258_v39  ;;  %v5087_v53 = vld [vmem:[#allocation48_spill] sm:$0xff] }
 0x343   :  { %3047 = vpow2.f32 %v2815_v50 }
 0x344   :  { %3049 = vpow2.f32 %v2816_v54  ;;  %v1264_v31 = vadd.f32 %v1260_v44, %v3910_v12 }
 0x345   :  { %3051 = vpow2.f32 %v2817_v33  ;;  %v1265_v33 = vadd.f32 %v1261_v41, %v5087_v53 }
 0x346   :  { %3053 = vtanh.f32 %v1255_v11  ;;  %v1329_v11 = vpop.permute.xlu0 %1328 }
 0x347   :  { %vm1330_vm6 = vcmp.eq.s32.totalorder %v1329_v11, 1  ;;  %v4217_v11 = vld [vmem:[#allocation11 + $0x12c] ss:$16 sps:$4 sm:$0xff]  }
 0x34d   :  { %v3048_v6 = vpop.eup %3047 }
 0x34e   :  { %v3050_v40 = vpop.eup %3049  ;;  %v1275_v20 = vadd.f32 1.0, %v3048_v6 }
 0x34f   :  { %v1281_v34 = vadd.f32 1.0, %v3050_v40  ;;  %v3052_v45 = vpop.eup %3051 }
 0x350   :  { %3055 = vrcp.f32 %v1275_v20  ;;  %v3054_v47 = vpop.eup %3053  ;;  %v1288_v48 = vadd.f32 1.0, %v3052_v45 }
 0x351   :  { %3057 = vrcp.f32 %v1281_v34 }
 0x352   :  { %3059 = vrcp.f32 %v1288_v48 }
 0x35a   :  { %v3056_v27 = vpop.eup %3055 }
 0x35b   :  { %v3058_v54 = vpop.eup %3057  ;;  %v1292_v42 = vmul.f32 %v3056_v27, %v3054_v47 }
 0x35c   :  { %v1291_v50 = vmul.f32 %v3058_v54, %v4028_v61 }
 0x35e   :  { %v1293_v56 = vadd.f32 %v1292_v42, %v1291_v50  ;;  %v1194_v20 = vpop.f32.mrb[20].mxu0  ;;  %v1235_v35 = vpop.f32.mrb[20].mxu1  ;;  %v1267_v42 = vadd.f32 %v1263_v5, %v3916_v23  ;;  %v1262_v50 = vunpack.c.l.bf16 %v1259_v38 }
 0x35f   :  { %v1268_v4 = vadd.f32 %v1264_v31, %v1194_v20  ;;  %v1196_v6 = vpop.f32.mrb[21].mxu0  ;;  %v1237_v40 = vpop.f32.mrb[21].mxu1 }
 0x360   :  { %3061 = vtanh.f32 %v1293_v56  ;;  %v1269_v34 = vadd.f32 %v1265_v33, %v1196_v6  ;;  %v1198_v39 = vpop.f32.mrb[22].mxu0  ;;  %v1239_v45 = vpop.f32.mrb[22].mxu1  ;;  %v4197_v44 = vsel %vm1330_vm6, %v1293_v56, %v4028_v61  ;;  %v1271_v48 = vadd.f32 %v1267_v42, %v1237_v40  ;;  %v4222_v40 = vld [vmem:[#allocation11 + $0x120] ss:$16 sps:$4 sm:$0xff]  }
 0x361   :  { %v2818_v47 = vmul.f32 -1.442695, %v1268_v4  ;;  %v1199_v41 = vpop.f32.mrb[23].mxu0  ;;  %v1240_v27 = vpop.f32.mrb[23].mxu1  ;;  %v1266_v31 = vadd.f32 %v1262_v50, %v3922_v52  ;;  %v4234_v42 = vld [vmem:[#allocation11 + $0x140] ss:$16 sps:$4 sm:$0xff]  }
 0x362   :  { %v2819_v54 = vmul.f32 -1.442695, %v1269_v34  ;;  %v3060_v20 = vpop.eup %3059  ;;  %v2820_v6 = vmul.f32 -1.442695, %v1271_v48  ;;  %v4225_v34 = vld [vmem:[#allocation11 + $0x128] ss:$16 sps:$4 sm:$0xff]  }
 0x363   :  { %3063 = vpow2.f32 %v2818_v47  ;;  %v1270_v39 = vadd.f32 %v1266_v31, %v1235_v35  ;;  %v4208_v35 = vld [vmem:[#allocation11 + $0x100] ss:$16 sps:$4 sm:$0xff]   ;;  %v4228_v47 = vld [vmem:[#allocation11 + $0x144] ss:$16 sps:$4 sm:$0xff]   ;;  %v4231_v41 = vld [vmem:[#allocation11 + $0x14c] ss:$16 sps:$4 sm:$0xff]  }
 0x364   :  { %3065 = vpow2.f32 %v2819_v54  ;;  %v4237_v50 = vld [vmem:[#allocation11 + $0x148] ss:$16 sps:$4 sm:$0xff]   ;;  %v4240_v31 = vld [vmem:[#allocation11 + $0x164] ss:$16 sps:$4 sm:$0xff]  }
 0x365   :  { %3067 = vpow2.f32 %v2820_v6  ;;  %5088 = vst [vmem:[#allocation36_spill] sm:$0xff] %v4240_v31 }
 0x366   :  { %3069 = vtanh.f32 %v1270_v39 }
 0x36a   :  { %v3062_v33 = vpop.eup %3061 }
 0x36b   :  { %v1295_v45 = vmul.f32 %v3062_v33, %v3060_v20  ;;  %v4243_v20 = vld [vmem:[#allocation11 + $0x16c] ss:$16 sps:$4 sm:$0xff]  }
 0x36c   :  { %5089 = vst [vmem:[#allocation33_spill] sm:$0xff] %v4243_v20 }
 0x36d   :  { %v3064_v53 = vpop.eup %3063  ;;  %v4203_v61 = vsel %vm1330_vm6, %v1295_v45, %v4034_v2  ;;  %v4211_v2 = vld [vmem:[#allocation11 + $0x108] ss:$16 sps:$4 sm:$0xff]  }
 0x36e   :  { %v3066_v56 = vpop.eup %3065  ;;  %v1299_v4 = vadd.f32 1.0, %v3064_v53  ;;  %1341 = vst [vmem:[#allocation12 + $0x10] sm:$0xff] %v4203_v61  ;;  %v1344_v38 = vpack.c.bf16 %v4203_v61, %v4203_v61  ;;  %v4214_v53 = vld [vmem:[#allocation11 + $0x124] ss:$16 sps:$4 sm:$0xff]  }
 0x36f   :  { %v1305_v5 = vadd.f32 1.0, %v3066_v56  ;;  %v3068_v27 = vpop.eup %3067  ;;  %v4247_v56 = vld [vmem:[#allocation11 + $0x160] ss:$16 sps:$4 sm:$0xff]  }
 0x370   :  { %3071 = vrcp.f32 %v1299_v4  ;;  %1378 = vmatmul.mubr.bf16.vlgmr.msra.gmra.mrb[24].mxu0 %v1344_v38  ;;  %1419 = vmatmul.mubr.bf16.vlgmr.msra.gmra.mrb[24].mxu1 %v1344_v38  ;;  %v3070_v54 = vpop.eup %3069  ;;  %v1312_v39 = vadd.f32 1.0, %v3068_v27  ;;  %v4250_v4 = vld [vmem:[#allocation11 + $0x168] ss:$16 sps:$4 sm:$0xff]   ;;  %v1336_v38 = vpop.permute.xlu1 %1335 }
 0x371   :  { %3073 = vrcp.f32 %v1305_v5  ;;  %1429 = vmatpush1.bf16.msra.mxu0 %v4208_v35  ;;  %1470 = vmatpush1.bf16.msra.mxu1 %v4211_v2  ;;  %vm1337_vm7 = vcmp.eq.s32.totalorder %v1336_v38, 1  ;;  %v5102_v38 = vld [vmem:[#allocation35_spill] sm:$0xff] }
 0x372   :  { %1430 = vmatprep.subr.bf16.mxu0 %v4214_v53  ;;  %1471 = vmatprep.subr.bf16.mxu1 %v4217_v11  ;;  %3075 = vrcp.f32 %v1312_v39  ;;  %v4275_v39 = vld [vmem:[#allocation11 + $0x1a0] ss:$16 sps:$4 sm:$0xff]  }
 0x373   :  { %1460 = vmatprep.mubr.bf16.mxu0 %v5032_v49  ;;  %1501 = vmatprep.mubr.bf16.mxu1 %v5032_v49  ;;  %5095 = vst [vmem:[#allocation49_spill] sm:$0xff] %v4275_v39 }
 0x375   :  { %1431 = vmatpush1.bf16.msra.mxu0 %v4222_v40  ;;  %1472 = vmatpush1.bf16.msra.mxu1 %v4225_v34 }
 0x376   :  { %1432 = vmatprep.subr.bf16.mxu0 %v4228_v47  ;;  %1473 = vmatprep.subr.bf16.mxu1 %v4231_v41 }
 0x379   :  { %1433 = vmatpush1.bf16.msra.mxu0 %v4234_v42  ;;  %1474 = vmatpush1.bf16.msra.mxu1 %v4237_v50 }
 0x37a   :  { %v3072_v48 = vpop.eup %3071  ;;  %1434 = vmatprep.subr.bf16.mxu0 %v4240_v31  ;;  %1475 = vmatprep.subr.bf16.mxu1 %v4243_v20  ;;  %v4253_v31 = vld [vmem:[#allocation11 + $0x184] ss:$16 sps:$4 sm:$0xff]   ;;  %v4256_v20 = vld [vmem:[#allocation11 + $0x18c] ss:$16 sps:$4 sm:$0xff]  }
 0x37b   :  { %v3074_v33 = vpop.eup %3073  ;;  %v1316_v6 = vmul.f32 %v3072_v48, %v3070_v54  ;;  %5090 = vst [vmem:[#allocation37_spill] sm:$0xff] %v4256_v20  ;;  %v4263_v54 = vld [vmem:[#allocation11 + $0x180] ss:$16 sps:$4 sm:$0xff]   ;;  %v4266_v48 = vld [vmem:[#allocation11 + $0x188] ss:$16 sps:$4 sm:$0xff]  }
 0x37c   :  { %v1315_v45 = vmul.f32 %v3074_v33, %v4061_v43  ;;  %5091 = vst [vmem:[#allocation34_spill] sm:$0xff] %v4263_v54  ;;  %5092 = vst [vmem:[#allocation38_spill] sm:$0xff] %v4266_v48  ;;  %v4269_v33 = vld [vmem:[#allocation11 + $0x1a4] ss:$16 sps:$4 sm:$0xff]  }
 0x37d   :  { %1435 = vmatpush1.bf16.msra.mxu0 %v4247_v56  ;;  %1476 = vmatpush1.bf16.msra.mxu1 %v4250_v4  ;;  %5093 = vst [vmem:[#allocation47_spill] sm:$0xff] %v4269_v33 }
 0x37e   :  { %v1317_v5 = vadd.f32 %v1316_v6, %v1315_v45  ;;  %1436 = vmatprep.subr.bf16.mxu0 %v4253_v31  ;;  %1477 = vmatprep.subr.bf16.mxu1 %v4256_v20  ;;  %v4272_v6 = vld [vmem:[#allocation11 + $0x1ac] ss:$16 sps:$4 sm:$0xff]   ;;  %v4281_v45 = vld [vmem:[#allocation11 + $0x1c4] ss:$16 sps:$4 sm:$0xff]   ;;  %v4302_v20 = vld [vmem:[#allocation11 + $0x1e8] ss:$16 sps:$4 sm:$0xff]  }
 0x37f   :  { %5094 = vst [vmem:[#allocation41_spill] sm:$0xff] %v4272_v6  ;;  %5097 = vst [vmem:[#allocation51_spill] sm:$0xff] %v4281_v45 }
 0x380   :  { %3077 = vtanh.f32 %v1317_v5  ;;  %v4261_v27 = vsel %vm1337_vm7, %v1317_v5, %v4061_v43  ;;  %v4278_v43 = vld [vmem:[#allocation11 + $0x1a8] ss:$16 sps:$4 sm:$0xff]   ;;  %v4284_v5 = vld [vmem:[#allocation11 + $0x1cc] ss:$16 sps:$4 sm:$0xff]  }
 0x381   :  { %1437 = vmatpush1.bf16.msra.mxu0 %v4263_v54  ;;  %1478 = vmatpush1.bf16.msra.mxu1 %v4266_v48  ;;  %5096 = vst [vmem:[#allocation50_spill] sm:$0xff] %v4278_v43  ;;  %5098 = vst [vmem:[#allocation52_spill] sm:$0xff] %v4284_v5  ;;  %v4287_v48 = vld [vmem:[#allocation11 + $0x1c0] ss:$16 sps:$4 sm:$0xff]   ;;  %v4293_v54 = vld [vmem:[#allocation11 + $0x1e4] ss:$16 sps:$4 sm:$0xff]  }
 0x382   :  { %1438 = vmatprep.subr.bf16.mxu0 %v4269_v33  ;;  %1479 = vmatprep.subr.bf16.mxu1 %v4272_v6  ;;  %v3076_v33 = vpop.eup %3075  ;;  %v4290_v6 = vld [vmem:[#allocation11 + $0x1c8] ss:$16 sps:$4 sm:$0xff]   ;;  %5100 = vst [vmem:[#allocation54_spill] sm:$0xff] %v4293_v54 }
 0x383   :  { %5099 = vst [vmem:[#allocation53_spill] sm:$0xff] %v4290_v6 }
 0x385   :  { %1439 = vmatpush1.bf16.msra.mxu0 %v4275_v39  ;;  %1480 = vmatpush1.bf16.msra.mxu1 %v4278_v43  ;;  %v4296_v43 = vld [vmem:[#allocation11 + $0x1ec] ss:$16 sps:$4 sm:$0xff]  }
 0x386   :  { %1440 = vmatprep.subr.bf16.mxu0 %v4281_v45  ;;  %1481 = vmatprep.subr.bf16.mxu1 %v4284_v5  ;;  %v4299_v5 = vld [vmem:[#allocation11 + $0x1e0] ss:$16 sps:$4 sm:$0xff]  }
 0x389   :  { %1441 = vmatpush1.bf16.msra.mxu0 %v4287_v48  ;;  %1482 = vmatpush1.bf16.msra.mxu1 %v4290_v6 }
 0x38a   :  { %v3078_v39 = vpop.eup %3077  ;;  %1442 = vmatprep.subr.bf16.mxu0 %v4293_v54  ;;  %1483 = vmatprep.subr.bf16.mxu1 %v4296_v43 }
 0x38b   :  { %v1319_v45 = vmul.f32 %v3078_v39, %v3076_v33  ;;  %v1511_v33 = vld [vmem:[#allocation6 + $0x30] sm:$0xff] }
 0x38c   :  { %v1513_v39 = vunpack.c.l.bf16 %v1511_v33 }
 0x38d   :  { %1443 = vmatpush1.bf16.msra.mxu0 %v4299_v5  ;;  %1484 = vmatpush1.bf16.msra.mxu1 %v4302_v20  ;;  %v4307_v6 = vsel %vm1337_vm7, %v1319_v45, %v4079_v55  ;;  %v5101_v55 = vld [vmem:[#allocation29_spill] sm:$0xff]  ;;  %v1514_v45 = vunpack.c.h.bf16 %v1511_v33 }
 0x38e   :  { %1343 = vst [vmem:[#allocation13 + $0x28] sm:$0xff] %v4307_v6  ;;  %v1427_v54 = vpack.c.bf16 %v4307_v6, %v4307_v6  ;;  %1613 = vmatprep.subr.bf16.mxu0 %v4084_v57  ;;  %1654 = vmatprep.subr.bf16.mxu1 %v4087_v59 }
 0x390   :  { %1461 = vmatmul.mubr.bf16.vlgmr.msra.gmra.mrb[28].mxu0 %v1427_v54  ;;  %1502 = vmatmul.mubr.bf16.vlgmr.msra.gmra.mrb[28].mxu1 %v1427_v54  ;;  %v5103_v54 = vld [vmem:[#allocation30_spill] sm:$0xff] }
 0x391   :  { %1614 = vmatpush1.bf16.msra.mxu0 %v4090_v62  ;;  %1655 = vmatpush1.bf16.msra.mxu1 %v4093_v63 }
 0x392   :  { %1615 = vmatprep.subr.bf16.mxu0 %v4096_v58  ;;  %1656 = vmatprep.subr.bf16.mxu1 %v4099_v46 }
 0x393   :  { %1645 = vmatprep.mubr.bf16.mxu0 %v5032_v49  ;;  %1686 = vmatprep.mubr.bf16.mxu1 %v5032_v49 }
 0x395   :  { %1616 = vmatpush1.bf16.msra.mxu0 %v4104_v51  ;;  %1657 = vmatpush1.bf16.msra.mxu1 %v4107_v37 }
 0x396   :  { %1617 = vmatprep.subr.bf16.mxu0 %v4110_v22  ;;  %1658 = vmatprep.subr.bf16.mxu1 %v4113_v21 }
 0x399   :  { %1618 = vmatpush1.bf16.msra.mxu0 %v4116_v24  ;;  %1659 = vmatpush1.bf16.msra.mxu1 %v4119_v18 }
 0x39a   :  { %1619 = vmatprep.subr.bf16.mxu0 %v4122_v28  ;;  %1660 = vmatprep.subr.bf16.mxu1 %v4125_v19 }
 0x39d   :  { %1620 = vmatpush1.bf16.msra.mxu0 %v4128_v13  ;;  %1661 = vmatpush1.bf16.msra.mxu1 %v4131_v17 }
 0x39e   :  { %1621 = vmatprep.subr.bf16.mxu0 %v4134_v1  ;;  %1662 = vmatprep.subr.bf16.mxu1 %v4137_v60 }
 0x3a1   :  { %1622 = vmatpush1.bf16.msra.mxu0 %v4140_v26  ;;  %1663 = vmatpush1.bf16.msra.mxu1 %v4143_v32 }
 0x3a2   :  { %1623 = vmatprep.subr.bf16.mxu0 %v4146_v10  ;;  %1664 = vmatprep.subr.bf16.mxu1 %v4149_v9 }
 0x3a5   :  { %1624 = vmatpush1.bf16.msra.mxu0 %v4152_v14  ;;  %1665 = vmatpush1.bf16.msra.mxu1 %v4155_v15  ;;  %v5105_v15 = vld [vmem:[#allocation46_spill] sm:$0xff] }
 0x3a6   :  { %1625 = vmatprep.subr.bf16.mxu0 %v4158_v3  ;;  %1666 = vmatprep.subr.bf16.mxu1 %v4161_v8  ;;  %v5104_v8 = vld [vmem:[#allocation45_spill] sm:$0xff] }
 0x3a7   :  { %v1517_v3 = vadd.f32 %v1513_v39, %v5104_v8 }
 0x3a9   :  { %1626 = vmatpush1.bf16.msra.mxu0 %v4164_v16  ;;  %1667 = vmatpush1.bf16.msra.mxu1 %v4167_v0  ;;  %v1512_v16 = vld [vmem:[#allocation6 + $0x38] sm:$0xff]  ;;  %v1518_v0 = vadd.f32 %v1514_v45, %v5105_v15 }
 0x3aa   :  { %1627 = vmatprep.subr.bf16.mxu0 %v4170_v7  ;;  %1668 = vmatprep.subr.bf16.mxu1 %v4173_v30  ;;  %v1516_v9 = vunpack.c.h.bf16 %v1512_v16  ;;  %v1515_v39 = vunpack.c.l.bf16 %v1512_v16 }
 0x3ac   :  { %v1520_v33 = vadd.f32 %v1516_v9, %v3900_v25  ;;  %v1519_v45 = vadd.f32 %v1515_v39, %v5062_v36 }
 0x3ad   :  { %1628 = vmatpush1.bf16.msra.mxu0 %v4176_v29  ;;  %1669 = vmatpush1.bf16.msra.mxu1 %v5101_v55 }
 0x3ae   :  { %1696 = vmatprep.subr.bf16.mxu0 %v5102_v38  ;;  %1737 = vmatprep.subr.bf16.mxu1 %v5103_v54 }
 0x443   :  { %v1379_v14 = vpop.f32.mrb[24].mxu0  ;;  %v1420_v7 = vpop.f32.mrb[24].mxu1 }
 0x444   :  { %v1521_v30 = vadd.f32 %v1517_v3, %v1379_v14  ;;  %v1381_v10 = vpop.f32.mrb[25].mxu0  ;;  %v1422_v29 = vpop.f32.mrb[25].mxu1  ;;  %v1523_v17 = vadd.f32 %v1519_v45, %v1420_v7  ;;  %v1527_v7 = vld [vmem:[#allocation9 + $0x48] sm:$0xff] }
 0x445   :  { %v1522_v32 = vadd.f32 %v1518_v0, %v1381_v10  ;;  %v1383_v55 = vpop.f32.mrb[26].mxu0  ;;  %v1424_v26 = vpop.f32.mrb[26].mxu1  ;;  %v1524_v8 = vadd.f32 %v1520_v33, %v1422_v29  ;;  %v1531_v39 = vunpack.c.h.bf16 %v1527_v7 }
 0x446   :  { %v2823_v38 = vmul.f32 -1.442695, %v1521_v30  ;;  %v1384_v60 = vpop.f32.mrb[27].mxu0  ;;  %v1425_v54 = vpop.f32.mrb[27].mxu1 }
 0x447   :  { %v2824_v1 = vmul.f32 -1.442695, %v1522_v32  ;;  %v2825_v15 = vmul.f32 -1.442695, %v1524_v8  ;;  %v1526_v60 = vld [vmem:[#allocation9 + $0x40] sm:$0xff] }
 0x448   :  { %3079 = vpow2.f32 %v2823_v38  ;;  %v1528_v32 = vunpack.c.l.bf16 %v1526_v60  ;;  %v1529_v9 = vunpack.c.h.bf16 %v1526_v60  ;;  %v5106_v38 = vld [vmem:[#allocation48_spill] sm:$0xff] }
 0x449   :  { %3081 = vpow2.f32 %v2824_v1 }
 0x44a   :  { %3083 = vpow2.f32 %v2825_v15  ;;  %v1532_v8 = vadd.f32 %v1528_v32, %v3910_v12  ;;  %v1533_v15 = vadd.f32 %v1529_v9, %v5106_v38 }
 0x44b   :  { %3085 = vtanh.f32 %v1523_v17  ;;  %v1597_v17 = vpop.permute.xlu0 %1596 }
 0x44c   :  { %vm1598_vm8 = vcmp.eq.s32.totalorder %v1597_v17, 1 }
 0x452   :  { %v3080_v14 = vpop.eup %3079 }
 0x453   :  { %v3082_v3 = vpop.eup %3081  ;;  %v1543_v13 = vadd.f32 1.0, %v3080_v14 }
 0x454   :  { %v1549_v26 = vadd.f32 1.0, %v3082_v3  ;;  %v3084_v10 = vpop.eup %3083 }
 0x455   :  { %3087 = vrcp.f32 %v1543_v13  ;;  %v3086_v0 = vpop.eup %3085  ;;  %v1556_v29 = vadd.f32 1.0, %v3084_v10 }
 0x456   :  { %3089 = vrcp.f32 %v1549_v26 }
 0x457   :  { %3091 = vrcp.f32 %v1556_v29 }
 0x45f   :  { %v3088_v16 = vpop.eup %3087 }
 0x460   :  { %v3090_v1 = vpop.eup %3089  ;;  %v1560_v30 = vmul.f32 %v3088_v16, %v3086_v0 }
 0x461   :  { %v1559_v55 = vmul.f32 %v3090_v1, %v4197_v44 }
 0x463   :  { %v1561_v54 = vadd.f32 %v1560_v30, %v1559_v55  ;;  %v1462_v13 = vpop.f32.mrb[28].mxu0  ;;  %v1503_v33 = vpop.f32.mrb[28].mxu1  ;;  %v1535_v30 = vadd.f32 %v1531_v39, %v3916_v23  ;;  %v1530_v55 = vunpack.c.l.bf16 %v1527_v7 }
 0x464   :  { %v1536_v45 = vadd.f32 %v1532_v8, %v1462_v13  ;;  %v1464_v14 = vpop.f32.mrb[29].mxu0  ;;  %v1505_v3 = vpop.f32.mrb[29].mxu1 }
 0x465   :  { %3093 = vtanh.f32 %v1561_v54  ;;  %v1537_v26 = vadd.f32 %v1533_v15, %v1464_v14  ;;  %v1466_v60 = vpop.f32.mrb[30].mxu0  ;;  %v1507_v10 = vpop.f32.mrb[30].mxu1  ;;  %v4357_v32 = vsel %vm1598_vm8, %v1561_v54, %v4197_v44  ;;  %v1539_v29 = vadd.f32 %v1535_v30, %v1505_v3  ;;  %v5108_v3 = vld [vmem:[#allocation33_spill] sm:$0xff] }
 0x466   :  { %v2826_v0 = vmul.f32 -1.442695, %v1536_v45  ;;  %v1467_v9 = vpop.f32.mrb[31].mxu0  ;;  %v1508_v16 = vpop.f32.mrb[31].mxu1  ;;  %v1534_v8 = vadd.f32 %v1530_v55, %v3922_v52  ;;  %v5109_v55 = vld [vmem:[#allocation37_spill] sm:$0xff] }
 0x467   :  { %v2827_v1 = vmul.f32 -1.442695, %v1537_v26  ;;  %v3092_v13 = vpop.eup %3091  ;;  %v2828_v14 = vmul.f32 -1.442695, %v1539_v29 }
 0x468   :  { %3095 = vpow2.f32 %v2826_v0  ;;  %v1538_v60 = vadd.f32 %v1534_v8, %v1503_v33  ;;  %v5107_v33 = vld [vmem:[#allocation36_spill] sm:$0xff]  ;;  %v5110_v8 = vld [vmem:[#allocation34_spill] sm:$0xff] }
 0x469   :  { %3097 = vpow2.f32 %v2827_v1  ;;  %v1604_v1 = vpop.permute.xlu1 %1603 }
 0x46a   :  { %3099 = vpow2.f32 %v2828_v14  ;;  %vm1605_vm9 = vcmp.eq.s32.totalorder %v1604_v1, 1  ;;  %v5113_v14 = vld [vmem:[#allocation41_spill] sm:$0xff]  ;;  %v5138_v1 = vld [vmem:[#allocation35_spill] sm:$0xff] }
 0x46b   :  { %3101 = vtanh.f32 %v1538_v60  ;;  %v5114_v60 = vld [vmem:[#allocation49_spill] sm:$0xff] }
 0x46f   :  { %v3094_v15 = vpop.eup %3093 }
 0x470   :  { %v1563_v10 = vmul.f32 %v3094_v15, %v3092_v13  ;;  %v5111_v13 = vld [vmem:[#allocation38_spill] sm:$0xff]  ;;  %v5112_v15 = vld [vmem:[#allocation47_spill] sm:$0xff] }
 0x472   :  { %v3096_v38 = vpop.eup %3095  ;;  %v4363_v44 = vsel %vm1598_vm8, %v1563_v10, %v4203_v61  ;;  %v5115_v10 = vld [vmem:[#allocation50_spill] sm:$0xff] }
 0x473   :  { %v3098_v54 = vpop.eup %3097  ;;  %v1567_v45 = vadd.f32 1.0, %v3096_v38  ;;  %1609 = vst [vmem:[#allocation12 + $0x18] sm:$0xff] %v4363_v44  ;;  %v1612_v7 = vpack.c.bf16 %v4363_v44, %v4363_v44 }
 0x474   :  { %v1573_v39 = vadd.f32 1.0, %v3098_v54  ;;  %v3100_v61 = vpop.eup %3099  ;;  %v5116_v54 = vld [vmem:[#allocation51_spill] sm:$0xff] }
 0x475   :  { %3103 = vrcp.f32 %v1567_v45  ;;  %1646 = vmatmul.mubr.bf16.vlgmr.msra.gmra.mrb[32].mxu0 %v1612_v7  ;;  %1687 = vmatmul.mubr.bf16.vlgmr.msra.gmra.mrb[32].mxu1 %v1612_v7  ;;  %v3102_v38 = vpop.eup %3101  ;;  %v1580_v9 = vadd.f32 1.0, %v3100_v61  ;;  %v5117_v45 = vld [vmem:[#allocation52_spill] sm:$0xff]  ;;  %v5119_v61 = vld [vmem:[#allocation54_spill] sm:$0xff] }
 0x476   :  { %3105 = vrcp.f32 %v1573_v39  ;;  %1697 = vmatpush1.bf16.msra.mxu0 %v4208_v35  ;;  %1738 = vmatpush1.bf16.msra.mxu1 %v4211_v2 }
 0x477   :  { %1698 = vmatprep.subr.bf16.mxu0 %v4214_v53  ;;  %1739 = vmatprep.subr.bf16.mxu1 %v4217_v11  ;;  %3107 = vrcp.f32 %v1580_v9  ;;  %v5136_v9 = vld [vmem:[#allocation32_spill] sm:$0xff] }
 0x478   :  { %1728 = vmatprep.mubr.bf16.mxu0 %v5032_v49  ;;  %1769 = vmatprep.mubr.bf16.mxu1 %v5032_v49 }
 0x47a   :  { %1699 = vmatpush1.bf16.msra.mxu0 %v4222_v40  ;;  %1740 = vmatpush1.bf16.msra.mxu1 %v4225_v34 }
 0x47b   :  { %1700 = vmatprep.subr.bf16.mxu0 %v4228_v47  ;;  %1741 = vmatprep.subr.bf16.mxu1 %v4231_v41 }
 0x47e   :  { %1701 = vmatpush1.bf16.msra.mxu0 %v4234_v42  ;;  %1742 = vmatpush1.bf16.msra.mxu1 %v4237_v50 }
 0x47f   :  { %v3104_v17 = vpop.eup %3103  ;;  %1702 = vmatprep.subr.bf16.mxu0 %v5107_v33  ;;  %1743 = vmatprep.subr.bf16.mxu1 %v5108_v3 }
 0x480   :  { %v3106_v26 = vpop.eup %3105  ;;  %v1584_v0 = vmul.f32 %v3104_v17, %v3102_v38 }
 0x481   :  { %v1583_v16 = vmul.f32 %v3106_v26, %v4261_v27  ;;  %v3108_v7 = vpop.eup %3107 }
 0x482   :  { %1703 = vmatpush1.bf16.msra.mxu0 %v4247_v56  ;;  %1744 = vmatpush1.bf16.msra.mxu1 %v4250_v4 }
 0x483   :  { %v1585_v30 = vadd.f32 %v1584_v0, %v1583_v16  ;;  %1704 = vmatprep.subr.bf16.mxu0 %v4253_v31  ;;  %1745 = vmatprep.subr.bf16.mxu1 %v5109_v55  ;;  %v5135_v0 = vld [vmem:[#allocation26_spill] sm:$0xff]  ;;  %v5137_v16 = vld [vmem:[#allocation29_spill] sm:$0xff] }
 0x485   :  { %3109 = vtanh.f32 %v1585_v30  ;;  %v4389_v29 = vsel %vm1605_vm9, %v1585_v30, %v4261_v27  ;;  %v5118_v27 = vld [vmem:[#allocation53_spill] sm:$0xff]  ;;  %v5139_v30 = vld [vmem:[#allocation30_spill] sm:$0xff] }
 0x486   :  { %1705 = vmatpush1.bf16.msra.mxu0 %v5110_v8  ;;  %1746 = vmatpush1.bf16.msra.mxu1 %v5111_v13 }
 0x487   :  { %1706 = vmatprep.subr.bf16.mxu0 %v5112_v15  ;;  %1747 = vmatprep.subr.bf16.mxu1 %v5113_v14 }
 0x48a   :  { %1707 = vmatpush1.bf16.msra.mxu0 %v5114_v60  ;;  %1748 = vmatpush1.bf16.msra.mxu1 %v5115_v10 }
 0x48b   :  { %1708 = vmatprep.subr.bf16.mxu0 %v5116_v54  ;;  %1749 = vmatprep.subr.bf16.mxu1 %v5117_v45 }
 0x48e   :  { %1709 = vmatpush1.bf16.msra.mxu0 %v4287_v48  ;;  %1750 = vmatpush1.bf16.msra.mxu1 %v5118_v27 }
 0x48f   :  { %v3110_v39 = vpop.eup %3109  ;;  %1710 = vmatprep.subr.bf16.mxu0 %v5119_v61  ;;  %1751 = vmatprep.subr.bf16.mxu1 %v4296_v43 }
 0x490   :  { %v1587_v38 = vmul.f32 %v3110_v39, %v3108_v7  ;;  %v1779_v7 = vld [vmem:[#allocation6 + $0x40] sm:$0xff] }
 0x491   :  { %v1781_v39 = vunpack.c.l.bf16 %v1779_v7 }
 0x492   :  { %1711 = vmatpush1.bf16.msra.mxu0 %v4299_v5  ;;  %1752 = vmatpush1.bf16.msra.mxu1 %v4302_v20  ;;  %v4407_v17 = vsel %vm1605_vm9, %v1587_v38, %v4307_v6  ;;  %v5134_v6 = vld [vmem:[#allocation31_spill] sm:$0xff]  ;;  %v1782_v38 = vunpack.c.h.bf16 %v1779_v7 }
 0x493   :  { %1611 = vst [vmem:[#allocation13 + $0x20] sm:$0xff] %v4407_v17  ;;  %v1695_v26 = vpack.c.bf16 %v4407_v17, %v4407_v17  ;;  %1881 = vmatprep.subr.bf16.mxu0 %v4084_v57  ;;  %1922 = vmatprep.subr.bf16.mxu1 %v4087_v59  ;;  %v5120_v57 = vld [vmem:[#allocation39_spill] sm:$0xff]  ;;  %v5121_v59 = vld [vmem:[#allocation40_spill] sm:$0xff] }
 0x495   :  { %1729 = vmatmul.mubr.bf16.vlgmr.msra.gmra.mrb[36].mxu0 %v1695_v26  ;;  %1770 = vmatmul.mubr.bf16.vlgmr.msra.gmra.mrb[36].mxu1 %v1695_v26  ;;  %v5140_v26 = vld [vmem:[#allocation45_spill] sm:$0xff] }
 0x496   :  { %1882 = vmatpush1.bf16.msra.mxu0 %v4090_v62  ;;  %1923 = vmatpush1.bf16.msra.mxu1 %v4093_v63  ;;  %v5122_v62 = vld [vmem:[#allocation44_spill] sm:$0xff]  ;;  %v5123_v63 = vld [vmem:[#allocation42_spill] sm:$0xff] }
 0x497   :  { %1883 = vmatprep.subr.bf16.mxu0 %v4096_v58  ;;  %1924 = vmatprep.subr.bf16.mxu1 %v4099_v46  ;;  %v5124_v58 = vld [vmem:[#allocation43_spill] sm:$0xff] }
 0x498   :  { %1913 = vmatprep.mubr.bf16.mxu0 %v5032_v49  ;;  %1954 = vmatprep.mubr.bf16.mxu1 %v5032_v49  ;;  %v5125_v46 = vld [vmem:[#allocation19_spill] sm:$0xff] }
 0x49a   :  { %1884 = vmatpush1.bf16.msra.mxu0 %v4104_v51  ;;  %1925 = vmatpush1.bf16.msra.mxu1 %v4107_v37  ;;  %v5126_v51 = vld [vmem:[#allocation23_spill] sm:$0xff]  ;;  %v5127_v37 = vld [vmem:[#allocation20_spill] sm:$0xff] }
 0x49b   :  { %1885 = vmatprep.subr.bf16.mxu0 %v4110_v22  ;;  %1926 = vmatprep.subr.bf16.mxu1 %v4113_v21  ;;  %v5128_v22 = vld [vmem:[#allocation24_spill] sm:$0xff]  ;;  %v5129_v21 = vld [vmem:[#allocation21_spill] sm:$0xff] }
 0x49e   :  { %1886 = vmatpush1.bf16.msra.mxu0 %v4116_v24  ;;  %1927 = vmatpush1.bf16.msra.mxu1 %v4119_v18  ;;  %v5130_v24 = vld [vmem:[#allocation27_spill] sm:$0xff]  ;;  %v5131_v18 = vld [vmem:[#allocation22_spill] sm:$0xff] }
 0x49f   :  { %1887 = vmatprep.subr.bf16.mxu0 %v4122_v28  ;;  %1928 = vmatprep.subr.bf16.mxu1 %v4125_v19  ;;  %v5132_v28 = vld [vmem:[#allocation28_spill] sm:$0xff]  ;;  %v5133_v19 = vld [vmem:[#allocation25_spill] sm:$0xff] }
 0x4a2   :  { %1888 = vmatpush1.bf16.msra.mxu0 %v5120_v57  ;;  %1929 = vmatpush1.bf16.msra.mxu1 %v5121_v59  ;;  %v1785_v57 = vadd.f32 %v1781_v39, %v5140_v26  ;;  %v1780_v59 = vld [vmem:[#allocation6 + $0x48] sm:$0xff] }
 0x4a3   :  { %1889 = vmatprep.subr.bf16.mxu0 %v5122_v62  ;;  %1930 = vmatprep.subr.bf16.mxu1 %v5123_v63  ;;  %v5141_v62 = vld [vmem:[#allocation46_spill] sm:$0xff] }
 0x4a4   :  { %v1786_v63 = vadd.f32 %v1782_v38, %v5141_v62 }
 0x4a6   :  { %1890 = vmatpush1.bf16.msra.mxu0 %v5124_v58  ;;  %1931 = vmatpush1.bf16.msra.mxu1 %v5125_v46 }
 0x4a7   :  { %1891 = vmatprep.subr.bf16.mxu0 %v5126_v51  ;;  %1932 = vmatprep.subr.bf16.mxu1 %v5127_v37  ;;  %v1784_v51 = vunpack.c.h.bf16 %v1780_v59 }
 0x4aa   :  { %1892 = vmatpush1.bf16.msra.mxu0 %v5128_v22  ;;  %1933 = vmatpush1.bf16.msra.mxu1 %v5129_v21 }
 0x4ab   :  { %1893 = vmatprep.subr.bf16.mxu0 %v5130_v24  ;;  %1934 = vmatprep.subr.bf16.mxu1 %v5131_v18 }
 0x4ae   :  { %1894 = vmatpush1.bf16.msra.mxu0 %v5132_v28  ;;  %1935 = vmatpush1.bf16.msra.mxu1 %v5133_v19 }
 0x4af   :  { %1895 = vmatprep.subr.bf16.mxu0 %v5134_v6  ;;  %1936 = vmatprep.subr.bf16.mxu1 %v5135_v0 }
 0x4b2   :  { %1896 = vmatpush1.bf16.msra.mxu0 %v5136_v9  ;;  %1937 = vmatpush1.bf16.msra.mxu1 %v5137_v16  ;;  %v1788_v16 = vadd.f32 %v1784_v51, %v3900_v25 }
 0x4b3   :  { %1964 = vmatprep.subr.bf16.mxu0 %v5138_v1  ;;  %2005 = vmatprep.subr.bf16.mxu1 %v5139_v30  ;;  %v1783_v1 = vunpack.c.l.bf16 %v1780_v59 }
 0x4b5   :  { %v1787_v7 = vadd.f32 %v1783_v1, %v5062_v36  ;;  %v1865_v1 = vpop.permute.xlu0 %1864 }
 0x4b6   :  { %vm1866_vm10 = vcmp.eq.s32.totalorder %v1865_v1, 1  ;;  %v4571_v1 = vld [vmem:[#allocation11 + $0x88] ss:$16 sps:$4 sm:$0xff]  }
 0x548   :  { %v1647_v58 = vpop.f32.mrb[32].mxu0  ;;  %v1688_v46 = vpop.f32.mrb[32].mxu1 }
 0x549   :  { %v1789_v37 = vadd.f32 %v1785_v57, %v1647_v58  ;;  %v1649_v22 = vpop.f32.mrb[33].mxu0  ;;  %v1690_v21 = vpop.f32.mrb[33].mxu1  ;;  %v1791_v38 = vadd.f32 %v1787_v7, %v1688_v46  ;;  %v1795_v46 = vld [vmem:[#allocation9 + $0x38] sm:$0xff] }
 0x54a   :  { %v1790_v24 = vadd.f32 %v1786_v63, %v1649_v22  ;;  %v1651_v18 = vpop.f32.mrb[34].mxu0  ;;  %v1692_v28 = vpop.f32.mrb[34].mxu1  ;;  %v1792_v30 = vadd.f32 %v1788_v16, %v1690_v21 }
 0x54b   :  { %v2831_v19 = vmul.f32 -1.442695, %v1789_v37  ;;  %v1652_v6 = vpop.f32.mrb[35].mxu0  ;;  %v1693_v0 = vpop.f32.mrb[35].mxu1  ;;  %v1794_v37 = vld [vmem:[#allocation9 + $0x30] sm:$0xff] }
 0x54c   :  { %v2832_v9 = vmul.f32 -1.442695, %v1790_v24  ;;  %v2833_v39 = vmul.f32 -1.442695, %v1792_v30  ;;  %v1796_v22 = vunpack.c.l.bf16 %v1794_v37  ;;  %v1797_v51 = vunpack.c.h.bf16 %v1794_v37 }
 0x54d   :  { %3111 = vpow2.f32 %v2831_v19 }
 0x54e   :  { %3113 = vpow2.f32 %v2832_v9  ;;  %v1800_v6 = vadd.f32 %v1796_v22, %v3910_v12  ;;  %v5142_v9 = vld [vmem:[#allocation48_spill] sm:$0xff] }
 0x54f   :  { %3115 = vpow2.f32 %v2833_v39  ;;  %v1801_v16 = vadd.f32 %v1797_v51, %v5142_v9  ;;  %v1799_v39 = vunpack.c.h.bf16 %v1795_v46 }
 0x550   :  { %3117 = vtanh.f32 %v1791_v38 }
 0x557   :  { %v3112_v57 = vpop.eup %3111 }
 0x558   :  { %v3114_v58 = vpop.eup %3113  ;;  %v1811_v62 = vadd.f32 1.0, %v3112_v57 }
 0x559   :  { %v1817_v63 = vadd.f32 1.0, %v3114_v58  ;;  %v3116_v24 = vpop.eup %3115 }
 0x55a   :  { %3119 = vrcp.f32 %v1811_v62  ;;  %v3118_v18 = vpop.eup %3117  ;;  %v1824_v19 = vadd.f32 1.0, %v3116_v24 }
 0x55b   :  { %3121 = vrcp.f32 %v1817_v63 }
 0x55c   :  { %3123 = vrcp.f32 %v1824_v19 }
 0x564   :  { %v3120_v59 = vpop.eup %3119 }
 0x565   :  { %v3122_v28 = vpop.eup %3121  ;;  %v1828_v21 = vmul.f32 %v3120_v59, %v3118_v18 }
 0x566   :  { %v1827_v0 = vmul.f32 %v3122_v28, %v4357_v32 }
 0x568   :  { %v1829_v30 = vadd.f32 %v1828_v21, %v1827_v0  ;;  %v1730_v62 = vpop.f32.mrb[36].mxu0  ;;  %v1771_v7 = vpop.f32.mrb[36].mxu1  ;;  %v1803_v21 = vadd.f32 %v1799_v39, %v3916_v23  ;;  %v1798_v0 = vunpack.c.l.bf16 %v1795_v46 }
 0x569   :  { %v1804_v38 = vadd.f32 %v1800_v6, %v1730_v62  ;;  %v1732_v57 = vpop.f32.mrb[37].mxu0  ;;  %v1773_v58 = vpop.f32.mrb[37].mxu1 }
 0x56a   :  { %3125 = vtanh.f32 %v1829_v30  ;;  %v1805_v63 = vadd.f32 %v1801_v16, %v1732_v57  ;;  %v1734_v37 = vpop.f32.mrb[38].mxu0  ;;  %v1775_v24 = vpop.f32.mrb[38].mxu1  ;;  %v4457_v22 = vsel %vm1866_vm10, %v1829_v30, %v4357_v32  ;;  %v1807_v19 = vadd.f32 %v1803_v21, %v1773_v58  ;;  %v4577_v58 = vld [vmem:[#allocation11 + $0xac] ss:$16 sps:$4 sm:$0xff]   ;;  %v4595_v21 = vld [vmem:[#allocation11 + $0xc8] ss:$16 sps:$4 sm:$0xff]  }
 0x56b   :  { %v2834_v18 = vmul.f32 -1.442695, %v1804_v38  ;;  %v1735_v51 = vpop.f32.mrb[39].mxu0  ;;  %v1776_v59 = vpop.f32.mrb[39].mxu1  ;;  %v1802_v6 = vadd.f32 %v1798_v0, %v3922_v52  ;;  %v4598_v0 = vld [vmem:[#allocation11 + $0xe4] ss:$16 sps:$4 sm:$0xff]  }
 0x56c   :  { %v2835_v28 = vmul.f32 -1.442695, %v1805_v63  ;;  %v3124_v62 = vpop.eup %3123  ;;  %v2836_v57 = vmul.f32 -1.442695, %v1807_v19  ;;  %v4580_v63 = vld [vmem:[#allocation11 + $0xa0] ss:$16 sps:$4 sm:$0xff]  }
 0x56d   :  { %3127 = vpow2.f32 %v2834_v18  ;;  %v1806_v37 = vadd.f32 %v1802_v6, %v1771_v7  ;;  %v4574_v7 = vld [vmem:[#allocation11 + $0xa4] ss:$16 sps:$4 sm:$0xff]   ;;  %v4583_v18 = vld [vmem:[#allocation11 + $0xa8] ss:$16 sps:$4 sm:$0xff]   ;;  %v4589_v59 = vld [vmem:[#allocation11 + $0xcc] ss:$16 sps:$4 sm:$0xff]  }
 0x56e   :  { %3129 = vpow2.f32 %v2835_v28  ;;  %v4586_v51 = vld [vmem:[#allocation11 + $0xc4] ss:$16 sps:$4 sm:$0xff]   ;;  %v4592_v28 = vld [vmem:[#allocation11 + $0xc0] ss:$16 sps:$4 sm:$0xff]   ;;  %v4601_v19 = vld [vmem:[#allocation11 + $0xec] ss:$16 sps:$4 sm:$0xff]  }
 0x56f   :  { %3131 = vpow2.f32 %v2836_v57  ;;  %v4604_v6 = vld [vmem:[#allocation11 + $0xe0] ss:$16 sps:$4 sm:$0xff]   ;;  %v4613_v57 = vld [vmem:[#allocation11 + $0x10c] ss:$16 sps:$4 sm:$0xff]  }
 0x570   :  { %3133 = vtanh.f32 %v1806_v37  ;;  %5145 = vst [vmem:[#allocation37_spill] sm:$0xff] %v4613_v57  ;;  %v2047_v37 = vld [vmem:[#allocation6 + $0x50] sm:$0xff] }
 0x574   :  { %v3126_v16 = vpop.eup %3125 }
 0x575   :  { %v1831_v24 = vmul.f32 %v3126_v16, %v3124_v62  ;;  %v4607_v62 = vld [vmem:[#allocation11 + $0xe8] ss:$16 sps:$4 sm:$0xff]   ;;  %v4610_v16 = vld [vmem:[#allocation11 + $0x104] ss:$16 sps:$4 sm:$0xff]  }
 0x576   :  { %5143 = vst [vmem:[#allocation36_spill] sm:$0xff] %v4607_v62  ;;  %5144 = vst [vmem:[#allocation33_spill] sm:$0xff] %v4610_v16 }
 0x577   :  { %v3128_v9 = vpop.eup %3127  ;;  %v4463_v32 = vsel %vm1866_vm10, %v1831_v24, %v4363_v44  ;;  %v2049_v24 = vunpack.c.l.bf16 %v2047_v37 }
 0x578   :  { %v3130_v30 = vpop.eup %3129  ;;  %v1835_v38 = vadd.f32 1.0, %v3128_v9  ;;  %1877 = vst [vmem:[#allocation12 + $0x20] sm:$0xff] %v4463_v32  ;;  %v1880_v46 = vpack.c.bf16 %v4463_v32, %v4463_v32  ;;  %v4568_v9 = vld [vmem:[#allocation11 + $0x80] ss:$16 sps:$4 sm:$0xff]  }
 0x579   :  { %v1841_v39 = vadd.f32 1.0, %v3130_v30  ;;  %v3132_v44 = vpop.eup %3131  ;;  %v2050_v30 = vunpack.c.h.bf16 %v2047_v37 }
 0x57a   :  { %3135 = vrcp.f32 %v1835_v38  ;;  %1914 = vmatmul.mubr.bf16.vlgmr.msra.gmra.mrb[40].mxu0 %v1880_v46  ;;  %1955 = vmatmul.mubr.bf16.vlgmr.msra.gmra.mrb[40].mxu1 %v1880_v46  ;;  %v2053_v38 = vadd.f32 %v2049_v24, %v5140_v26  ;;  %v2048_v46 = vld [vmem:[#allocation6 + $0x58] sm:$0xff] }
 0x57b   :  { %3137 = vrcp.f32 %v1841_v39  ;;  %1965 = vmatpush1.bf16.msra.mxu0 %v4208_v35  ;;  %2006 = vmatpush1.bf16.msra.mxu1 %v4211_v2  ;;  %v3134_v35 = vpop.eup %3133  ;;  %v5146_v39 = vld [vmem:[#allocation46_spill] sm:$0xff]  ;;  %v2051_v24 = vunpack.c.l.bf16 %v2048_v46 }
 0x57c   :  { %1966 = vmatprep.subr.bf16.mxu0 %v4214_v53  ;;  %2007 = vmatprep.subr.bf16.mxu1 %v4217_v11 }
 0x57d   :  { %1996 = vmatprep.mubr.bf16.mxu0 %v5032_v49  ;;  %2037 = vmatprep.mubr.bf16.mxu1 %v5032_v49 }
 0x57f   :  { %1967 = vmatpush1.bf16.msra.mxu0 %v4222_v40  ;;  %2008 = vmatpush1.bf16.msra.mxu1 %v4225_v34  ;;  %v1848_v40 = vadd.f32 1.0, %v3132_v44  ;;  %v2054_v44 = vadd.f32 %v2050_v30, %v5146_v39  ;;  %v2055_v30 = vadd.f32 %v2051_v24, %v5062_v36 }
 0x580   :  { %1968 = vmatprep.subr.bf16.mxu0 %v4228_v47  ;;  %2009 = vmatprep.subr.bf16.mxu1 %v4231_v41  ;;  %v1872_v47 = vpop.permute.xlu1 %1871 }
 0x581   :  { %vm1873_vm11 = vcmp.eq.s32.totalorder %v1872_v47, 1  ;;  %3139 = vrcp.f32 %v1848_v40 }
 0x583   :  { %1969 = vmatpush1.bf16.msra.mxu0 %v4234_v42  ;;  %2010 = vmatpush1.bf16.msra.mxu1 %v4237_v50 }
 0x584   :  { %v3136_v2 = vpop.eup %3135  ;;  %1970 = vmatprep.subr.bf16.mxu0 %v5107_v33  ;;  %2011 = vmatprep.subr.bf16.mxu1 %v5108_v3  ;;  %v4512_v33 = vld [vmem:[#allocation11 + $0x4] ss:$16 sps:$4 sm:$0xff]   ;;  %v4515_v3 = vld [vmem:[#allocation11 + $0xc] ss:$16 sps:$4 sm:$0xff]  }
 0x585   :  { %v3138_v53 = vpop.eup %3137  ;;  %v1852_v11 = vmul.f32 %v3136_v2, %v3134_v35 }
 0x586   :  { %v1851_v34 = vmul.f32 %v3138_v53, %v4389_v29  ;;  %v2052_v53 = vunpack.c.h.bf16 %v2048_v46 }
 0x587   :  { %1971 = vmatpush1.bf16.msra.mxu0 %v4247_v56  ;;  %2012 = vmatpush1.bf16.msra.mxu1 %v4250_v4 }
 0x588   :  { %v1853_v41 = vadd.f32 %v1852_v11, %v1851_v34  ;;  %1972 = vmatprep.subr.bf16.mxu0 %v4253_v31  ;;  %2013 = vmatprep.subr.bf16.mxu1 %v5109_v55  ;;  %v4527_v55 = vld [vmem:[#allocation11 + $0x2c] ss:$16 sps:$4 sm:$0xff]   ;;  %v2056_v37 = vadd.f32 %v2052_v53, %v3900_v25 }
 0x58a   :  { %3141 = vtanh.f32 %v1853_v41  ;;  %v4489_v42 = vsel %vm1873_vm11, %v1853_v41, %v4389_v29  ;;  %v4532_v29 = vld [vmem:[#allocation11 + $0x20] ss:$16 sps:$4 sm:$0xff]  }
 0x58b   :  { %1973 = vmatpush1.bf16.msra.mxu0 %v5110_v8  ;;  %2014 = vmatpush1.bf16.msra.mxu1 %v5111_v13  ;;  %v3140_v50 = vpop.eup %3139  ;;  %v4535_v8 = vld [vmem:[#allocation11 + $0x28] ss:$16 sps:$4 sm:$0xff]   ;;  %v4538_v13 = vld [vmem:[#allocation11 + $0x44] ss:$16 sps:$4 sm:$0xff]  }
 0x58c   :  { %1974 = vmatprep.subr.bf16.mxu0 %v5112_v15  ;;  %2015 = vmatprep.subr.bf16.mxu1 %v5113_v14  ;;  %v4541_v15 = vld [vmem:[#allocation11 + $0x4c] ss:$16 sps:$4 sm:$0xff]   ;;  %v4544_v14 = vld [vmem:[#allocation11 + $0x40] ss:$16 sps:$4 sm:$0xff]  }
 0x58f   :  { %1975 = vmatpush1.bf16.msra.mxu0 %v5114_v60  ;;  %2016 = vmatpush1.bf16.msra.mxu1 %v5115_v10  ;;  %v4547_v60 = vld [vmem:[#allocation11 + $0x48] ss:$16 sps:$4 sm:$0xff]   ;;  %v4550_v10 = vld [vmem:[#allocation11 + $0x64] ss:$16 sps:$4 sm:$0xff]  }
 0x590   :  { %1976 = vmatprep.subr.bf16.mxu0 %v5116_v54  ;;  %2017 = vmatprep.subr.bf16.mxu1 %v5117_v45  ;;  %v4553_v54 = vld [vmem:[#allocation11 + $0x6c] ss:$16 sps:$4 sm:$0xff]   ;;  %v4556_v45 = vld [vmem:[#allocation11 + $0x60] ss:$16 sps:$4 sm:$0xff]  }
 0x593   :  { %1977 = vmatpush1.bf16.msra.mxu0 %v4287_v48  ;;  %2018 = vmatpush1.bf16.msra.mxu1 %v5118_v27  ;;  %v4559_v27 = vld [vmem:[#allocation11 + $0x68] ss:$16 sps:$4 sm:$0xff]  }
 0x594   :  { %v3142_v31 = vpop.eup %3141  ;;  %1978 = vmatprep.subr.bf16.mxu0 %v5119_v61  ;;  %2019 = vmatprep.subr.bf16.mxu1 %v4296_v43  ;;  %v4521_v43 = vld [vmem:[#allocation11 + $0x8] ss:$16 sps:$4 sm:$0xff]   ;;  %v4562_v61 = vld [vmem:[#allocation11 + $0x84] ss:$16 sps:$4 sm:$0xff]  }
 0x595   :  { %v1855_v56 = vmul.f32 %v3142_v31, %v3140_v50 }
 0x597   :  { %1979 = vmatpush1.bf16.msra.mxu0 %v4299_v5  ;;  %2020 = vmatpush1.bf16.msra.mxu1 %v4302_v20  ;;  %v4507_v4 = vsel %vm1873_vm11, %v1855_v56, %v4407_v17  ;;  %v4518_v20 = vld [vmem:[#allocation11] ss:$16 sps:$4 sm:$0xff]   ;;  %v4524_v5 = vld [vmem:[#allocation11 + $0x24] ss:$16 sps:$4 sm:$0xff]   ;;  %v4565_v17 = vld [vmem:[#allocation11 + $0x8c] ss:$16 sps:$4 sm:$0xff]  }
 0x598   :  { %1879 = vst [vmem:[#allocation13 + $0x18] sm:$0xff] %v4507_v4  ;;  %v1963_v48 = vpack.c.bf16 %v4507_v4, %v4507_v4  ;;  %2149 = vmatprep.subr.bf16.mxu0 %v4512_v33  ;;  %2190 = vmatprep.subr.bf16.mxu1 %v4515_v3 }
 0x59a   :  { %1997 = vmatmul.mubr.bf16.vlgmr.msra.gmra.mrb[44].mxu0 %v1963_v48  ;;  %2038 = vmatmul.mubr.bf16.vlgmr.msra.gmra.mrb[44].mxu1 %v1963_v48 }
 0x59b   :  { %2150 = vmatpush1.bf16.msra.mxu0 %v4518_v20  ;;  %2191 = vmatpush1.bf16.msra.mxu1 %v4521_v43 }
 0x59c   :  { %2151 = vmatprep.subr.bf16.mxu0 %v4524_v5  ;;  %2192 = vmatprep.subr.bf16.mxu1 %v4527_v55 }
 0x59d   :  { %2181 = vmatprep.mubr.bf16.mxu0 %v5032_v49  ;;  %2222 = vmatprep.mubr.bf16.mxu1 %v5032_v49 }
 0x59f   :  { %2152 = vmatpush1.bf16.msra.mxu0 %v4532_v29  ;;  %2193 = vmatpush1.bf16.msra.mxu1 %v4535_v8 }
 0x5a0   :  { %2153 = vmatprep.subr.bf16.mxu0 %v4538_v13  ;;  %2194 = vmatprep.subr.bf16.mxu1 %v4541_v15 }
 0x5a3   :  { %2154 = vmatpush1.bf16.msra.mxu0 %v4544_v14  ;;  %2195 = vmatpush1.bf16.msra.mxu1 %v4547_v60 }
 0x5a4   :  { %2155 = vmatprep.subr.bf16.mxu0 %v4550_v10  ;;  %2196 = vmatprep.subr.bf16.mxu1 %v4553_v54 }
 0x5a7   :  { %2156 = vmatpush1.bf16.msra.mxu0 %v4556_v45  ;;  %2197 = vmatpush1.bf16.msra.mxu1 %v4559_v27 }
 0x5a8   :  { %2157 = vmatprep.subr.bf16.mxu0 %v4562_v61  ;;  %2198 = vmatprep.subr.bf16.mxu1 %v4565_v17 }
 0x5ab   :  { %2158 = vmatpush1.bf16.msra.mxu0 %v4568_v9  ;;  %2199 = vmatpush1.bf16.msra.mxu1 %v4571_v1 }
 0x5ac   :  { %2159 = vmatprep.subr.bf16.mxu0 %v4574_v7  ;;  %2200 = vmatprep.subr.bf16.mxu1 %v4577_v58 }
 0x5af   :  { %2160 = vmatpush1.bf16.msra.mxu0 %v4580_v63  ;;  %2201 = vmatpush1.bf16.msra.mxu1 %v4583_v18 }
 0x5b0   :  { %2161 = vmatprep.subr.bf16.mxu0 %v4586_v51  ;;  %2202 = vmatprep.subr.bf16.mxu1 %v4589_v59 }
 0x5b3   :  { %2162 = vmatpush1.bf16.msra.mxu0 %v4592_v28  ;;  %2203 = vmatpush1.bf16.msra.mxu1 %v4595_v21 }
 0x5b4   :  { %2163 = vmatprep.subr.bf16.mxu0 %v4598_v0  ;;  %2204 = vmatprep.subr.bf16.mxu1 %v4601_v19 }
 0x5b7   :  { %2164 = vmatpush1.bf16.msra.mxu0 %v4604_v6  ;;  %2205 = vmatpush1.bf16.msra.mxu1 %v4607_v62 }
 0x5b8   :  { %2232 = vmatprep.subr.bf16.mxu0 %v4610_v16  ;;  %2273 = vmatprep.subr.bf16.mxu1 %v4613_v57 }
 0x64d   :  { %v1915_v35 = vpop.f32.mrb[40].mxu0  ;;  %v1956_v2 = vpop.f32.mrb[40].mxu1 }
 0x64e   :  { %v2057_v11 = vadd.f32 %v2053_v38, %v1915_v35  ;;  %v1917_v40 = vpop.f32.mrb[41].mxu0  ;;  %v1958_v34 = vpop.f32.mrb[41].mxu1  ;;  %v2059_v16 = vadd.f32 %v2055_v30, %v1956_v2  ;;  %v2063_v2 = vld [vmem:[#allocation9 + $0x28] sm:$0xff] }
 0x64f   :  { %v2058_v47 = vadd.f32 %v2054_v44, %v1917_v40  ;;  %v1919_v41 = vpop.f32.mrb[42].mxu0  ;;  %v1960_v50 = vpop.f32.mrb[42].mxu1  ;;  %v2060_v26 = vadd.f32 %v2056_v37, %v1958_v34  ;;  %v2067_v24 = vunpack.c.h.bf16 %v2063_v2 }
 0x650   :  { %v2839_v31 = vmul.f32 -1.442695, %v2057_v11  ;;  %v1920_v56 = vpop.f32.mrb[43].mxu0  ;;  %v1961_v48 = vpop.f32.mrb[43].mxu1  ;;  %v2062_v11 = vld [vmem:[#allocation9 + $0x20] sm:$0xff] }
 0x651   :  { %v2840_v57 = vmul.f32 -1.442695, %v2058_v47  ;;  %v2841_v39 = vmul.f32 -1.442695, %v2060_v26  ;;  %v2064_v40 = vunpack.c.l.bf16 %v2062_v11  ;;  %v2065_v53 = vunpack.c.h.bf16 %v2062_v11  ;;  %v5147_v56 = vld [vmem:[#allocation48_spill] sm:$0xff] }
 0x652   :  { %3143 = vpow2.f32 %v2839_v31 }
 0x653   :  { %3145 = vpow2.f32 %v2840_v57  ;;  %v2068_v26 = vadd.f32 %v2064_v40, %v3910_v12 }
 0x654   :  { %3147 = vpow2.f32 %v2841_v39  ;;  %v2069_v39 = vadd.f32 %v2065_v53, %v5147_v56 }
 0x655   :  { %3149 = vtanh.f32 %v2059_v16  ;;  %v2133_v16 = vpop.permute.xlu0 %2132 }
 0x656   :  { %vm2134_vm12 = vcmp.eq.s32.totalorder %v2133_v16, 1  ;;  %v4645_v16 = vld [vmem:[#allocation11 + $0x12c] ss:$16 sps:$4 sm:$0xff]  }
 0x65c   :  { %v3144_v38 = vpop.eup %3143 }
 0x65d   :  { %v3146_v35 = vpop.eup %3145  ;;  %v2079_v62 = vadd.f32 1.0, %v3144_v38 }
 0x65e   :  { %v2085_v44 = vadd.f32 1.0, %v3146_v35  ;;  %v3148_v47 = vpop.eup %3147 }
 0x65f   :  { %3151 = vrcp.f32 %v2079_v62  ;;  %v3150_v41 = vpop.eup %3149  ;;  %v2092_v50 = vadd.f32 1.0, %v3148_v47 }
 0x660   :  { %3153 = vrcp.f32 %v2085_v44 }
 0x661   :  { %3155 = vrcp.f32 %v2092_v50 }
 0x669   :  { %v3152_v46 = vpop.eup %3151 }
 0x66a   :  { %v3154_v57 = vpop.eup %3153  ;;  %v2096_v34 = vmul.f32 %v3152_v46, %v3150_v41 }
 0x66b   :  { %v2095_v31 = vmul.f32 %v3154_v57, %v4457_v22 }
 0x66d   :  { %v2097_v48 = vadd.f32 %v2096_v34, %v2095_v31  ;;  %v1998_v62 = vpop.f32.mrb[44].mxu0  ;;  %v2039_v37 = vpop.f32.mrb[44].mxu1  ;;  %v2071_v34 = vadd.f32 %v2067_v24, %v3916_v23  ;;  %v2066_v31 = vunpack.c.l.bf16 %v2063_v2 }
 0x66e   :  { %v2072_v30 = vadd.f32 %v2068_v26, %v1998_v62  ;;  %v2000_v38 = vpop.f32.mrb[45].mxu0  ;;  %v2041_v35 = vpop.f32.mrb[45].mxu1 }
 0x66f   :  { %3157 = vtanh.f32 %v2097_v48  ;;  %v2073_v44 = vadd.f32 %v2069_v39, %v2000_v38  ;;  %v2002_v11 = vpop.f32.mrb[46].mxu0  ;;  %v2043_v47 = vpop.f32.mrb[46].mxu1  ;;  %v4625_v40 = vsel %vm2134_vm12, %v2097_v48, %v4457_v22  ;;  %v2075_v50 = vadd.f32 %v2071_v34, %v2041_v35  ;;  %v4650_v35 = vld [vmem:[#allocation11 + $0x120] ss:$16 sps:$4 sm:$0xff]  }
 0x670   :  { %v2842_v41 = vmul.f32 -1.442695, %v2072_v30  ;;  %v2003_v53 = vpop.f32.mrb[47].mxu0  ;;  %v2044_v46 = vpop.f32.mrb[47].mxu1  ;;  %v2070_v26 = vadd.f32 %v2066_v31, %v3922_v52  ;;  %v4662_v34 = vld [vmem:[#allocation11 + $0x140] ss:$16 sps:$4 sm:$0xff]  }
 0x671   :  { %v2843_v57 = vmul.f32 -1.442695, %v2073_v44  ;;  %v3156_v62 = vpop.eup %3155  ;;  %v2844_v38 = vmul.f32 -1.442695, %v2075_v50  ;;  %v4653_v44 = vld [vmem:[#allocation11 + $0x128] ss:$16 sps:$4 sm:$0xff]  }
 0x672   :  { %3159 = vpow2.f32 %v2842_v41  ;;  %v2074_v11 = vadd.f32 %v2070_v26, %v2039_v37  ;;  %v4636_v37 = vld [vmem:[#allocation11 + $0x100] ss:$16 sps:$4 sm:$0xff]   ;;  %v4656_v41 = vld [vmem:[#allocation11 + $0x144] ss:$16 sps:$4 sm:$0xff]   ;;  %v4659_v53 = vld [vmem:[#allocation11 + $0x14c] ss:$16 sps:$4 sm:$0xff]  }
 0x673   :  { %3161 = vpow2.f32 %v2843_v57  ;;  %v4665_v31 = vld [vmem:[#allocation11 + $0x148] ss:$16 sps:$4 sm:$0xff]   ;;  %v4668_v26 = vld [vmem:[#allocation11 + $0x164] ss:$16 sps:$4 sm:$0xff]  }
 0x674   :  { %3163 = vpow2.f32 %v2844_v38  ;;  %5148 = vst [vmem:[#allocation34_spill] sm:$0xff] %v4668_v26 }
 0x675   :  { %3165 = vtanh.f32 %v2074_v11 }
 0x679   :  { %v3158_v39 = vpop.eup %3157 }
 0x67a   :  { %v2099_v47 = vmul.f32 %v3158_v39, %v3156_v62  ;;  %v4671_v62 = vld [vmem:[#allocation11 + $0x16c] ss:$16 sps:$4 sm:$0xff]  }
 0x67b   :  { %5149 = vst [vmem:[#allocation38_spill] sm:$0xff] %v4671_v62 }
 0x67c   :  { %v3160_v56 = vpop.eup %3159  ;;  %v4631_v22 = vsel %vm2134_vm12, %v2099_v47, %v4463_v32  ;;  %v4639_v32 = vld [vmem:[#allocation11 + $0x108] ss:$16 sps:$4 sm:$0xff]  }
 0x67d   :  { %v3162_v48 = vpop.eup %3161  ;;  %v2103_v30 = vadd.f32 1.0, %v3160_v56  ;;  %2145 = vst [vmem:[#allocation12 + $0x28] sm:$0xff] %v4631_v22  ;;  %v2148_v2 = vpack.c.bf16 %v4631_v22, %v4631_v22  ;;  %v4642_v56 = vld [vmem:[#allocation11 + $0x124] ss:$16 sps:$4 sm:$0xff]  }
 0x67e   :  { %v2109_v24 = vadd.f32 1.0, %v3162_v48  ;;  %v3164_v46 = vpop.eup %3163  ;;  %v4675_v48 = vld [vmem:[#allocation11 + $0x160] ss:$16 sps:$4 sm:$0xff]  }
 0x67f   :  { %3167 = vrcp.f32 %v2103_v30  ;;  %2182 = vmatmul.mubr.bf16.vlgmr.msra.gmra.mrb[48].mxu0 %v2148_v2  ;;  %2223 = vmatmul.mubr.bf16.vlgmr.msra.gmra.mrb[48].mxu1 %v2148_v2  ;;  %v3166_v57 = vpop.eup %3165  ;;  %v2116_v11 = vadd.f32 1.0, %v3164_v46  ;;  %v4678_v30 = vld [vmem:[#allocation11 + $0x168] ss:$16 sps:$4 sm:$0xff]   ;;  %v2140_v2 = vpop.permute.xlu1 %2139 }
 0x680   :  { %3169 = vrcp.f32 %v2109_v24  ;;  %2233 = vmatpush1.bf16.msra.mxu0 %v4636_v37  ;;  %2274 = vmatpush1.bf16.msra.mxu1 %v4639_v32  ;;  %vm2141_vm13 = vcmp.eq.s32.totalorder %v2140_v2, 1 }
 0x681   :  { %2234 = vmatprep.subr.bf16.mxu0 %v4642_v56  ;;  %2275 = vmatprep.subr.bf16.mxu1 %v4645_v16  ;;  %3171 = vrcp.f32 %v2116_v11  ;;  %v4703_v11 = vld [vmem:[#allocation11 + $0x1a0] ss:$16 sps:$4 sm:$0xff]  }
 0x682   :  { %2264 = vmatprep.mubr.bf16.mxu0 %v5032_v49  ;;  %2305 = vmatprep.mubr.bf16.mxu1 %v5032_v49  ;;  %5155 = vst [vmem:[#allocation52_spill] sm:$0xff] %v4703_v11 }
 0x684   :  { %2235 = vmatpush1.bf16.msra.mxu0 %v4650_v35  ;;  %2276 = vmatpush1.bf16.msra.mxu1 %v4653_v44 }
 0x685   :  { %2236 = vmatprep.subr.bf16.mxu0 %v4656_v41  ;;  %2277 = vmatprep.subr.bf16.mxu1 %v4659_v53 }
 0x688   :  { %2237 = vmatpush1.bf16.msra.mxu0 %v4662_v34  ;;  %2278 = vmatpush1.bf16.msra.mxu1 %v4665_v31 }
 0x689   :  { %v3168_v50 = vpop.eup %3167  ;;  %2238 = vmatprep.subr.bf16.mxu0 %v4668_v26  ;;  %2279 = vmatprep.subr.bf16.mxu1 %v4671_v62  ;;  %v4681_v26 = vld [vmem:[#allocation11 + $0x184] ss:$16 sps:$4 sm:$0xff]   ;;  %v4684_v62 = vld [vmem:[#allocation11 + $0x18c] ss:$16 sps:$4 sm:$0xff]  }
 0x68a   :  { %v3170_v39 = vpop.eup %3169  ;;  %v2120_v38 = vmul.f32 %v3168_v50, %v3166_v57  ;;  %5150 = vst [vmem:[#allocation47_spill] sm:$0xff] %v4684_v62  ;;  %v4691_v57 = vld [vmem:[#allocation11 + $0x180] ss:$16 sps:$4 sm:$0xff]   ;;  %v4694_v50 = vld [vmem:[#allocation11 + $0x188] ss:$16 sps:$4 sm:$0xff]  }
 0x68b   :  { %v2119_v47 = vmul.f32 %v3170_v39, %v4489_v42  ;;  %5151 = vst [vmem:[#allocation41_spill] sm:$0xff] %v4691_v57  ;;  %5152 = vst [vmem:[#allocation49_spill] sm:$0xff] %v4694_v50  ;;  %v4697_v39 = vld [vmem:[#allocation11 + $0x1a4] ss:$16 sps:$4 sm:$0xff]  }
 0x68c   :  { %2239 = vmatpush1.bf16.msra.mxu0 %v4675_v48  ;;  %2280 = vmatpush1.bf16.msra.mxu1 %v4678_v30  ;;  %5153 = vst [vmem:[#allocation50_spill] sm:$0xff] %v4697_v39 }
 0x68d   :  { %v2121_v24 = vadd.f32 %v2120_v38, %v2119_v47  ;;  %2240 = vmatprep.subr.bf16.mxu0 %v4681_v26  ;;  %2281 = vmatprep.subr.bf16.mxu1 %v4684_v62  ;;  %v4700_v38 = vld [vmem:[#allocation11 + $0x1ac] ss:$16 sps:$4 sm:$0xff]   ;;  %v4709_v47 = vld [vmem:[#allocation11 + $0x1c4] ss:$16 sps:$4 sm:$0xff]   ;;  %v4730_v62 = vld [vmem:[#allocation11 + $0x1e8] ss:$16 sps:$4 sm:$0xff]  }
 0x68e   :  { %5154 = vst [vmem:[#allocation51_spill] sm:$0xff] %v4700_v38  ;;  %5157 = vst [vmem:[#allocation54_spill] sm:$0xff] %v4709_v47 }
 0x68f   :  { %3173 = vtanh.f32 %v2121_v24  ;;  %v4689_v46 = vsel %vm2141_vm13, %v2121_v24, %v4489_v42  ;;  %v4706_v42 = vld [vmem:[#allocation11 + $0x1a8] ss:$16 sps:$4 sm:$0xff]   ;;  %v4712_v24 = vld [vmem:[#allocation11 + $0x1cc] ss:$16 sps:$4 sm:$0xff]  }
 0x690   :  { %2241 = vmatpush1.bf16.msra.mxu0 %v4691_v57  ;;  %2282 = vmatpush1.bf16.msra.mxu1 %v4694_v50  ;;  %5156 = vst [vmem:[#allocation53_spill] sm:$0xff] %v4706_v42  ;;  %5158 = vst [vmem:[#allocation39_spill] sm:$0xff] %v4712_v24  ;;  %v4715_v50 = vld [vmem:[#allocation11 + $0x1c0] ss:$16 sps:$4 sm:$0xff]   ;;  %v4721_v57 = vld [vmem:[#allocation11 + $0x1e4] ss:$16 sps:$4 sm:$0xff]  }
 0x691   :  { %2242 = vmatprep.subr.bf16.mxu0 %v4697_v39  ;;  %2283 = vmatprep.subr.bf16.mxu1 %v4700_v38  ;;  %v3172_v39 = vpop.eup %3171  ;;  %v4718_v38 = vld [vmem:[#allocation11 + $0x1c8] ss:$16 sps:$4 sm:$0xff]   ;;  %5160 = vst [vmem:[#allocation44_spill] sm:$0xff] %v4721_v57 }
 0x692   :  { %5159 = vst [vmem:[#allocation40_spill] sm:$0xff] %v4718_v38 }
 0x694   :  { %2243 = vmatpush1.bf16.msra.mxu0 %v4703_v11  ;;  %2284 = vmatpush1.bf16.msra.mxu1 %v4706_v42  ;;  %v4724_v42 = vld [vmem:[#allocation11 + $0x1ec] ss:$16 sps:$4 sm:$0xff]  }
 0x695   :  { %2244 = vmatprep.subr.bf16.mxu0 %v4709_v47  ;;  %2285 = vmatprep.subr.bf16.mxu1 %v4712_v24  ;;  %v4727_v24 = vld [vmem:[#allocation11 + $0x1e0] ss:$16 sps:$4 sm:$0xff]  }
 0x698   :  { %2245 = vmatpush1.bf16.msra.mxu0 %v4715_v50  ;;  %2286 = vmatpush1.bf16.msra.mxu1 %v4718_v38 }
 0x699   :  { %v3174_v11 = vpop.eup %3173  ;;  %2246 = vmatprep.subr.bf16.mxu0 %v4721_v57  ;;  %2287 = vmatprep.subr.bf16.mxu1 %v4724_v42 }
 0x69a   :  { %v2123_v47 = vmul.f32 %v3174_v11, %v3172_v39  ;;  %v2330_v39 = vld [vmem:[#allocation9 + $0x10] sm:$0xff] }
 0x69b   :  { %v2332_v11 = vunpack.c.l.bf16 %v2330_v39 }
 0x69c   :  { %2247 = vmatpush1.bf16.msra.mxu0 %v4727_v24  ;;  %2288 = vmatpush1.bf16.msra.mxu1 %v4730_v62  ;;  %v4735_v38 = vsel %vm2141_vm13, %v2123_v47, %v4507_v4  ;;  %v5161_v4 = vld [vmem:[#allocation36_spill] sm:$0xff] }
 0x69d   :  { %2147 = vst [vmem:[#allocation13 + $0x10] sm:$0xff] %v4735_v38  ;;  %v2231_v57 = vpack.c.bf16 %v4735_v38, %v4735_v38  ;;  %2417 = vmatprep.subr.bf16.mxu0 %v4512_v33  ;;  %2458 = vmatprep.subr.bf16.mxu1 %v4515_v3  ;;  %v5162_v33 = vld [vmem:[#allocation33_spill] sm:$0xff] }
 0x69e   :  { %v5163_v3 = vld [vmem:[#allocation37_spill] sm:$0xff] }
 0x69f   :  { %2265 = vmatmul.mubr.bf16.vlgmr.msra.gmra.mrb[52].mxu0 %v2231_v57  ;;  %2306 = vmatmul.mubr.bf16.vlgmr.msra.gmra.mrb[52].mxu1 %v2231_v57 }
 0x6a0   :  { %2418 = vmatpush1.bf16.msra.mxu0 %v4518_v20  ;;  %2459 = vmatpush1.bf16.msra.mxu1 %v4521_v43  ;;  %v2315_v20 = vld [vmem:[#allocation6 + $0x60] sm:$0xff] }
 0x6a1   :  { %2419 = vmatprep.subr.bf16.mxu0 %v4524_v5  ;;  %2460 = vmatprep.subr.bf16.mxu1 %v4527_v55  ;;  %v2317_v43 = vunpack.c.l.bf16 %v2315_v20  ;;  %v2318_v5 = vunpack.c.h.bf16 %v2315_v20  ;;  %v5164_v55 = vld [vmem:[#allocation45_spill] sm:$0xff] }
 0x6a2   :  { %2449 = vmatprep.mubr.bf16.mxu0 %v5032_v49  ;;  %2490 = vmatprep.mubr.bf16.mxu1 %v5032_v49 }
 0x6a4   :  { %2420 = vmatpush1.bf16.msra.mxu0 %v4532_v29  ;;  %2461 = vmatpush1.bf16.msra.mxu1 %v4535_v8  ;;  %v2321_v29 = vadd.f32 %v2317_v43, %v5164_v55  ;;  %v2316_v8 = vld [vmem:[#allocation6 + $0x68] sm:$0xff] }
 0x6a5   :  { %2421 = vmatprep.subr.bf16.mxu0 %v4538_v13  ;;  %2462 = vmatprep.subr.bf16.mxu1 %v4541_v15  ;;  %v5165_v13 = vld [vmem:[#allocation46_spill] sm:$0xff] }
 0x6a6   :  { %v2322_v15 = vadd.f32 %v2318_v5, %v5165_v13 }
 0x6a8   :  { %2422 = vmatpush1.bf16.msra.mxu0 %v4544_v14  ;;  %2463 = vmatpush1.bf16.msra.mxu1 %v4547_v60 }
 0x6a9   :  { %2423 = vmatprep.subr.bf16.mxu0 %v4550_v10  ;;  %2464 = vmatprep.subr.bf16.mxu1 %v4553_v54  ;;  %v2320_v10 = vunpack.c.h.bf16 %v2316_v8 }
 0x6ac   :  { %2424 = vmatpush1.bf16.msra.mxu0 %v4556_v45  ;;  %2465 = vmatpush1.bf16.msra.mxu1 %v4559_v27 }
 0x6ad   :  { %2425 = vmatprep.subr.bf16.mxu0 %v4562_v61  ;;  %2466 = vmatprep.subr.bf16.mxu1 %v4565_v17 }
 0x6b0   :  { %2426 = vmatpush1.bf16.msra.mxu0 %v4568_v9  ;;  %2467 = vmatpush1.bf16.msra.mxu1 %v4571_v1 }
 0x6b1   :  { %2427 = vmatprep.subr.bf16.mxu0 %v4574_v7  ;;  %2468 = vmatprep.subr.bf16.mxu1 %v4577_v58 }
 0x6b4   :  { %2428 = vmatpush1.bf16.msra.mxu0 %v4580_v63  ;;  %2469 = vmatpush1.bf16.msra.mxu1 %v4583_v18  ;;  %v2324_v18 = vadd.f32 %v2320_v10, %v3900_v25  ;;  %v2401_v10 = vpop.permute.xlu0 %2400 }
 0x6b5   :  { %2429 = vmatprep.subr.bf16.mxu0 %v4586_v51  ;;  %2470 = vmatprep.subr.bf16.mxu1 %v4589_v59  ;;  %v2319_v51 = vunpack.c.l.bf16 %v2316_v8  ;;  %v2331_v8 = vld [vmem:[#allocation9 + $0x18] sm:$0xff]  ;;  %vm2402_vm14 = vcmp.eq.s32.totalorder %v2401_v10, 1 }
 0x6b6   :  { %v5176_v10 = vld [vmem:[#allocation54_spill] sm:$0xff] }
 0x6b8   :  { %2430 = vmatpush1.bf16.msra.mxu0 %v4592_v28  ;;  %2471 = vmatpush1.bf16.msra.mxu1 %v4595_v21  ;;  %v2323_v28 = vadd.f32 %v2319_v51, %v5062_v36 }
 0x6b9   :  { %2431 = vmatprep.subr.bf16.mxu0 %v4598_v0  ;;  %2472 = vmatprep.subr.bf16.mxu1 %v4601_v19 }
 0x6bc   :  { %2432 = vmatpush1.bf16.msra.mxu0 %v4604_v6  ;;  %2473 = vmatpush1.bf16.msra.mxu1 %v5161_v4  ;;  %v2333_v4 = vunpack.c.h.bf16 %v2330_v39 }
 0x6bd   :  { %2500 = vmatprep.subr.bf16.mxu0 %v5162_v33  ;;  %2541 = vmatprep.subr.bf16.mxu1 %v5163_v3 }
 0x752   :  { %v2183_v14 = vpop.f32.mrb[48].mxu0  ;;  %v2224_v60 = vpop.f32.mrb[48].mxu1 }
 0x753   :  { %v2325_v54 = vadd.f32 %v2321_v29, %v2183_v14  ;;  %v2185_v45 = vpop.f32.mrb[49].mxu0  ;;  %v2226_v27 = vpop.f32.mrb[49].mxu1  ;;  %v2327_v0 = vadd.f32 %v2323_v28, %v2224_v60  ;;  %v2336_v29 = vadd.f32 %v2332_v11, %v3910_v12  ;;  %v5166_v14 = vld [vmem:[#allocation48_spill] sm:$0xff] }
 0x754   :  { %v2326_v61 = vadd.f32 %v2322_v15, %v2185_v45  ;;  %v2187_v17 = vpop.f32.mrb[50].mxu0  ;;  %v2228_v9 = vpop.f32.mrb[50].mxu1  ;;  %v2328_v59 = vadd.f32 %v2324_v18, %v2226_v27  ;;  %v2337_v60 = vadd.f32 %v2333_v4, %v5166_v14 }
 0x755   :  { %v2847_v1 = vmul.f32 -1.442695, %v2325_v54  ;;  %v2188_v7 = vpop.f32.mrb[51].mxu0  ;;  %v2229_v58 = vpop.f32.mrb[51].mxu1 }
 0x756   :  { %v2848_v63 = vmul.f32 -1.442695, %v2326_v61  ;;  %v2849_v21 = vmul.f32 -1.442695, %v2328_v59  ;;  %v2335_v61 = vunpack.c.h.bf16 %v2331_v8 }
 0x757   :  { %3175 = vpow2.f32 %v2847_v1 }
 0x758   :  { %3177 = vpow2.f32 %v2848_v63 }
 0x759   :  { %3179 = vpow2.f32 %v2849_v21 }
 0x75a   :  { %3181 = vtanh.f32 %v2327_v0  ;;  %v2339_v0 = vadd.f32 %v2335_v61, %v3916_v23  ;;  %v5179_v61 = vld [vmem:[#allocation44_spill] sm:$0xff] }
 0x761   :  { %v3176_v19 = vpop.eup %3175 }
 0x762   :  { %v3178_v6 = vpop.eup %3177  ;;  %v2347_v2 = vadd.f32 1.0, %v3176_v19  ;;  %v2334_v19 = vunpack.c.l.bf16 %v2331_v8  ;;  %v5170_v8 = vld [vmem:[#allocation41_spill] sm:$0xff] }
 0x763   :  { %v2353_v57 = vadd.f32 1.0, %v3178_v6  ;;  %v3180_v47 = vpop.eup %3179 }
 0x764   :  { %3183 = vrcp.f32 %v2347_v2  ;;  %v3182_v33 = vpop.eup %3181  ;;  %v2360_v5 = vadd.f32 1.0, %v3180_v47  ;;  %v2338_v2 = vadd.f32 %v2334_v19, %v3922_v52 }
 0x765   :  { %3185 = vrcp.f32 %v2353_v57 }
 0x766   :  { %3187 = vrcp.f32 %v2360_v5 }
 0x76e   :  { %v3184_v3 = vpop.eup %3183 }
 0x76f   :  { %v3186_v20 = vpop.eup %3185  ;;  %v2364_v43 = vmul.f32 %v3184_v3, %v3182_v33 }
 0x770   :  { %v2363_v15 = vmul.f32 %v3186_v20, %v4625_v40  ;;  %v3188_v57 = vpop.eup %3187 }
 0x772   :  { %v2365_v54 = vadd.f32 %v2364_v43, %v2363_v15  ;;  %v2266_v45 = vpop.f32.mrb[52].mxu0  ;;  %v2307_v27 = vpop.f32.mrb[52].mxu1  ;;  %v5171_v15 = vld [vmem:[#allocation49_spill] sm:$0xff] }
 0x773   :  { %v2340_v17 = vadd.f32 %v2336_v29, %v2266_v45  ;;  %v2268_v9 = vpop.f32.mrb[53].mxu0  ;;  %v2309_v1 = vpop.f32.mrb[53].mxu1  ;;  %v2342_v47 = vadd.f32 %v2338_v2, %v2307_v27 }
 0x774   :  { %3189 = vtanh.f32 %v2365_v54  ;;  %v2341_v7 = vadd.f32 %v2337_v60, %v2268_v9  ;;  %v2270_v58 = vpop.f32.mrb[54].mxu0  ;;  %v2311_v63 = vpop.f32.mrb[54].mxu1  ;;  %v4785_v18 = vsel %vm2402_vm14, %v2365_v54, %v4625_v40  ;;  %v2343_v6 = vadd.f32 %v2339_v0, %v2309_v1  ;;  %v5174_v60 = vld [vmem:[#allocation52_spill] sm:$0xff]  ;;  %v5177_v54 = vld [vmem:[#allocation39_spill] sm:$0xff]  ;;  %v2583_v1 = vld [vmem:[#allocation6 + $0x70] sm:$0xff] }
 0x775   :  { %v2850_v51 = vmul.f32 -1.442695, %v2340_v17  ;;  %v2271_v59 = vpop.f32.mrb[55].mxu0  ;;  %v2312_v28 = vpop.f32.mrb[55].mxu1  ;;  %v2586_v58 = vunpack.c.h.bf16 %v2583_v1  ;;  %v2584_v63 = vld [vmem:[#allocation6 + $0x78] sm:$0xff] }
 0x776   :  { %v2851_v21 = vmul.f32 -1.442695, %v2341_v7  ;;  %v2852_v11 = vmul.f32 -1.442695, %v2343_v6  ;;  %v2585_v7 = vunpack.c.l.bf16 %v2583_v1  ;;  %v2588_v59 = vunpack.c.h.bf16 %v2584_v63 }
 0x777   :  { %3191 = vpow2.f32 %v2850_v51 }
 0x778   :  { %3193 = vpow2.f32 %v2851_v21 }
 0x779   :  { %3195 = vpow2.f32 %v2852_v11 }
 0x77a   :  { %3197 = vtanh.f32 %v2342_v47  ;;  %v2592_v47 = vadd.f32 %v2588_v59, %v3900_v25 }
 0x77e   :  { %v3190_v39 = vpop.eup %3189 }
 0x77f   :  { %v2367_v4 = vmul.f32 %v3190_v39, %v3188_v57 }
 0x781   :  { %v3192_v33 = vpop.eup %3191  ;;  %v4791_v40 = vsel %vm2402_vm14, %v2367_v4, %v4631_v22 }
 0x782   :  { %v3194_v3 = vpop.eup %3193  ;;  %v2371_v20 = vadd.f32 1.0, %v3192_v33  ;;  %2413 = vst [vmem:[#allocation12 + $0x30] sm:$0xff] %v4791_v40  ;;  %v2416_v43 = vpack.c.bf16 %v4791_v40, %v4791_v40 }
 0x783   :  { %v2377_v5 = vadd.f32 1.0, %v3194_v3  ;;  %v3196_v22 = vpop.eup %3195 }
 0x784   :  { %3199 = vrcp.f32 %v2371_v20  ;;  %2450 = vmatmul.mubr.bf16.vlgmr.msra.gmra.mrb[56].mxu0 %v2416_v43  ;;  %2491 = vmatmul.mubr.bf16.vlgmr.msra.gmra.mrb[56].mxu1 %v2416_v43 }
 0x785   :  { %3201 = vrcp.f32 %v2377_v5  ;;  %2501 = vmatpush1.bf16.msra.mxu0 %v4636_v37  ;;  %2542 = vmatpush1.bf16.msra.mxu1 %v4639_v32  ;;  %v3198_v37 = vpop.eup %3197 }
 0x786   :  { %2502 = vmatprep.subr.bf16.mxu0 %v4642_v56  ;;  %2543 = vmatprep.subr.bf16.mxu1 %v4645_v16  ;;  %v5167_v56 = vld [vmem:[#allocation34_spill] sm:$0xff] }
 0x787   :  { %2532 = vmatprep.mubr.bf16.mxu0 %v5032_v49  ;;  %2573 = vmatprep.mubr.bf16.mxu1 %v5032_v49  ;;  %v5168_v16 = vld [vmem:[#allocation38_spill] sm:$0xff] }
 0x789   :  { %2503 = vmatpush1.bf16.msra.mxu0 %v4650_v35  ;;  %2544 = vmatpush1.bf16.msra.mxu1 %v4653_v44  ;;  %v2384_v35 = vadd.f32 1.0, %v3196_v22 }
 0x78a   :  { %2504 = vmatprep.subr.bf16.mxu0 %v4656_v41  ;;  %2545 = vmatprep.subr.bf16.mxu1 %v4659_v53  ;;  %v2408_v41 = vpop.permute.xlu1 %2407 }
 0x78b   :  { %vm2409_vm15 = vcmp.eq.s32.totalorder %v2408_v41, 1  ;;  %3203 = vrcp.f32 %v2384_v35  ;;  %v2598_v41 = vld [vmem:[#allocation9 + $0x8] sm:$0xff] }
 0x78d   :  { %2505 = vmatpush1.bf16.msra.mxu0 %v4662_v34  ;;  %2546 = vmatpush1.bf16.msra.mxu1 %v4665_v31  ;;  %v5169_v34 = vld [vmem:[#allocation47_spill] sm:$0xff] }
 0x78e   :  { %v3200_v32 = vpop.eup %3199  ;;  %2506 = vmatprep.subr.bf16.mxu0 %v5167_v56  ;;  %2547 = vmatprep.subr.bf16.mxu1 %v5168_v16 }
 0x78f   :  { %v3202_v49 = vpop.eup %3201  ;;  %v2388_v29 = vmul.f32 %v3200_v32, %v3198_v37  ;;  %v2597_v37 = vld [vmem:[#allocation9] sm:$0xff] }
 0x790   :  { %v2387_v44 = vmul.f32 %v3202_v49, %v4689_v46  ;;  %v2599_v32 = vunpack.c.l.bf16 %v2597_v37  ;;  %v2600_v25 = vunpack.c.h.bf16 %v2597_v37 }
 0x791   :  { %2507 = vmatpush1.bf16.msra.mxu0 %v4675_v48  ;;  %2548 = vmatpush1.bf16.msra.mxu1 %v4678_v30  ;;  %v5172_v48 = vld [vmem:[#allocation50_spill] sm:$0xff]  ;;  %v5173_v30 = vld [vmem:[#allocation51_spill] sm:$0xff] }
 0x792   :  { %v2389_v53 = vadd.f32 %v2388_v29, %v2387_v44  ;;  %2508 = vmatprep.subr.bf16.mxu0 %v4681_v26  ;;  %2549 = vmatprep.subr.bf16.mxu1 %v5169_v34  ;;  %v5175_v26 = vld [vmem:[#allocation53_spill] sm:$0xff]  ;;  %v2604_v34 = vadd.f32 %v2600_v25, %v5166_v14  ;;  %v2601_v14 = vunpack.c.l.bf16 %v2598_v41 }
 0x794   :  { %3205 = vtanh.f32 %v2389_v53  ;;  %v4817_v31 = vsel %vm2409_vm15, %v2389_v53, %v4689_v46  ;;  %v5178_v46 = vld [vmem:[#allocation40_spill] sm:$0xff]  ;;  %v2605_v1 = vadd.f32 %v2601_v14, %v3922_v52 }
 0x795   :  { %2509 = vmatpush1.bf16.msra.mxu0 %v5170_v8  ;;  %2550 = vmatpush1.bf16.msra.mxu1 %v5171_v15  ;;  %v3204_v45 = vpop.eup %3203 }
 0x796   :  { %2510 = vmatprep.subr.bf16.mxu0 %v5172_v48  ;;  %2551 = vmatprep.subr.bf16.mxu1 %v5173_v30  ;;  %v2602_v30 = vunpack.c.h.bf16 %v2598_v41 }
 0x799   :  { %2511 = vmatpush1.bf16.msra.mxu0 %v5174_v60  ;;  %2552 = vmatpush1.bf16.msra.mxu1 %v5175_v26 }
 0x79a   :  { %2512 = vmatprep.subr.bf16.mxu0 %v5176_v10  ;;  %2553 = vmatprep.subr.bf16.mxu1 %v5177_v54 }
 0x79d   :  { %2513 = vmatpush1.bf16.msra.mxu0 %v4715_v50  ;;  %2554 = vmatpush1.bf16.msra.mxu1 %v5178_v46 }
 0x79e   :  { %v3206_v27 = vpop.eup %3205  ;;  %2514 = vmatprep.subr.bf16.mxu0 %v5179_v61  ;;  %2555 = vmatprep.subr.bf16.mxu1 %v4724_v42  ;;  %v2589_v42 = vadd.f32 %v2585_v7, %v5164_v55  ;;  %v2587_v55 = vunpack.c.l.bf16 %v2584_v63 }
 0x79f   :  { %v2391_v17 = vmul.f32 %v3206_v27, %v3204_v45 }
 0x7a1   :  { %2515 = vmatpush1.bf16.msra.mxu0 %v4727_v24  ;;  %2556 = vmatpush1.bf16.msra.mxu1 %v4730_v62  ;;  %v4835_v9 = vsel %vm2409_vm15, %v2391_v17, %v4735_v38  ;;  %v2590_v24 = vadd.f32 %v2586_v58, %v5165_v13  ;;  %v2591_v13 = vadd.f32 %v2587_v55, %v5062_v36  ;;  %v2667_v58 = vpop.permute.xlu0 %2666 }
 0x7a2   :  { %2415 = vst [vmem:[#allocation13 + $0x8] sm:$0xff] %v4835_v9  ;;  %v2499_v50 = vpack.c.bf16 %v4835_v9, %v4835_v9  ;;  %v2603_v36 = vadd.f32 %v2599_v32, %v3910_v12  ;;  %vm2668_vm0 = vcmp.eq.s32.totalorder %v2667_v58, 1 }
 0x7a4   :  { %2533 = vmatmul.mubr.bf16.vlgmr.msra.gmra.mrb[60].mxu0 %v2499_v50  ;;  %2574 = vmatmul.mubr.bf16.vlgmr.msra.gmra.mrb[60].mxu1 %v2499_v50 }
 0x857   :  { %v2451_v62 = vpop.f32.mrb[56].mxu0  ;;  %v2492_v51 = vpop.f32.mrb[56].mxu1 }
 0x858   :  { %v2593_v38 = vadd.f32 %v2589_v42, %v2451_v62  ;;  %v2453_v28 = vpop.f32.mrb[57].mxu0  ;;  %v2494_v21 = vpop.f32.mrb[57].mxu1  ;;  %v2595_v3 = vadd.f32 %v2591_v13, %v2492_v51 }
 0x859   :  { %v2594_v0 = vadd.f32 %v2590_v24, %v2453_v28  ;;  %v2455_v19 = vpop.f32.mrb[58].mxu0  ;;  %v2496_v6 = vpop.f32.mrb[58].mxu1  ;;  %v2596_v4 = vadd.f32 %v2592_v47, %v2494_v21 }
 0x85a   :  { %v2855_v2 = vmul.f32 -1.442695, %v2593_v38  ;;  %v2456_v57 = vpop.f32.mrb[59].mxu0  ;;  %v2497_v39 = vpop.f32.mrb[59].mxu1 }
 0x85b   :  { %v2856_v11 = vmul.f32 -1.442695, %v2594_v0  ;;  %v2857_v33 = vmul.f32 -1.442695, %v2596_v4 }
 0x85c   :  { %3207 = vpow2.f32 %v2855_v2 }
 0x85d   :  { %3209 = vpow2.f32 %v2856_v11 }
 0x85e   :  { %3211 = vpow2.f32 %v2857_v33 }
 0x85f   :  { %3213 = vtanh.f32 %v2595_v3 }
 0x866   :  { %v3208_v20 = vpop.eup %3207 }
 0x867   :  { %v3210_v43 = vpop.eup %3209  ;;  %v2614_v5 = vadd.f32 1.0, %v3208_v20 }
 0x868   :  { %v2620_v22 = vadd.f32 1.0, %v3210_v43  ;;  %v3212_v56 = vpop.eup %3211 }
 0x869   :  { %3215 = vrcp.f32 %v2614_v5  ;;  %v3214_v16 = vpop.eup %3213  ;;  %v2627_v44 = vadd.f32 1.0, %v3212_v56 }
 0x86a   :  { %3217 = vrcp.f32 %v2620_v22 }
 0x86b   :  { %3219 = vrcp.f32 %v2627_v44 }
 0x873   :  { %v3216_v49 = vpop.eup %3215 }
 0x874   :  { %v3218_v29 = vpop.eup %3217  ;;  %v2631_v35 = vmul.f32 %v3216_v49, %v3214_v16 }
 0x875   :  { %v2630_v53 = vmul.f32 %v3218_v29, %v4785_v18  ;;  %v2606_v18 = vadd.f32 %v2602_v30, %v3916_v23  ;;  %v3220_v7 = vpop.eup %3219 }
 0x877   :  { %v2632_v8 = vadd.f32 %v2631_v35, %v2630_v53  ;;  %v2534_v15 = vpop.f32.mrb[60].mxu0  ;;  %v2575_v48 = vpop.f32.mrb[60].mxu1 }
 0x878   :  { %v2607_v60 = vadd.f32 %v2603_v36, %v2534_v15  ;;  %v2536_v26 = vpop.f32.mrb[61].mxu0  ;;  %v2577_v10 = vpop.f32.mrb[61].mxu1  ;;  %v2609_v62 = vadd.f32 %v2605_v1, %v2575_v48 }
 0x879   :  { %3221 = vtanh.f32 %v2632_v8  ;;  %v2608_v54 = vadd.f32 %v2604_v34, %v2536_v26  ;;  %v2538_v45 = vpop.f32.mrb[62].mxu0  ;;  %v2579_v46 = vpop.f32.mrb[62].mxu1  ;;  %v2610_v50 = vadd.f32 %v2606_v18, %v2577_v10 }
 0x87a   :  { %v2858_v27 = vmul.f32 -1.442695, %v2607_v60  ;;  %v2539_v61 = vpop.f32.mrb[63].mxu0  ;;  %v2580_v12 = vpop.f32.mrb[63].mxu1 }
 0x87b   :  { %v2859_v17 = vmul.f32 -1.442695, %v2608_v54  ;;  %v2860_v63 = vmul.f32 -1.442695, %v2610_v50 }
 0x87c   :  { %3223 = vpow2.f32 %v2858_v27 }
 0x87d   :  { %3225 = vpow2.f32 %v2859_v17 }
 0x87e   :  { %3227 = vpow2.f32 %v2860_v63 }
 0x87f   :  { %3229 = vtanh.f32 %v2609_v62 }
 0x883   :  { %v3222_v42 = vpop.eup %3221 }
 0x884   :  { %v2634_v24 = vmul.f32 %v3222_v42, %v3220_v7 }
 0x886   :  { %v3224_v51 = vpop.eup %3223  ;;  %v2669_v59 = vsel %vm2668_vm0, %v2634_v24, %v4791_v40 }
 0x887   :  { %v3226_v23 = vpop.eup %3225  ;;  %2679 = vst [vmem:[#allocation12 + $0x38] sm:$0xff] %v2669_v59  ;;  %v2638_v38 = vadd.f32 1.0, %v3224_v51 }
 0x888   :  { %v2644_v28 = vadd.f32 1.0, %v3226_v23 }
 0x889   :  { %3447 = shalt.err (!%p3444_p6)
}
 0x88a   :  { %s3448_s26 = scalar_lea.hbm %s4888_s6, 1024 }
 0x88b   :  { %p3449_p7 = scmp.ne.s32.totalorder %s4888_s6, %s3448_s26  ;;  %p3452_p8 = scmp.lt.u32.totalorder %s3448_s26, %s4888_s6 }
 0x88d   :  { %p3454_p9 = pnand %p3452_p8, %p3449_p7 }
 0x88f   :  { %3457 = shalt.err (!%p3454_p9)
}
 0x890   :  { %s3496_s9 = smov 128   ;;  %s3497_s10 = smov 8   ;;  %3231 = vrcp.f32 %v2638_v38  ;;  %v3228_v52 = vpop.eup %3227  ;;  %v2674_v11 = vpop.permute.xlu1 %2673 }
 0x891   :  { %2696 = dma.vmem_to_hbm [thread:$0]  %s2691_s22, 1024, %s4888_s6, [#allocation8], %s3496_s9, %s3496_s9, %s3497_s10   ;;  %3233 = vrcp.f32 %v2644_v28  ;;  %v3230_v40 = vpop.eup %3229  ;;  %v2651_v6 = vadd.f32 1.0, %v3228_v52  ;;  %vm2675_vm1 = vcmp.eq.s32.totalorder %v2674_v11, 1 }
 0x892   :  { %s3498_s13 = smov [#allocation13]  }
 0x893   :  { %3235 = vrcp.f32 %v2651_v6  ;;  %s2706_s1 = sshll.u32 %s3498_s13, 4  ;;  %s2707_s1 = int_to_ptr.vmem [resolvable:$true] %s2706_s1 }
 0x894   :  { %s3458_s6 = scalar_lea.vmem %s2707_s1, 1024  ;;  %p3463_p11 = scmp.lt.s32.totalorder %s2707_s1, %s2707_s1 }
 0x895   :  { %p3459_p10 = scmp.ne.s32.totalorder %s2707_s1, %s3458_s6  ;;  %p3464_p12 = scmp.lt.s32.totalorder %s3458_s6, %s3458_s6 }
 0x897   :  { %p3465_p13 = por %p3464_p12, %p3463_p11 }
 0x899   :  { %p3466_p0 = pnand %p3465_p13, %p3459_p10 }
 0x89a   :  { %v3232_v21 = vpop.eup %3231 }
 0x89b   :  { %v3234_v0 = vpop.eup %3233  ;;  %v2655_v19 = vmul.f32 %v3232_v21, %v3230_v40 }
 0x89c   :  { %v2654_v2 = vmul.f32 %v3234_v0, %v4817_v31 }
 0x89d   :  { %v3236_v39 = vpop.eup %3235 }
 0x89e   :  { %v2656_v57 = vadd.f32 %v2655_v19, %v2654_v2 }
 0x8a0   :  { %3237 = vtanh.f32 %v2656_v57 }
 0x8aa   :  { %v3238_v47 = vpop.eup %3237 }
 0x8ab   :  { %v2658_v55 = vmul.f32 %v3238_v47, %v3236_v39 }
 0x8ad   :  { %v2676_v4 = vsel %vm2675_vm1, %v2658_v55, %v4835_v9 }
 0x8ae   :  { %2680 = vst [vmem:[#allocation13] sm:$0xff] %v2676_v4 }
 0x8af   :  { %3469 = shalt.err (!%p3466_p0)
}
 0x8b0   :  { %s3470_s0 = scalar_lea.hbm %s4889_s7, 1024 }
 0x8b1   :  { %p3471_p1 = scmp.ne.s32.totalorder %s4889_s7, %s3470_s0  ;;  %p3474_p2 = scmp.lt.u32.totalorder %s3470_s0, %s4889_s7 }
 0x8b3   :  { %p3476_p3 = pnand %p3474_p2, %p3471_p1 }
 0x8b5   :  { %3479 = shalt.err (!%p3476_p3)
}
 0x8b6   :  { %2712 = dma.vmem_to_hbm [thread:$0]  %s2707_s1, 1024, %s4889_s7, [#allocation14], %s3496_s9, %s3496_s9, %s3497_s10  }
 0x8b7   :  { %3484 = dma.done.wait [#allocation8], 1024  }
 0x8b8   :  { %3485 = vsyncadd [#allocation8], 4294966272 }
 0x8b9   :  { %3486 = dma.done.wait [#allocation14], 1024  }
 0x8ba   :  { %3487 = vsyncadd [#allocation14], 4294966272 }
 0x8bb   :  { %2719 = vsyncpa [#allocation7], 1 }
 0x8bc   :  { %2720 = vsyncpa [#allocation10], 1 }
 0x8bd   :  { %2721 = vsyncpa [#allocation8], 1 }
 0x8be   :  { %2722 = vsyncpa [#allocation14], 1 }

</bundles_post_ra>
